<compile_context>
chip_gen: v7x
topology: tpu7x:2x2x1
jax: 0.10.0
libtpu: 0.0.40
codegen_flags: <defaults>
</compile_context>

<pallas_src>
import functools

import jax
import jax.numpy as jnp
from jax.experimental import pallas as pl
from jax.experimental.pallas import tpu as pltpu


HP = 128  # padded per-gate lane width (one full vreg lane extent)


def _lstm_cell(gates, h, c):
    """gates: [1, 4*HP] packed as (i, f, o | g). Padded lanes stay exactly 0."""
    sig = 0.5 * jnp.tanh(0.5 * gates[:, : 3 * HP]) + 0.5   # one EUP op for i, f, o
    i_g = sig[:, 0 * HP:1 * HP]
    f_g = sig[:, 1 * HP:2 * HP]
    o_g = sig[:, 2 * HP:3 * HP]
    g_g = jnp.tanh(gates[:, 3 * HP:4 * HP])
    c_new = f_g * c + i_g * g_g
    h_new = o_g * jnp.tanh(c_new)
    return h_new, c_new


def encoder_kernel(x_ref, wih1_ref, whh1_ref, b1_ref, wih2_ref, whh2_ref, b2_ref,
                   hn_ref, y1_sc, gx_sc, *, T):
    """Fused 2-layer LSTM encoder (batch = 1, time-major).

    x_ref    : [T, n_in]       input sequence
    wih*_ref : [in_pad, 4*HP]  input->gates weights (gate-padded, (i,f,o,g) order)
    whh*_ref : [HP, 4*HP]      hidden->gates weights (row- and gate-padded)
    b*_ref   : [1, 4*HP]       bias_ih + bias_hh (gate-padded)
    hn_ref   : [1, HP]         final layer-2 hidden state (lane-padded)
    y1_sc    : [T, HP]         layer-1 hidden states (VMEM scratch)
    gx_sc    : [T, 4*HP]       hoisted input-projection gates (VMEM scratch)
    """
    zeros = jnp.zeros((1, HP), jnp.float32)

    # ---- layer 1: hoist input projection + bias for all T steps at once ----
    gx_sc[...] = (
        jnp.dot(x_ref[...], wih1_ref[...], preferred_element_type=jnp.float32)
        + b1_ref[...]
    )

    def step1(t, carry):
        h, c = carry
        gates = gx_sc[pl.ds(t, 1), :] + jnp.dot(
            h, whh1_ref[...], preferred_element_type=jnp.float32)
        h, c = _lstm_cell(gates, h, c)
        y1_sc[pl.ds(t, 1), :] = h                      # lane-dense [1, 128] store
        return (h, c)

    jax.lax.fori_loop(0, T, step1, (zeros, zeros), unroll=True)

    # ---- layer 2: hoisted input projection over layer-1 outputs ----
    gx_sc[...] = (
        jnp.dot(y1_sc[...], wih2_ref[...], preferred_element_type=jnp.float32)
        + b2_ref[...]
    )

    def step2(t, carry):
        h, c = carry
        gates = gx_sc[pl.ds(t, 1), :] + jnp.dot(
            h, whh2_ref[...], preferred_element_type=jnp.float32)
        return _lstm_cell(gates, h, c)

    h2, _ = jax.lax.fori_loop(0, T, step2, (zeros, zeros), unroll=True)
    hn_ref[...] = h2


def encoder_pallas(x, wih1, whh1, b1, wih2, whh2, b2):
    """Single fused pallas_call over the whole (tiny) problem; everything VMEM-resident."""
    T, n_in = x.shape
    kernel = functools.partial(encoder_kernel, T=T)
    hn = pl.pallas_call(
        kernel,
        out_shape=jax.ShapeDtypeStruct((1, HP), jnp.float32),
        in_specs=[
            pl.BlockSpec((T, n_in), lambda: (0, 0)),
            pl.BlockSpec((wih1.shape[0], 4 * HP), lambda: (0, 0)),
            pl.BlockSpec((HP, 4 * HP), lambda: (0, 0)),
            pl.BlockSpec((1, 4 * HP), lambda: (0, 0)),
            pl.BlockSpec((HP, 4 * HP), lambda: (0, 0)),
            pl.BlockSpec((HP, 4 * HP), lambda: (0, 0)),
            pl.BlockSpec((1, 4 * HP), lambda: (0, 0)),
        ],
        out_specs=pl.BlockSpec((1, HP), lambda: (0, 0)),
        scratch_shapes=[
            pltpu.VMEM((T, HP), jnp.float32),        # layer-1 hidden sequence
            pltpu.VMEM((T, 4 * HP), jnp.float32),    # hoisted input-projection gates
        ],
    )(x, wih1, whh1, b1, wih2, whh2, b2)
    return hn


# ------------------------- parameter handling -------------------------------

def init_lstm_params(key, n_in, hidden):
    """Deterministic init mimicking PyTorch's uniform(-1/sqrt(H), 1/sqrt(H)).
    Weights stored transposed vs. PyTorch ([in, 4H]), gate order (i, f, g, o)."""
    k1, k2, k3, k4 = jax.random.split(key, 4)
    bound = 1.0 / jnp.sqrt(jnp.float32(hidden))
    w_ih = jax.random.uniform(k1, (n_in, 4 * hidden), jnp.float32, -bound, bound)
    w_hh = jax.random.uniform(k2, (hidden, 4 * hidden), jnp.float32, -bound, bound)
    b_ih = jax.random.uniform(k3, (1, 4 * hidden), jnp.float32, -bound, bound)
    b_hh = jax.random.uniform(k4, (1, 4 * hidden), jnp.float32, -bound, bound)
    return w_ih, w_hh, b_ih + b_hh


def pack_lstm_params(w_ih, w_hh, b, *, hidden, in_pad):
    """Reorder gate columns (i,f,g,o)->(i,f,o,g), pad each gate block to HP=128
    lanes, and zero-pad the contraction (input / hidden) dimensions."""
    H = hidden

    def pack_cols(w):
        out = jnp.zeros((w.shape[0], 4 * HP), jnp.float32)
        for dst, src in enumerate((0, 1, 3, 2)):          # (i, f, o, g)
            out = out.at[:, dst * HP: dst * HP + H].set(w[:, src * H:(src + 1) * H])
        return out

    wih = pack_cols(w_ih)
    if in_pad > wih.shape[0]:
        wih = jnp.zeros((in_pad, 4 * HP), jnp.float32).at[: w_ih.shape[0]].set(wih)
    whh = jnp.zeros((HP, 4 * HP), jnp.float32).at[:H].set(pack_cols(w_hh))
    bias = pack_cols(b)
    return wih, whh, bias


def pack_encoder_params(layer1, layer2, hidden_dim, embedding_dim):
    w_ih1, w_hh1, b1 = layer1
    w_ih2, w_hh2, b2 = layer2
    p1 = pack_lstm_params(w_ih1, w_hh1, b1, hidden=hidden_dim, in_pad=w_ih1.shape[0])
    p2 = pack_lstm_params(w_ih2, w_hh2, b2, hidden=embedding_dim, in_pad=HP)
    return (*p1, *p2)


# ------------------------------ forward -------------------------------------

def encoder_forward(x, packed_params, seq_len, n_features, embedding_dim):
    """Mirror of Encoder.forward (batch = 1 folded out)."""
    x = x.reshape((seq_len, n_features)).astype(jnp.float32)
    hn = encoder_pallas(x, *packed_params)                 # [1, HP]
    return hn[:, :embedding_dim].reshape((n_features, embedding_dim))


def reference_forward(x, raw_params, seq_len, n_features, embedding_dim):
    """Pure-JAX reference (PyTorch gate order, standard sigmoid)."""
    x = x.reshape((seq_len, n_features)).astype(jnp.float32)

    def run_layer(xs, w_ih, w_hh, b):
        H = w_hh.shape[0]

        def step(carry, x_t):
            h, c = carry
            gates = x_t[None, :] @ w_ih + h @ w_hh + b
            i = jax.nn.sigmoid(gates[:, 0 * H:1 * H])
            f = jax.nn.sigmoid(gates[:, 1 * H:2 * H])
            g = jnp.tanh(gates[:, 2 * H:3 * H])
            o = jax.nn.sigmoid(gates[:, 3 * H:4 * H])
            c = f * c + i * g
            h = o * jnp.tanh(c)
            return (h, c), h[0]

        init = (jnp.zeros((1, H), jnp.float32), jnp.zeros((1, H), jnp.float32))
        (h, _), ys = jax.lax.scan(step, init, xs)
        return ys, h

    (w_ih1, w_hh1, b1), (w_ih2, w_hh2, b2) = raw_params
    y1, _ = run_layer(x, w_ih1, w_hh1, b1)
    _, hn = run_layer(y1, w_ih2, w_hh2, b2)
    return hn.reshape((n_features, embedding_dim))


if __name__ == "__main__":
    seq_len = 8
    n_features = 1          # must be 1 for the module's final reshape to be valid
    embedding_dim = 32
    hidden_dim = 2 * embedding_dim

    key = jax.random.PRNGKey(0)
    k_x, k_l1, k_l2 = jax.random.split(key, 3)

    x = jax.random.normal(k_x, (seq_len, n_features), dtype=jnp.float32)
    raw1 = init_lstm_params(k_l1, n_features, hidden_dim)     # rnn1
    raw2 = init_lstm_params(k_l2, hidden_dim, embedding_dim)  # rnn2
    packed = pack_encoder_params(raw1, raw2, hidden_dim, embedding_dim)

    out = encoder_forward(x, packed, seq_len, n_features, embedding_dim)
    out = jax.block_until_ready(out)

    ref = reference_forward(x, (raw1, raw2), seq_len, n_features, embedding_dim)
    ref = jax.block_until_ready(ref)

    assert out.shape == (n_features, embedding_dim)
    assert jnp.allclose(out, ref, atol=1e-4, rtol=1e-4), float(jnp.max(jnp.abs(out - ref)))

    print("KERNEL_OK")
</pallas_src>

<mosaic_0001>
module attributes {stable_mosaic.version = 11 : i64} {
  func.func @encoder_kernel(%arg0: memref<8x1xf32, #tpu.memory_space<vmem>>, %arg1: memref<1x512xf32, #tpu.memory_space<vmem>>, %arg2: memref<128x512xf32, #tpu.memory_space<vmem>>, %arg3: memref<1x512xf32, #tpu.memory_space<vmem>>, %arg4: memref<128x512xf32, #tpu.memory_space<vmem>>, %arg5: memref<128x512xf32, #tpu.memory_space<vmem>>, %arg6: memref<1x512xf32, #tpu.memory_space<vmem>>, %arg7: memref<1x128xf32, #tpu.memory_space<vmem>>, %arg8: memref<8x128xf32, #tpu.memory_space<vmem>>, %arg9: memref<8x512xf32, #tpu.memory_space<vmem>>) attributes {dimension_semantics = [], scalar_prefetch = 0 : i64, scratch_operands = 2 : i64, tpu.core_type = #tpu.core_type<tc>} {
    %cst = arith.constant 0.000000e+00 : f32
    %0 = vector.broadcast %cst : f32 to vector<1x128xf32>
    %c0 = arith.constant 0 : index
    %c0_0 = arith.constant 0 : index
    %1 = vector.load %arg0[%c0, %c0_0] : memref<8x1xf32, #tpu.memory_space<vmem>>, vector<8x1xf32>
    %c0_1 = arith.constant 0 : index
    %c0_2 = arith.constant 0 : index
    %2 = vector.load %arg1[%c0_1, %c0_2] : memref<1x512xf32, #tpu.memory_space<vmem>>, vector<1x512xf32>
    %cst_3 = arith.constant dense<0.000000e+00> : vector<8x512xf32>
    %3 = tpu.matmul %1, %2, %cst_3 {dimension_numbers = #tpu.dot_dimension_numbers<[1], [0], [0], [1], [0, 0, 1, 1], [], []>} : vector<8x1xf32>, vector<1x512xf32>, vector<8x512xf32> -> vector<8x512xf32>
    %c0_4 = arith.constant 0 : index
    %c0_5 = arith.constant 0 : index
    %4 = vector.load %arg3[%c0_4, %c0_5] : memref<1x512xf32, #tpu.memory_space<vmem>>, vector<1x512xf32>
    %5 = vector.broadcast %4 : vector<1x512xf32> to vector<8x512xf32>
    %6 = arith.addf %3, %5 : vector<8x512xf32>
    %c0_6 = arith.constant 0 : index
    %c0_7 = arith.constant 0 : index
    %7 = vector.load %arg9[%c0_6, %c0_7] : memref<8x512xf32, #tpu.memory_space<vmem>>, vector<8x512xf32>
    tpu.vector_store %arg9[%c0_6, %c0_7], %6 {strides = array<i32>} : memref<8x512xf32, #tpu.memory_space<vmem>>, vector<8x512xf32>,
    %c0_i32 = arith.constant 0 : i32
    %8 = arith.index_cast %c0_i32 : i32 to index
    %c0_8 = arith.constant 0 : index
    %9 = vector.load %arg9[%8, %c0_8] : memref<8x512xf32, #tpu.memory_space<vmem>>, vector<1x512xf32>
    %c0_9 = arith.constant 0 : index
    %c0_10 = arith.constant 0 : index
    %10 = vector.load %arg2[%c0_9, %c0_10] : memref<128x512xf32, #tpu.memory_space<vmem>>, vector<128x512xf32>
    %cst_11 = arith.constant dense<0.000000e+00> : vector<1x512xf32>
    %11 = tpu.matmul %0, %10, %cst_11 {dimension_numbers = #tpu.dot_dimension_numbers<[1], [0], [0], [1], [0, 0, 1, 1], [], []>} : vector<1x128xf32>, vector<128x512xf32>, vector<1x512xf32> -> vector<1x512xf32>
    %12 = arith.addf %9, %11 : vector<1x512xf32>
    %13 = vector.extract_strided_slice %12 {offsets = [0, 0], sizes = [1, 384], strides = [1, 1]} : vector<1x512xf32> to vector<1x384xf32>
    %cst_12 = arith.constant 5.000000e-01 : f32
    %14 = vector.broadcast %cst_12 : f32 to vector<1x384xf32>
    %15 = arith.mulf %14, %13 : vector<1x384xf32>
    %16 = math.tanh %15 : vector<1x384xf32>
    %cst_13 = arith.constant 5.000000e-01 : f32
    %17 = vector.broadcast %cst_13 : f32 to vector<1x384xf32>
    %18 = arith.mulf %17, %16 : vector<1x384xf32>
    %cst_14 = arith.constant 5.000000e-01 : f32
    %19 = vector.broadcast %cst_14 : f32 to vector<1x384xf32>
    %20 = arith.addf %18, %19 : vector<1x384xf32>
    %21 = vector.extract_strided_slice %20 {offsets = [0, 0], sizes = [1, 128], strides = [1, 1]} : vector<1x384xf32> to vector<1x128xf32>
    %22 = vector.extract_strided_slice %20 {offsets = [0, 128], sizes = [1, 128], strides = [1, 1]} : vector<1x384xf32> to vector<1x128xf32>
    %23 = vector.extract_strided_slice %20 {offsets = [0, 256], sizes = [1, 128], strides = [1, 1]} : vector<1x384xf32> to vector<1x128xf32>
    %24 = vector.extract_strided_slice %12 {offsets = [0, 384], sizes = [1, 128], strides = [1, 1]} : vector<1x512xf32> to vector<1x128xf32>
    %25 = math.tanh %24 : vector<1x128xf32>
    %26 = arith.mulf %22, %0 : vector<1x128xf32>
    %27 = arith.mulf %21, %25 : vector<1x128xf32>
    %28 = arith.addf %26, %27 : vector<1x128xf32>
    %29 = math.tanh %28 : vector<1x128xf32>
    %30 = arith.mulf %23, %29 : vector<1x128xf32>
    %31 = arith.index_cast %c0_i32 : i32 to index
    %c0_15 = arith.constant 0 : index
    %32 = vector.load %arg8[%31, %c0_15] : memref<8x128xf32, #tpu.memory_space<vmem>>, vector<1x128xf32>
    tpu.vector_store %arg8[%31, %c0_15], %30 {strides = array<i32>} : memref<8x128xf32, #tpu.memory_space<vmem>>, vector<1x128xf32>,
    %c1_i32 = arith.constant 1 : i32
    %33 = arith.index_cast %c1_i32 : i32 to index
    %c0_16 = arith.constant 0 : index
    %34 = vector.load %arg9[%33, %c0_16] : memref<8x512xf32, #tpu.memory_space<vmem>>, vector<1x512xf32>
    %c0_17 = arith.constant 0 : index
    %c0_18 = arith.constant 0 : index
    %35 = vector.load %arg2[%c0_17, %c0_18] : memref<128x512xf32, #tpu.memory_space<vmem>>, vector<128x512xf32>
    %cst_19 = arith.constant dense<0.000000e+00> : vector<1x512xf32>
    %36 = tpu.matmul %30, %35, %cst_19 {dimension_numbers = #tpu.dot_dimension_numbers<[1], [0], [0], [1], [0, 0, 1, 1], [], []>} : vector<1x128xf32>, vector<128x512xf32>, vector<1x512xf32> -> vector<1x512xf32>
    %37 = arith.addf %34, %36 : vector<1x512xf32>
    %38 = vector.extract_strided_slice %37 {offsets = [0, 0], sizes = [1, 384], strides = [1, 1]} : vector<1x512xf32> to vector<1x384xf32>
    %cst_20 = arith.constant 5.000000e-01 : f32
    %39 = vector.broadcast %cst_20 : f32 to vector<1x384xf32>
    %40 = arith.mulf %39, %38 : vector<1x384xf32>
    %41 = math.tanh %40 : vector<1x384xf32>
    %cst_21 = arith.constant 5.000000e-01 : f32
    %42 = vector.broadcast %cst_21 : f32 to vector<1x384xf32>
    %43 = arith.mulf %42, %41 : vector<1x384xf32>
    %cst_22 = arith.constant 5.000000e-01 : f32
    %44 = vector.broadcast %cst_22 : f32 to vector<1x384xf32>
    %45 = arith.addf %43, %44 : vector<1x384xf32>
    %46 = vector.extract_strided_slice %45 {offsets = [0, 0], sizes = [1, 128], strides = [1, 1]} : vector<1x384xf32> to vector<1x128xf32>
    %47 = vector.extract_strided_slice %45 {offsets = [0, 128], sizes = [1, 128], strides = [1, 1]} : vector<1x384xf32> to vector<1x128xf32>
    %48 = vector.extract_strided_slice %45 {offsets = [0, 256], sizes = [1, 128], strides = [1, 1]} : vector<1x384xf32> to vector<1x128xf32>
    %49 = vector.extract_strided_slice %37 {offsets = [0, 384], sizes = [1, 128], strides = [1, 1]} : vector<1x512xf32> to vector<1x128xf32>
    %50 = math.tanh %49 : vector<1x128xf32>
    %51 = arith.mulf %47, %28 : vector<1x128xf32>
    %52 = arith.mulf %46, %50 : vector<1x128xf32>
    %53 = arith.addf %51, %52 : vector<1x128xf32>
    %54 = math.tanh %53 : vector<1x128xf32>
    %55 = arith.mulf %48, %54 : vector<1x128xf32>
    %56 = arith.index_cast %c1_i32 : i32 to index
    %c0_23 = arith.constant 0 : index
    %57 = vector.load %arg8[%56, %c0_23] : memref<8x128xf32, #tpu.memory_space<vmem>>, vector<1x128xf32>
    tpu.vector_store %arg8[%56, %c0_23], %55 {strides = array<i32>} : memref<8x128xf32, #tpu.memory_space<vmem>>, vector<1x128xf32>,
    %c2_i32 = arith.constant 2 : i32
    %58 = arith.index_cast %c2_i32 : i32 to index
    %c0_24 = arith.constant 0 : index
    %59 = vector.load %arg9[%58, %c0_24] : memref<8x512xf32, #tpu.memory_space<vmem>>, vector<1x512xf32>
    %c0_25 = arith.constant 0 : index
    %c0_26 = arith.constant 0 : index
    %60 = vector.load %arg2[%c0_25, %c0_26] : memref<128x512xf32, #tpu.memory_space<vmem>>, vector<128x512xf32>
    %cst_27 = arith.constant dense<0.000000e+00> : vector<1x512xf32>
    %61 = tpu.matmul %55, %60, %cst_27 {dimension_numbers = #tpu.dot_dimension_numbers<[1], [0], [0], [1], [0, 0, 1, 1], [], []>} : vector<1x128xf32>, vector<128x512xf32>, vector<1x512xf32> -> vector<1x512xf32>
    %62 = arith.addf %59, %61 : vector<1x512xf32>
    %63 = vector.extract_strided_slice %62 {offsets = [0, 0], sizes = [1, 384], strides = [1, 1]} : vector<1x512xf32> to vector<1x384xf32>
    %cst_28 = arith.constant 5.000000e-01 : f32
    %64 = vector.broadcast %cst_28 : f32 to vector<1x384xf32>
    %65 = arith.mulf %64, %63 : vector<1x384xf32>
    %66 = math.tanh %65 : vector<1x384xf32>
    %cst_29 = arith.constant 5.000000e-01 : f32
    %67 = vector.broadcast %cst_29 : f32 to vector<1x384xf32>
    %68 = arith.mulf %67, %66 : vector<1x384xf32>
    %cst_30 = arith.constant 5.000000e-01 : f32
    %69 = vector.broadcast %cst_30 : f32 to vector<1x384xf32>
    %70 = arith.addf %68, %69 : vector<1x384xf32>
    %71 = vector.extract_strided_slice %70 {offsets = [0, 0], sizes = [1, 128], strides = [1, 1]} : vector<1x384xf32> to vector<1x128xf32>
    %72 = vector.extract_strided_slice %70 {offsets = [0, 128], sizes = [1, 128], strides = [1, 1]} : vector<1x384xf32> to vector<1x128xf32>
    %73 = vector.extract_strided_slice %70 {offsets = [0, 256], sizes = [1, 128], strides = [1, 1]} : vector<1x384xf32> to vector<1x128xf32>
    %74 = vector.extract_strided_slice %62 {offsets = [0, 384], sizes = [1, 128], strides = [1, 1]} : vector<1x512xf32> to vector<1x128xf32>
    %75 = math.tanh %74 : vector<1x128xf32>
    %76 = arith.mulf %72, %53 : vector<1x128xf32>
    %77 = arith.mulf %71, %75 : vector<1x128xf32>
    %78 = arith.addf %76, %77 : vector<1x128xf32>
    %79 = math.tanh %78 : vector<1x128xf32>
    %80 = arith.mulf %73, %79 : vector<1x128xf32>
    %81 = arith.index_cast %c2_i32 : i32 to index
    %c0_31 = arith.constant 0 : index
    %82 = vector.load %arg8[%81, %c0_31] : memref<8x128xf32, #tpu.memory_space<vmem>>, vector<1x128xf32>
    tpu.vector_store %arg8[%81, %c0_31], %80 {strides = array<i32>} : memref<8x128xf32, #tpu.memory_space<vmem>>, vector<1x128xf32>,
    %c3_i32 = arith.constant 3 : i32
    %83 = arith.index_cast %c3_i32 : i32 to index
    %c0_32 = arith.constant 0 : index
    %84 = vector.load %arg9[%83, %c0_32] : memref<8x512xf32, #tpu.memory_space<vmem>>, vector<1x512xf32>
    %c0_33 = arith.constant 0 : index
    %c0_34 = arith.constant 0 : index
    %85 = vector.load %arg2[%c0_33, %c0_34] : memref<128x512xf32, #tpu.memory_space<vmem>>, vector<128x512xf32>
    %cst_35 = arith.constant dense<0.000000e+00> : vector<1x512xf32>
    %86 = tpu.matmul %80, %85, %cst_35 {dimension_numbers = #tpu.dot_dimension_numbers<[1], [0], [0], [1], [0, 0, 1, 1], [], []>} : vector<1x128xf32>, vector<128x512xf32>, vector<1x512xf32> -> vector<1x512xf32>
    %87 = arith.addf %84, %86 : vector<1x512xf32>
    %88 = vector.extract_strided_slice %87 {offsets = [0, 0], sizes = [1, 384], strides = [1, 1]} : vector<1x512xf32> to vector<1x384xf32>
    %cst_36 = arith.constant 5.000000e-01 : f32
    %89 = vector.broadcast %cst_36 : f32 to vector<1x384xf32>
    %90 = arith.mulf %89, %88 : vector<1x384xf32>
    %91 = math.tanh %90 : vector<1x384xf32>
    %cst_37 = arith.constant 5.000000e-01 : f32
    %92 = vector.broadcast %cst_37 : f32 to vector<1x384xf32>
    %93 = arith.mulf %92, %91 : vector<1x384xf32>
    %cst_38 = arith.constant 5.000000e-01 : f32
    %94 = vector.broadcast %cst_38 : f32 to vector<1x384xf32>
    %95 = arith.addf %93, %94 : vector<1x384xf32>
    %96 = vector.extract_strided_slice %95 {offsets = [0, 0], sizes = [1, 128], strides = [1, 1]} : vector<1x384xf32> to vector<1x128xf32>
    %97 = vector.extract_strided_slice %95 {offsets = [0, 128], sizes = [1, 128], strides = [1, 1]} : vector<1x384xf32> to vector<1x128xf32>
    %98 = vector.extract_strided_slice %95 {offsets = [0, 256], sizes = [1, 128], strides = [1, 1]} : vector<1x384xf32> to vector<1x128xf32>
    %99 = vector.extract_strided_slice %87 {offsets = [0, 384], sizes = [1, 128], strides = [1, 1]} : vector<1x512xf32> to vector<1x128xf32>
    %100 = math.tanh %99 : vector<1x128xf32>
    %101 = arith.mulf %97, %78 : vector<1x128xf32>
    %102 = arith.mulf %96, %100 : vector<1x128xf32>
    %103 = arith.addf %101, %102 : vector<1x128xf32>
    %104 = math.tanh %103 : vector<1x128xf32>
    %105 = arith.mulf %98, %104 : vector<1x128xf32>
    %106 = arith.index_cast %c3_i32 : i32 to index
    %c0_39 = arith.constant 0 : index
    %107 = vector.load %arg8[%106, %c0_39] : memref<8x128xf32, #tpu.memory_space<vmem>>, vector<1x128xf32>
    tpu.vector_store %arg8[%106, %c0_39], %105 {strides = array<i32>} : memref<8x128xf32, #tpu.memory_space<vmem>>, vector<1x128xf32>,
    %c4_i32 = arith.constant 4 : i32
    %108 = arith.index_cast %c4_i32 : i32 to index
    %c0_40 = arith.constant 0 : index
    %109 = vector.load %arg9[%108, %c0_40] : memref<8x512xf32, #tpu.memory_space<vmem>>, vector<1x512xf32>
    %c0_41 = arith.constant 0 : index
    %c0_42 = arith.constant 0 : index
    %110 = vector.load %arg2[%c0_41, %c0_42] : memref<128x512xf32, #tpu.memory_space<vmem>>, vector<128x512xf32>
    %cst_43 = arith.constant dense<0.000000e+00> : vector<1x512xf32>
    %111 = tpu.matmul %105, %110, %cst_43 {dimension_numbers = #tpu.dot_dimension_numbers<[1], [0], [0], [1], [0, 0, 1, 1], [], []>} : vector<1x128xf32>, vector<128x512xf32>, vector<1x512xf32> -> vector<1x512xf32>
    %112 = arith.addf %109, %111 : vector<1x512xf32>
    %113 = vector.extract_strided_slice %112 {offsets = [0, 0], sizes = [1, 384], strides = [1, 1]} : vector<1x512xf32> to vector<1x384xf32>
    %cst_44 = arith.constant 5.000000e-01 : f32
    %114 = vector.broadcast %cst_44 : f32 to vector<1x384xf32>
    %115 = arith.mulf %114, %113 : vector<1x384xf32>
    %116 = math.tanh %115 : vector<1x384xf32>
    %cst_45 = arith.constant 5.000000e-01 : f32
    %117 = vector.broadcast %cst_45 : f32 to vector<1x384xf32>
    %118 = arith.mulf %117, %116 : vector<1x384xf32>
    %cst_46 = arith.constant 5.000000e-01 : f32
    %119 = vector.broadcast %cst_46 : f32 to vector<1x384xf32>
    %120 = arith.addf %118, %119 : vector<1x384xf32>
    %121 = vector.extract_strided_slice %120 {offsets = [0, 0], sizes = [1, 128], strides = [1, 1]} : vector<1x384xf32> to vector<1x128xf32>
    %122 = vector.extract_strided_slice %120 {offsets = [0, 128], sizes = [1, 128], strides = [1, 1]} : vector<1x384xf32> to vector<1x128xf32>
    %123 = vector.extract_strided_slice %120 {offsets = [0, 256], sizes = [1, 128], strides = [1, 1]} : vector<1x384xf32> to vector<1x128xf32>
    %124 = vector.extract_strided_slice %112 {offsets = [0, 384], sizes = [1, 128], strides = [1, 1]} : vector<1x512xf32> to vector<1x128xf32>
    %125 = math.tanh %124 : vector<1x128xf32>
    %126 = arith.mulf %122, %103 : vector<1x128xf32>
    %127 = arith.mulf %121, %125 : vector<1x128xf32>
    %128 = arith.addf %126, %127 : vector<1x128xf32>
    %129 = math.tanh %128 : vector<1x128xf32>
    %130 = arith.mulf %123, %129 : vector<1x128xf32>
    %131 = arith.index_cast %c4_i32 : i32 to index
    %c0_47 = arith.constant 0 : index
    %132 = vector.load %arg8[%131, %c0_47] : memref<8x128xf32, #tpu.memory_space<vmem>>, vector<1x128xf32>
    tpu.vector_store %arg8[%131, %c0_47], %130 {strides = array<i32>} : memref<8x128xf32, #tpu.memory_space<vmem>>, vector<1x128xf32>,
    %c5_i32 = arith.constant 5 : i32
    %133 = arith.index_cast %c5_i32 : i32 to index
    %c0_48 = arith.constant 0 : index
    %134 = vector.load %arg9[%133, %c0_48] : memref<8x512xf32, #tpu.memory_space<vmem>>, vector<1x512xf32>
    %c0_49 = arith.constant 0 : index
    %c0_50 = arith.constant 0 : index
    %135 = vector.load %arg2[%c0_49, %c0_50] : memref<128x512xf32, #tpu.memory_space<vmem>>, vector<128x512xf32>
    %cst_51 = arith.constant dense<0.000000e+00> : vector<1x512xf32>
    %136 = tpu.matmul %130, %135, %cst_51 {dimension_numbers = #tpu.dot_dimension_numbers<[1], [0], [0], [1], [0, 0, 1, 1], [], []>} : vector<1x128xf32>, vector<128x512xf32>, vector<1x512xf32> -> vector<1x512xf32>
    %137 = arith.addf %134, %136 : vector<1x512xf32>
    %138 = vector.extract_strided_slice %137 {offsets = [0, 0], sizes = [1, 384], strides = [1, 1]} : vector<1x512xf32> to vector<1x384xf32>
    %cst_52 = arith.constant 5.000000e-01 : f32
    %139 = vector.broadcast %cst_52 : f32 to vector<1x384xf32>
    %140 = arith.mulf %139, %138 : vector<1x384xf32>
    %141 = math.tanh %140 : vector<1x384xf32>
    %cst_53 = arith.constant 5.000000e-01 : f32
    %142 = vector.broadcast %cst_53 : f32 to vector<1x384xf32>
    %143 = arith.mulf %142, %141 : vector<1x384xf32>
    %cst_54 = arith.constant 5.000000e-01 : f32
    %144 = vector.broadcast %cst_54 : f32 to vector<1x384xf32>
    %145 = arith.addf %143, %144 : vector<1x384xf32>
    %146 = vector.extract_strided_slice %145 {offsets = [0, 0], sizes = [1, 128], strides = [1, 1]} : vector<1x384xf32> to vector<1x128xf32>
    %147 = vector.extract_strided_slice %145 {offsets = [0, 128], sizes = [1, 128], strides = [1, 1]} : vector<1x384xf32> to vector<1x128xf32>
    %148 = vector.extract_strided_slice %145 {offsets = [0, 256], sizes = [1, 128], strides = [1, 1]} : vector<1x384xf32> to vector<1x128xf32>
    %149 = vector.extract_strided_slice %137 {offsets = [0, 384], sizes = [1, 128], strides = [1, 1]} : vector<1x512xf32> to vector<1x128xf32>
    %150 = math.tanh %149 : vector<1x128xf32>
    %151 = arith.mulf %147, %128 : vector<1x128xf32>
    %152 = arith.mulf %146, %150 : vector<1x128xf32>
    %153 = arith.addf %151, %152 : vector<1x128xf32>
    %154 = math.tanh %153 : vector<1x128xf32>
    %155 = arith.mulf %148, %154 : vector<1x128xf32>
    %156 = arith.index_cast %c5_i32 : i32 to index
    %c0_55 = arith.constant 0 : index
    %157 = vector.load %arg8[%156, %c0_55] : memref<8x128xf32, #tpu.memory_space<vmem>>, vector<1x128xf32>
    tpu.vector_store %arg8[%156, %c0_55], %155 {strides = array<i32>} : memref<8x128xf32, #tpu.memory_space<vmem>>, vector<1x128xf32>,
    %c6_i32 = arith.constant 6 : i32
    %158 = arith.index_cast %c6_i32 : i32 to index
    %c0_56 = arith.constant 0 : index
    %159 = vector.load %arg9[%158, %c0_56] : memref<8x512xf32, #tpu.memory_space<vmem>>, vector<1x512xf32>
    %c0_57 = arith.constant 0 : index
    %c0_58 = arith.constant 0 : index
    %160 = vector.load %arg2[%c0_57, %c0_58] : memref<128x512xf32, #tpu.memory_space<vmem>>, vector<128x512xf32>
    %cst_59 = arith.constant dense<0.000000e+00> : vector<1x512xf32>
    %161 = tpu.matmul %155, %160, %cst_59 {dimension_numbers = #tpu.dot_dimension_numbers<[1], [0], [0], [1], [0, 0, 1, 1], [], []>} : vector<1x128xf32>, vector<128x512xf32>, vector<1x512xf32> -> vector<1x512xf32>
    %162 = arith.addf %159, %161 : vector<1x512xf32>
    %163 = vector.extract_strided_slice %162 {offsets = [0, 0], sizes = [1, 384], strides = [1, 1]} : vector<1x512xf32> to vector<1x384xf32>
    %cst_60 = arith.constant 5.000000e-01 : f32
    %164 = vector.broadcast %cst_60 : f32 to vector<1x384xf32>
    %165 = arith.mulf %164, %163 : vector<1x384xf32>
    %166 = math.tanh %165 : vector<1x384xf32>
    %cst_61 = arith.constant 5.000000e-01 : f32
    %167 = vector.broadcast %cst_61 : f32 to vector<1x384xf32>
    %168 = arith.mulf %167, %166 : vector<1x384xf32>
    %cst_62 = arith.constant 5.000000e-01 : f32
    %169 = vector.broadcast %cst_62 : f32 to vector<1x384xf32>
    %170 = arith.addf %168, %169 : vector<1x384xf32>
    %171 = vector.extract_strided_slice %170 {offsets = [0, 0], sizes = [1, 128], strides = [1, 1]} : vector<1x384xf32> to vector<1x128xf32>
    %172 = vector.extract_strided_slice %170 {offsets = [0, 128], sizes = [1, 128], strides = [1, 1]} : vector<1x384xf32> to vector<1x128xf32>
    %173 = vector.extract_strided_slice %170 {offsets = [0, 256], sizes = [1, 128], strides = [1, 1]} : vector<1x384xf32> to vector<1x128xf32>
    %174 = vector.extract_strided_slice %162 {offsets = [0, 384], sizes = [1, 128], strides = [1, 1]} : vector<1x512xf32> to vector<1x128xf32>
    %175 = math.tanh %174 : vector<1x128xf32>
    %176 = arith.mulf %172, %153 : vector<1x128xf32>
    %177 = arith.mulf %171, %175 : vector<1x128xf32>
    %178 = arith.addf %176, %177 : vector<1x128xf32>
    %179 = math.tanh %178 : vector<1x128xf32>
    %180 = arith.mulf %173, %179 : vector<1x128xf32>
    %181 = arith.index_cast %c6_i32 : i32 to index
    %c0_63 = arith.constant 0 : index
    %182 = vector.load %arg8[%181, %c0_63] : memref<8x128xf32, #tpu.memory_space<vmem>>, vector<1x128xf32>
    tpu.vector_store %arg8[%181, %c0_63], %180 {strides = array<i32>} : memref<8x128xf32, #tpu.memory_space<vmem>>, vector<1x128xf32>,
    %c7_i32 = arith.constant 7 : i32
    %183 = arith.index_cast %c7_i32 : i32 to index
    %c0_64 = arith.constant 0 : index
    %184 = vector.load %arg9[%183, %c0_64] : memref<8x512xf32, #tpu.memory_space<vmem>>, vector<1x512xf32>
    %c0_65 = arith.constant 0 : index
    %c0_66 = arith.constant 0 : index
    %185 = vector.load %arg2[%c0_65, %c0_66] : memref<128x512xf32, #tpu.memory_space<vmem>>, vector<128x512xf32>
    %cst_67 = arith.constant dense<0.000000e+00> : vector<1x512xf32>
    %186 = tpu.matmul %180, %185, %cst_67 {dimension_numbers = #tpu.dot_dimension_numbers<[1], [0], [0], [1], [0, 0, 1, 1], [], []>} : vector<1x128xf32>, vector<128x512xf32>, vector<1x512xf32> -> vector<1x512xf32>
    %187 = arith.addf %184, %186 : vector<1x512xf32>
    %188 = vector.extract_strided_slice %187 {offsets = [0, 0], sizes = [1, 384], strides = [1, 1]} : vector<1x512xf32> to vector<1x384xf32>
    %cst_68 = arith.constant 5.000000e-01 : f32
    %189 = vector.broadcast %cst_68 : f32 to vector<1x384xf32>
    %190 = arith.mulf %189, %188 : vector<1x384xf32>
    %191 = math.tanh %190 : vector<1x384xf32>
    %cst_69 = arith.constant 5.000000e-01 : f32
    %192 = vector.broadcast %cst_69 : f32 to vector<1x384xf32>
    %193 = arith.mulf %192, %191 : vector<1x384xf32>
    %cst_70 = arith.constant 5.000000e-01 : f32
    %194 = vector.broadcast %cst_70 : f32 to vector<1x384xf32>
    %195 = arith.addf %193, %194 : vector<1x384xf32>
    %196 = vector.extract_strided_slice %195 {offsets = [0, 0], sizes = [1, 128], strides = [1, 1]} : vector<1x384xf32> to vector<1x128xf32>
    %197 = vector.extract_strided_slice %195 {offsets = [0, 128], sizes = [1, 128], strides = [1, 1]} : vector<1x384xf32> to vector<1x128xf32>
    %198 = vector.extract_strided_slice %195 {offsets = [0, 256], sizes = [1, 128], strides = [1, 1]} : vector<1x384xf32> to vector<1x128xf32>
    %199 = vector.extract_strided_slice %187 {offsets = [0, 384], sizes = [1, 128], strides = [1, 1]} : vector<1x512xf32> to vector<1x128xf32>
    %200 = math.tanh %199 : vector<1x128xf32>
    %201 = arith.mulf %197, %178 : vector<1x128xf32>
    %202 = arith.mulf %196, %200 : vector<1x128xf32>
    %203 = arith.addf %201, %202 : vector<1x128xf32>
    %204 = math.tanh %203 : vector<1x128xf32>
    %205 = arith.mulf %198, %204 : vector<1x128xf32>
    %206 = arith.index_cast %c7_i32 : i32 to index
    %c0_71 = arith.constant 0 : index
    %207 = vector.load %arg8[%206, %c0_71] : memref<8x128xf32, #tpu.memory_space<vmem>>, vector<1x128xf32>
    tpu.vector_store %arg8[%206, %c0_71], %205 {strides = array<i32>} : memref<8x128xf32, #tpu.memory_space<vmem>>, vector<1x128xf32>,
    %c8_i32 = arith.constant 8 : i32
    %c0_72 = arith.constant 0 : index
    %c0_73 = arith.constant 0 : index
    %208 = vector.load %arg8[%c0_72, %c0_73] : memref<8x128xf32, #tpu.memory_space<vmem>>, vector<8x128xf32>
    %c0_74 = arith.constant 0 : index
    %c0_75 = arith.constant 0 : index
    %209 = vector.load %arg4[%c0_74, %c0_75] : memref<128x512xf32, #tpu.memory_space<vmem>>, vector<128x512xf32>
    %cst_76 = arith.constant dense<0.000000e+00> : vector<8x512xf32>
    %210 = tpu.matmul %208, %209, %cst_76 {dimension_numbers = #tpu.dot_dimension_numbers<[1], [0], [0], [1], [0, 0, 1, 1], [], []>} : vector<8x128xf32>, vector<128x512xf32>, vector<8x512xf32> -> vector<8x512xf32>
    %c0_77 = arith.constant 0 : index
    %c0_78 = arith.constant 0 : index
    %211 = vector.load %arg6[%c0_77, %c0_78] : memref<1x512xf32, #tpu.memory_space<vmem>>, vector<1x512xf32>
    %212 = vector.broadcast %211 : vector<1x512xf32> to vector<8x512xf32>
    %213 = arith.addf %210, %212 : vector<8x512xf32>
    %c0_79 = arith.constant 0 : index
    %c0_80 = arith.constant 0 : index
    %214 = vector.load %arg9[%c0_79, %c0_80] : memref<8x512xf32, #tpu.memory_space<vmem>>, vector<8x512xf32>
    tpu.vector_store %arg9[%c0_79, %c0_80], %213 {strides = array<i32>} : memref<8x512xf32, #tpu.memory_space<vmem>>, vector<8x512xf32>,
    %c0_i32_81 = arith.constant 0 : i32
    %215 = arith.index_cast %c0_i32_81 : i32 to index
    %c0_82 = arith.constant 0 : index
    %216 = vector.load %arg9[%215, %c0_82] : memref<8x512xf32, #tpu.memory_space<vmem>>, vector<1x512xf32>
    %c0_83 = arith.constant 0 : index
    %c0_84 = arith.constant 0 : index
    %217 = vector.load %arg5[%c0_83, %c0_84] : memref<128x512xf32, #tpu.memory_space<vmem>>, vector<128x512xf32>
    %cst_85 = arith.constant dense<0.000000e+00> : vector<1x512xf32>
    %218 = tpu.matmul %0, %217, %cst_85 {dimension_numbers = #tpu.dot_dimension_numbers<[1], [0], [0], [1], [0, 0, 1, 1], [], []>} : vector<1x128xf32>, vector<128x512xf32>, vector<1x512xf32> -> vector<1x512xf32>
    %219 = arith.addf %216, %218 : vector<1x512xf32>
    %220 = vector.extract_strided_slice %219 {offsets = [0, 0], sizes = [1, 384], strides = [1, 1]} : vector<1x512xf32> to vector<1x384xf32>
    %cst_86 = arith.constant 5.000000e-01 : f32
    %221 = vector.broadcast %cst_86 : f32 to vector<1x384xf32>
    %222 = arith.mulf %221, %220 : vector<1x384xf32>
    %223 = math.tanh %222 : vector<1x384xf32>
    %cst_87 = arith.constant 5.000000e-01 : f32
    %224 = vector.broadcast %cst_87 : f32 to vector<1x384xf32>
    %225 = arith.mulf %224, %223 : vector<1x384xf32>
    %cst_88 = arith.constant 5.000000e-01 : f32
    %226 = vector.broadcast %cst_88 : f32 to vector<1x384xf32>
    %227 = arith.addf %225, %226 : vector<1x384xf32>
    %228 = vector.extract_strided_slice %227 {offsets = [0, 0], sizes = [1, 128], strides = [1, 1]} : vector<1x384xf32> to vector<1x128xf32>
    %229 = vector.extract_strided_slice %227 {offsets = [0, 128], sizes = [1, 128], strides = [1, 1]} : vector<1x384xf32> to vector<1x128xf32>
    %230 = vector.extract_strided_slice %227 {offsets = [0, 256], sizes = [1, 128], strides = [1, 1]} : vector<1x384xf32> to vector<1x128xf32>
    %231 = vector.extract_strided_slice %219 {offsets = [0, 384], sizes = [1, 128], strides = [1, 1]} : vector<1x512xf32> to vector<1x128xf32>
    %232 = math.tanh %231 : vector<1x128xf32>
    %233 = arith.mulf %229, %0 : vector<1x128xf32>
    %234 = arith.mulf %228, %232 : vector<1x128xf32>
    %235 = arith.addf %233, %234 : vector<1x128xf32>
    %236 = math.tanh %235 : vector<1x128xf32>
    %237 = arith.mulf %230, %236 : vector<1x128xf32>
    %c1_i32_89 = arith.constant 1 : i32
    %238 = arith.index_cast %c1_i32_89 : i32 to index
    %c0_90 = arith.constant 0 : index
    %239 = vector.load %arg9[%238, %c0_90] : memref<8x512xf32, #tpu.memory_space<vmem>>, vector<1x512xf32>
    %c0_91 = arith.constant 0 : index
    %c0_92 = arith.constant 0 : index
    %240 = vector.load %arg5[%c0_91, %c0_92] : memref<128x512xf32, #tpu.memory_space<vmem>>, vector<128x512xf32>
    %cst_93 = arith.constant dense<0.000000e+00> : vector<1x512xf32>
    %241 = tpu.matmul %237, %240, %cst_93 {dimension_numbers = #tpu.dot_dimension_numbers<[1], [0], [0], [1], [0, 0, 1, 1], [], []>} : vector<1x128xf32>, vector<128x512xf32>, vector<1x512xf32> -> vector<1x512xf32>
    %242 = arith.addf %239, %241 : vector<1x512xf32>
    %243 = vector.extract_strided_slice %242 {offsets = [0, 0], sizes = [1, 384], strides = [1, 1]} : vector<1x512xf32> to vector<1x384xf32>
    %cst_94 = arith.constant 5.000000e-01 : f32
    %244 = vector.broadcast %cst_94 : f32 to vector<1x384xf32>
    %245 = arith.mulf %244, %243 : vector<1x384xf32>
    %246 = math.tanh %245 : vector<1x384xf32>
    %cst_95 = arith.constant 5.000000e-01 : f32
    %247 = vector.broadcast %cst_95 : f32 to vector<1x384xf32>
    %248 = arith.mulf %247, %246 : vector<1x384xf32>
    %cst_96 = arith.constant 5.000000e-01 : f32
    %249 = vector.broadcast %cst_96 : f32 to vector<1x384xf32>
    %250 = arith.addf %248, %249 : vector<1x384xf32>
    %251 = vector.extract_strided_slice %250 {offsets = [0, 0], sizes = [1, 128], strides = [1, 1]} : vector<1x384xf32> to vector<1x128xf32>
    %252 = vector.extract_strided_slice %250 {offsets = [0, 128], sizes = [1, 128], strides = [1, 1]} : vector<1x384xf32> to vector<1x128xf32>
    %253 = vector.extract_strided_slice %250 {offsets = [0, 256], sizes = [1, 128], strides = [1, 1]} : vector<1x384xf32> to vector<1x128xf32>
    %254 = vector.extract_strided_slice %242 {offsets = [0, 384], sizes = [1, 128], strides = [1, 1]} : vector<1x512xf32> to vector<1x128xf32>
    %255 = math.tanh %254 : vector<1x128xf32>
    %256 = arith.mulf %252, %235 : vector<1x128xf32>
    %257 = arith.mulf %251, %255 : vector<1x128xf32>
    %258 = arith.addf %256, %257 : vector<1x128xf32>
    %259 = math.tanh %258 : vector<1x128xf32>
    %260 = arith.mulf %253, %259 : vector<1x128xf32>
    %c2_i32_97 = arith.constant 2 : i32
    %261 = arith.index_cast %c2_i32_97 : i32 to index
    %c0_98 = arith.constant 0 : index
    %262 = vector.load %arg9[%261, %c0_98] : memref<8x512xf32, #tpu.memory_space<vmem>>, vector<1x512xf32>
    %c0_99 = arith.constant 0 : index
    %c0_100 = arith.constant 0 : index
    %263 = vector.load %arg5[%c0_99, %c0_100] : memref<128x512xf32, #tpu.memory_space<vmem>>, vector<128x512xf32>
    %cst_101 = arith.constant dense<0.000000e+00> : vector<1x512xf32>
    %264 = tpu.matmul %260, %263, %cst_101 {dimension_numbers = #tpu.dot_dimension_numbers<[1], [0], [0], [1], [0, 0, 1, 1], [], []>} : vector<1x128xf32>, vector<128x512xf32>, vector<1x512xf32> -> vector<1x512xf32>
    %265 = arith.addf %262, %264 : vector<1x512xf32>
    %266 = vector.extract_strided_slice %265 {offsets = [0, 0], sizes = [1, 384], strides = [1, 1]} : vector<1x512xf32> to vector<1x384xf32>
    %cst_102 = arith.constant 5.000000e-01 : f32
    %267 = vector.broadcast %cst_102 : f32 to vector<1x384xf32>
    %268 = arith.mulf %267, %266 : vector<1x384xf32>
    %269 = math.tanh %268 : vector<1x384xf32>
    %cst_103 = arith.constant 5.000000e-01 : f32
    %270 = vector.broadcast %cst_103 : f32 to vector<1x384xf32>
    %271 = arith.mulf %270, %269 : vector<1x384xf32>
    %cst_104 = arith.constant 5.000000e-01 : f32
    %272 = vector.broadcast %cst_104 : f32 to vector<1x384xf32>
    %273 = arith.addf %271, %272 : vector<1x384xf32>
    %274 = vector.extract_strided_slice %273 {offsets = [0, 0], sizes = [1, 128], strides = [1, 1]} : vector<1x384xf32> to vector<1x128xf32>
    %275 = vector.extract_strided_slice %273 {offsets = [0, 128], sizes = [1, 128], strides = [1, 1]} : vector<1x384xf32> to vector<1x128xf32>
    %276 = vector.extract_strided_slice %273 {offsets = [0, 256], sizes = [1, 128], strides = [1, 1]} : vector<1x384xf32> to vector<1x128xf32>
    %277 = vector.extract_strided_slice %265 {offsets = [0, 384], sizes = [1, 128], strides = [1, 1]} : vector<1x512xf32> to vector<1x128xf32>
    %278 = math.tanh %277 : vector<1x128xf32>
    %279 = arith.mulf %275, %258 : vector<1x128xf32>
    %280 = arith.mulf %274, %278 : vector<1x128xf32>
    %281 = arith.addf %279, %280 : vector<1x128xf32>
    %282 = math.tanh %281 : vector<1x128xf32>
    %283 = arith.mulf %276, %282 : vector<1x128xf32>
    %c3_i32_105 = arith.constant 3 : i32
    %284 = arith.index_cast %c3_i32_105 : i32 to index
    %c0_106 = arith.constant 0 : index
    %285 = vector.load %arg9[%284, %c0_106] : memref<8x512xf32, #tpu.memory_space<vmem>>, vector<1x512xf32>
    %c0_107 = arith.constant 0 : index
    %c0_108 = arith.constant 0 : index
    %286 = vector.load %arg5[%c0_107, %c0_108] : memref<128x512xf32, #tpu.memory_space<vmem>>, vector<128x512xf32>
    %cst_109 = arith.constant dense<0.000000e+00> : vector<1x512xf32>
    %287 = tpu.matmul %283, %286, %cst_109 {dimension_numbers = #tpu.dot_dimension_numbers<[1], [0], [0], [1], [0, 0, 1, 1], [], []>} : vector<1x128xf32>, vector<128x512xf32>, vector<1x512xf32> -> vector<1x512xf32>
    %288 = arith.addf %285, %287 : vector<1x512xf32>
    %289 = vector.extract_strided_slice %288 {offsets = [0, 0], sizes = [1, 384], strides = [1, 1]} : vector<1x512xf32> to vector<1x384xf32>
    %cst_110 = arith.constant 5.000000e-01 : f32
    %290 = vector.broadcast %cst_110 : f32 to vector<1x384xf32>
    %291 = arith.mulf %290, %289 : vector<1x384xf32>
    %292 = math.tanh %291 : vector<1x384xf32>
    %cst_111 = arith.constant 5.000000e-01 : f32
    %293 = vector.broadcast %cst_111 : f32 to vector<1x384xf32>
    %294 = arith.mulf %293, %292 : vector<1x384xf32>
    %cst_112 = arith.constant 5.000000e-01 : f32
    %295 = vector.broadcast %cst_112 : f32 to vector<1x384xf32>
    %296 = arith.addf %294, %295 : vector<1x384xf32>
    %297 = vector.extract_strided_slice %296 {offsets = [0, 0], sizes = [1, 128], strides = [1, 1]} : vector<1x384xf32> to vector<1x128xf32>
    %298 = vector.extract_strided_slice %296 {offsets = [0, 128], sizes = [1, 128], strides = [1, 1]} : vector<1x384xf32> to vector<1x128xf32>
    %299 = vector.extract_strided_slice %296 {offsets = [0, 256], sizes = [1, 128], strides = [1, 1]} : vector<1x384xf32> to vector<1x128xf32>
    %300 = vector.extract_strided_slice %288 {offsets = [0, 384], sizes = [1, 128], strides = [1, 1]} : vector<1x512xf32> to vector<1x128xf32>
    %301 = math.tanh %300 : vector<1x128xf32>
    %302 = arith.mulf %298, %281 : vector<1x128xf32>
    %303 = arith.mulf %297, %301 : vector<1x128xf32>
    %304 = arith.addf %302, %303 : vector<1x128xf32>
    %305 = math.tanh %304 : vector<1x128xf32>
    %306 = arith.mulf %299, %305 : vector<1x128xf32>
    %c4_i32_113 = arith.constant 4 : i32
    %307 = arith.index_cast %c4_i32_113 : i32 to index
    %c0_114 = arith.constant 0 : index
    %308 = vector.load %arg9[%307, %c0_114] : memref<8x512xf32, #tpu.memory_space<vmem>>, vector<1x512xf32>
    %c0_115 = arith.constant 0 : index
    %c0_116 = arith.constant 0 : index
    %309 = vector.load %arg5[%c0_115, %c0_116] : memref<128x512xf32, #tpu.memory_space<vmem>>, vector<128x512xf32>
    %cst_117 = arith.constant dense<0.000000e+00> : vector<1x512xf32>
    %310 = tpu.matmul %306, %309, %cst_117 {dimension_numbers = #tpu.dot_dimension_numbers<[1], [0], [0], [1], [0, 0, 1, 1], [], []>} : vector<1x128xf32>, vector<128x512xf32>, vector<1x512xf32> -> vector<1x512xf32>
    %311 = arith.addf %308, %310 : vector<1x512xf32>
    %312 = vector.extract_strided_slice %311 {offsets = [0, 0], sizes = [1, 384], strides = [1, 1]} : vector<1x512xf32> to vector<1x384xf32>
    %cst_118 = arith.constant 5.000000e-01 : f32
    %313 = vector.broadcast %cst_118 : f32 to vector<1x384xf32>
    %314 = arith.mulf %313, %312 : vector<1x384xf32>
    %315 = math.tanh %314 : vector<1x384xf32>
    %cst_119 = arith.constant 5.000000e-01 : f32
    %316 = vector.broadcast %cst_119 : f32 to vector<1x384xf32>
    %317 = arith.mulf %316, %315 : vector<1x384xf32>
    %cst_120 = arith.constant 5.000000e-01 : f32
    %318 = vector.broadcast %cst_120 : f32 to vector<1x384xf32>
    %319 = arith.addf %317, %318 : vector<1x384xf32>
    %320 = vector.extract_strided_slice %319 {offsets = [0, 0], sizes = [1, 128], strides = [1, 1]} : vector<1x384xf32> to vector<1x128xf32>
    %321 = vector.extract_strided_slice %319 {offsets = [0, 128], sizes = [1, 128], strides = [1, 1]} : vector<1x384xf32> to vector<1x128xf32>
    %322 = vector.extract_strided_slice %319 {offsets = [0, 256], sizes = [1, 128], strides = [1, 1]} : vector<1x384xf32> to vector<1x128xf32>
    %323 = vector.extract_strided_slice %311 {offsets = [0, 384], sizes = [1, 128], strides = [1, 1]} : vector<1x512xf32> to vector<1x128xf32>
    %324 = math.tanh %323 : vector<1x128xf32>
    %325 = arith.mulf %321, %304 : vector<1x128xf32>
    %326 = arith.mulf %320, %324 : vector<1x128xf32>
    %327 = arith.addf %325, %326 : vector<1x128xf32>
    %328 = math.tanh %327 : vector<1x128xf32>
    %329 = arith.mulf %322, %328 : vector<1x128xf32>
    %c5_i32_121 = arith.constant 5 : i32
    %330 = arith.index_cast %c5_i32_121 : i32 to index
    %c0_122 = arith.constant 0 : index
    %331 = vector.load %arg9[%330, %c0_122] : memref<8x512xf32, #tpu.memory_space<vmem>>, vector<1x512xf32>
    %c0_123 = arith.constant 0 : index
    %c0_124 = arith.constant 0 : index
    %332 = vector.load %arg5[%c0_123, %c0_124] : memref<128x512xf32, #tpu.memory_space<vmem>>, vector<128x512xf32>
    %cst_125 = arith.constant dense<0.000000e+00> : vector<1x512xf32>
    %333 = tpu.matmul %329, %332, %cst_125 {dimension_numbers = #tpu.dot_dimension_numbers<[1], [0], [0], [1], [0, 0, 1, 1], [], []>} : vector<1x128xf32>, vector<128x512xf32>, vector<1x512xf32> -> vector<1x512xf32>
    %334 = arith.addf %331, %333 : vector<1x512xf32>
    %335 = vector.extract_strided_slice %334 {offsets = [0, 0], sizes = [1, 384], strides = [1, 1]} : vector<1x512xf32> to vector<1x384xf32>
    %cst_126 = arith.constant 5.000000e-01 : f32
    %336 = vector.broadcast %cst_126 : f32 to vector<1x384xf32>
    %337 = arith.mulf %336, %335 : vector<1x384xf32>
    %338 = math.tanh %337 : vector<1x384xf32>
    %cst_127 = arith.constant 5.000000e-01 : f32
    %339 = vector.broadcast %cst_127 : f32 to vector<1x384xf32>
    %340 = arith.mulf %339, %338 : vector<1x384xf32>
    %cst_128 = arith.constant 5.000000e-01 : f32
    %341 = vector.broadcast %cst_128 : f32 to vector<1x384xf32>
    %342 = arith.addf %340, %341 : vector<1x384xf32>
    %343 = vector.extract_strided_slice %342 {offsets = [0, 0], sizes = [1, 128], strides = [1, 1]} : vector<1x384xf32> to vector<1x128xf32>
    %344 = vector.extract_strided_slice %342 {offsets = [0, 128], sizes = [1, 128], strides = [1, 1]} : vector<1x384xf32> to vector<1x128xf32>
    %345 = vector.extract_strided_slice %342 {offsets = [0, 256], sizes = [1, 128], strides = [1, 1]} : vector<1x384xf32> to vector<1x128xf32>
    %346 = vector.extract_strided_slice %334 {offsets = [0, 384], sizes = [1, 128], strides = [1, 1]} : vector<1x512xf32> to vector<1x128xf32>
    %347 = math.tanh %346 : vector<1x128xf32>
    %348 = arith.mulf %344, %327 : vector<1x128xf32>
    %349 = arith.mulf %343, %347 : vector<1x128xf32>
    %350 = arith.addf %348, %349 : vector<1x128xf32>
    %351 = math.tanh %350 : vector<1x128xf32>
    %352 = arith.mulf %345, %351 : vector<1x128xf32>
    %c6_i32_129 = arith.constant 6 : i32
    %353 = arith.index_cast %c6_i32_129 : i32 to index
    %c0_130 = arith.constant 0 : index
    %354 = vector.load %arg9[%353, %c0_130] : memref<8x512xf32, #tpu.memory_space<vmem>>, vector<1x512xf32>
    %c0_131 = arith.constant 0 : index
    %c0_132 = arith.constant 0 : index
    %355 = vector.load %arg5[%c0_131, %c0_132] : memref<128x512xf32, #tpu.memory_space<vmem>>, vector<128x512xf32>
    %cst_133 = arith.constant dense<0.000000e+00> : vector<1x512xf32>
    %356 = tpu.matmul %352, %355, %cst_133 {dimension_numbers = #tpu.dot_dimension_numbers<[1], [0], [0], [1], [0, 0, 1, 1], [], []>} : vector<1x128xf32>, vector<128x512xf32>, vector<1x512xf32> -> vector<1x512xf32>
    %357 = arith.addf %354, %356 : vector<1x512xf32>
    %358 = vector.extract_strided_slice %357 {offsets = [0, 0], sizes = [1, 384], strides = [1, 1]} : vector<1x512xf32> to vector<1x384xf32>
    %cst_134 = arith.constant 5.000000e-01 : f32
    %359 = vector.broadcast %cst_134 : f32 to vector<1x384xf32>
    %360 = arith.mulf %359, %358 : vector<1x384xf32>
    %361 = math.tanh %360 : vector<1x384xf32>
    %cst_135 = arith.constant 5.000000e-01 : f32
    %362 = vector.broadcast %cst_135 : f32 to vector<1x384xf32>
    %363 = arith.mulf %362, %361 : vector<1x384xf32>
    %cst_136 = arith.constant 5.000000e-01 : f32
    %364 = vector.broadcast %cst_136 : f32 to vector<1x384xf32>
    %365 = arith.addf %363, %364 : vector<1x384xf32>
    %366 = vector.extract_strided_slice %365 {offsets = [0, 0], sizes = [1, 128], strides = [1, 1]} : vector<1x384xf32> to vector<1x128xf32>
    %367 = vector.extract_strided_slice %365 {offsets = [0, 128], sizes = [1, 128], strides = [1, 1]} : vector<1x384xf32> to vector<1x128xf32>
    %368 = vector.extract_strided_slice %365 {offsets = [0, 256], sizes = [1, 128], strides = [1, 1]} : vector<1x384xf32> to vector<1x128xf32>
    %369 = vector.extract_strided_slice %357 {offsets = [0, 384], sizes = [1, 128], strides = [1, 1]} : vector<1x512xf32> to vector<1x128xf32>
    %370 = math.tanh %369 : vector<1x128xf32>
    %371 = arith.mulf %367, %350 : vector<1x128xf32>
    %372 = arith.mulf %366, %370 : vector<1x128xf32>
    %373 = arith.addf %371, %372 : vector<1x128xf32>
    %374 = math.tanh %373 : vector<1x128xf32>
    %375 = arith.mulf %368, %374 : vector<1x128xf32>
    %c7_i32_137 = arith.constant 7 : i32
    %376 = arith.index_cast %c7_i32_137 : i32 to index
    %c0_138 = arith.constant 0 : index
    %377 = vector.load %arg9[%376, %c0_138] : memref<8x512xf32, #tpu.memory_space<vmem>>, vector<1x512xf32>
    %c0_139 = arith.constant 0 : index
    %c0_140 = arith.constant 0 : index
    %378 = vector.load %arg5[%c0_139, %c0_140] : memref<128x512xf32, #tpu.memory_space<vmem>>, vector<128x512xf32>
    %cst_141 = arith.constant dense<0.000000e+00> : vector<1x512xf32>
    %379 = tpu.matmul %375, %378, %cst_141 {dimension_numbers = #tpu.dot_dimension_numbers<[1], [0], [0], [1], [0, 0, 1, 1], [], []>} : vector<1x128xf32>, vector<128x512xf32>, vector<1x512xf32> -> vector<1x512xf32>
    %380 = arith.addf %377, %379 : vector<1x512xf32>
    %381 = vector.extract_strided_slice %380 {offsets = [0, 0], sizes = [1, 384], strides = [1, 1]} : vector<1x512xf32> to vector<1x384xf32>
    %cst_142 = arith.constant 5.000000e-01 : f32
    %382 = vector.broadcast %cst_142 : f32 to vector<1x384xf32>
    %383 = arith.mulf %382, %381 : vector<1x384xf32>
    %384 = math.tanh %383 : vector<1x384xf32>
    %cst_143 = arith.constant 5.000000e-01 : f32
    %385 = vector.broadcast %cst_143 : f32 to vector<1x384xf32>
    %386 = arith.mulf %385, %384 : vector<1x384xf32>
    %cst_144 = arith.constant 5.000000e-01 : f32
    %387 = vector.broadcast %cst_144 : f32 to vector<1x384xf32>
    %388 = arith.addf %386, %387 : vector<1x384xf32>
    %389 = vector.extract_strided_slice %388 {offsets = [0, 0], sizes = [1, 128], strides = [1, 1]} : vector<1x384xf32> to vector<1x128xf32>
    %390 = vector.extract_strided_slice %388 {offsets = [0, 128], sizes = [1, 128], strides = [1, 1]} : vector<1x384xf32> to vector<1x128xf32>
    %391 = vector.extract_strided_slice %388 {offsets = [0, 256], sizes = [1, 128], strides = [1, 1]} : vector<1x384xf32> to vector<1x128xf32>
    %392 = vector.extract_strided_slice %380 {offsets = [0, 384], sizes = [1, 128], strides = [1, 1]} : vector<1x512xf32> to vector<1x128xf32>
    %393 = math.tanh %392 : vector<1x128xf32>
    %394 = arith.mulf %390, %373 : vector<1x128xf32>
    %395 = arith.mulf %389, %393 : vector<1x128xf32>
    %396 = arith.addf %394, %395 : vector<1x128xf32>
    %397 = math.tanh %396 : vector<1x128xf32>
    %398 = arith.mulf %391, %397 : vector<1x128xf32>
    %c8_i32_145 = arith.constant 8 : i32
    %c0_146 = arith.constant 0 : index
    %c0_147 = arith.constant 0 : index
    %399 = vector.load %arg7[%c0_146, %c0_147] : memref<1x128xf32, #tpu.memory_space<vmem>>, vector<1x128xf32>
    tpu.vector_store %arg7[%c0_146, %c0_147], %398 {strides = array<i32>} : memref<1x128xf32, #tpu.memory_space<vmem>>, vector<1x128xf32>,
    return
  }
}

</mosaic_0001>

<bundles_post_ra>
// kernel: tpu_custom_call.1
= control target key start
LH: loop header
LB: loop body
LE: loop exit
PB: predicated region body
PF: predicated region fallthrough
CT: control target
= control target key end

     0   :  { %12 = vsyncpa [#allocation5], 0  ;;  %s6428_s0 = inlined_call_operand.vmem [shape: f32[8,1], index: 0, kind: input, shape index: {}]   ;;  %s6429_s1 = inlined_call_operand.vmem [shape: f32[1,512], index: 1, kind: input, shape index: {}]   ;;  %s6430_s2 = inlined_call_operand.hbm [shape: f32[128,512], index: 2, kind: input, shape index: {}]   ;;  %s6431_s3 = inlined_call_operand.vmem [shape: f32[1,512], index: 3, kind: input, shape index: {}]   ;;  %s6432_s4 = inlined_call_operand.hbm [shape: f32[128,512], index: 4, kind: input, shape index: {}]   ;;  %s6433_s5 = inlined_call_operand.hbm [shape: f32[128,512], index: 5, kind: input, shape index: {}]   ;;  %s6434_s6 = inlined_call_operand.vmem [shape: f32[1,512], index: 6, kind: input, shape index: {}]   ;;  %s6435_s7 = inlined_call_operand.hbm [shape: f32[1,128], index: 7, kind: output, shape index: {}]  }
   0x1   :  { %13 = vsyncpa [#allocation8], 0 }
   0x2   :  { %14 = vsyncpa [#allocation6], 0  ;;  %s5457_s24 = smov [#allocation7]   ;;  %s5458_s26 = smov [#allocation4]  }
   0x3   :  { %s38_s25 = sshll.u32 %s5457_s24, 4  ;;  %s24_s27 = sshll.u32 %s5458_s26, 4  ;;  %s39_s25 = int_to_ptr.vmem [resolvable:$true] %s38_s25  ;;  %s5505_s27 = int_to_ptr.vmem [resolvable:$true] %s24_s27 }
   0x4   :  { %s5363_s30 = scalar_lea.hbm %s6432_s4, 8192 }
   0x5   :  { %p5364_p0 = scmp.ne.s32.totalorder %s6432_s4, %s5363_s30  ;;  %p5367_p1 = scmp.lt.u32.totalorder %s5363_s30, %s6432_s4 }
   0x7   :  { %p5369_p2 = pnand %p5367_p1, %p5364_p0 }
   0x9   :  { %5372 = shalt.err (!%p5369_p2)
}
   0xa   :  { %s5373_s12 = scalar_lea.vmem %s39_s25, 8192  ;;  %p5378_p4 = scmp.lt.s32.totalorder %s39_s25, %s39_s25 }
   0xb   :  { %p5374_p3 = scmp.ne.s32.totalorder %s39_s25, %s5373_s12  ;;  %p5379_p5 = scmp.lt.s32.totalorder %s5373_s12, %s5373_s12 }
   0xd   :  { %p5380_p6 = por %p5379_p5, %p5378_p4 }
   0xf   :  { %p5381_p7 = pnand %p5380_p6, %p5374_p3 }
  0x11   :  { %5384 = shalt.err (!%p5381_p7)
}
  0x12   :  { %s5459_s13 = smov 512   ;;  %s5460_s14 = smov 32  }
  0x13   :  { %44 = dma.hbm_to_vmem [thread:$0]  %s6432_s4, 8192, %s39_s25, [#allocation8], %s5459_s13, %s5459_s13, %s5460_s14  }
  0x14   :  { %s5385_s19 = scalar_lea.hbm %s6430_s2, 8192 }
  0x15   :  { %p5386_p8 = scmp.ne.s32.totalorder %s6430_s2, %s5385_s19  ;;  %p5389_p9 = scmp.lt.u32.totalorder %s5385_s19, %s6430_s2 }
  0x17   :  { %p5391_p10 = pnand %p5389_p9, %p5386_p8 }
  0x19   :  { %5394 = shalt.err (!%p5391_p10)
}
  0x1a   :  { %s5395_s24 = scalar_lea.vmem %s5505_s27, 8192  ;;  %p5400_p12 = scmp.lt.s32.totalorder %s5505_s27, %s5505_s27 }
  0x1b   :  { %p5396_p11 = scmp.ne.s32.totalorder %s5505_s27, %s5395_s24  ;;  %p5401_p13 = scmp.lt.s32.totalorder %s5395_s24, %s5395_s24 }
  0x1d   :  { %p5402_p0 = por %p5401_p13, %p5400_p12 }
  0x1f   :  { %p5403_p1 = pnand %p5402_p0, %p5396_p11 }
  0x21   :  { %5406 = shalt.err (!%p5403_p1)
}
  0x22   :  { %30 = dma.hbm_to_vmem [thread:$0]  %s6430_s2, 8192, %s5505_s27, [#allocation5], %s5459_s13, %s5459_s13, %s5460_s14  }
  0x23   :  { %s5461_s26 = smov [#allocation9]   ;;  %s5407_s8 = scalar_lea.hbm %s6433_s5, 8192 }
  0x24   :  { %s50_s28 = sshll.u32 %s5461_s26, 4  ;;  %p5408_p2 = scmp.ne.s32.totalorder %s6433_s5, %s5407_s8  ;;  %s51_s28 = int_to_ptr.vmem [resolvable:$true] %s50_s28 }
  0x25   :  { %p5411_p3 = scmp.lt.u32.totalorder %s5407_s8, %s6433_s5 }
  0x27   :  { %p5413_p4 = pnand %p5411_p3, %p5408_p2 }
  0x29   :  { %5416 = shalt.err (!%p5413_p4)
}
  0x2a   :  { %s5417_s15 = scalar_lea.vmem %s51_s28, 8192  ;;  %p5422_p6 = scmp.lt.s32.totalorder %s51_s28, %s51_s28 }
  0x2b   :  { %p5418_p5 = scmp.ne.s32.totalorder %s51_s28, %s5417_s15  ;;  %p5423_p7 = scmp.lt.s32.totalorder %s5417_s15, %s5417_s15 }
  0x2d   :  { %p5424_p8 = por %p5423_p7, %p5422_p6 }
  0x2f   :  { %p5425_p9 = pnand %p5424_p8, %p5418_p5 }
  0x31   :  { %5428 = shalt.err (!%p5425_p9)
}
  0x32   :  { %56 = dma.hbm_to_vmem [thread:$0]  %s6433_s5, 8192, %s51_s28, [#allocation8], %s5459_s13, %s5459_s13, %s5460_s14  }
  0x33   :  { %5451 = dma.done.wait [#allocation5], 8192  }
  0x34   :  { %5452 = vsyncadd [#allocation5], 4294959104 }
  0x35   :  { %5453 = dma.done.wait [#allocation8], 16384  }
  0x36   :  { %5454 = vsyncadd [#allocation8], 4294950912  ;;  %v72_v0 = vlaneseq  ;;  %v5462_v1 = vmov 0.0   ;;  %v69_v7 = vld [vmem:[%s6429_s1] sm:$0xf]  ;;  %vm113_vm0 = vcmask 1040384  }
  0x37   :  { %186 = vmatprep.mubr.f32.mxu0 %v5462_v1  ;;  %257 = vmatprep.mubr.f32.mxu1 %v5462_v1  ;;  %v68_v8 = vld [vmem:[%s6428_s0] sm:$0xff]  ;;  %v270_v9 = vld [vmem:[#allocation4 + $0x8] sm:$0xff]  ;;  %v272_v15 = vld [vmem:[#allocation4 + $0x18] sm:$0xff]  ;;  %vm109_vm1 = vcmask 7168  }
  0x38   :  { %v5559_v2 = vshrl.u32 %v72_v0, 7  ;;  %v274_v14 = vld [vmem:[#allocation4 + $0x28] sm:$0xff]  ;;  %v276_v16 = vld [vmem:[#allocation4 + $0x38] sm:$0xff]  ;;  %v269_v19 = vld [vmem:[#allocation4] sm:$0xff] }
  0x39   :  { %v5583_v17 = vpack.c.bf16 %v274_v14, %v270_v9  ;;  %v5585_v18 = vpack.c.bf16 %v276_v16, %v272_v15  ;;  %v273_v20 = vld [vmem:[#allocation4 + $0x20] sm:$0xff]  ;;  %v271_v21 = vld [vmem:[#allocation4 + $0x10] sm:$0xff]  ;;  %v278_v24 = vld [vmem:[#allocation4 + $0x48] sm:$0xff] }
  0x3a   :  { %v5562_v3 = vsub.s32 1, %v5559_v2  ;;  %v5565_v4 = vsub.s32 3, %v5559_v2  ;;  %v5568_v5 = vsub.s32 0, %v5559_v2  ;;  %v5571_v6 = vsub.s32 2, %v5559_v2  ;;  %v275_v23 = vld [vmem:[#allocation4 + $0x30] sm:$0xff]  ;;  %v282_v25 = vld [vmem:[#allocation4 + $0x68] sm:$0xff] }
  0x3b   :  { %v5589_v22 = vpack.c.bf16 %v273_v20, %v269_v19  ;;  %v5593_v26 = vpack.c.bf16 %v275_v23, %v271_v21  ;;  %v5595_v27 = vpack.c.bf16 %v282_v25, %v278_v24  ;;  %v280_v28 = vld [vmem:[#allocation4 + $0x58] sm:$0xff]  ;;  %v277_v30 = vld [vmem:[#allocation4 + $0x40] sm:$0xff]  ;;  %v279_v33 = vld [vmem:[#allocation4 + $0x50] sm:$0xff] }
  0x3c   :  { %v100_v10 = vrot.slane %v69_v7, %v5562_v3  ;;  %v108_v11 = vrot.slane %v69_v7, %v5565_v4  ;;  %v96_v12 = vrot.slane %v69_v7, %v5568_v5  ;;  %v104_v13 = vrot.slane %v69_v7, %v5571_v6  ;;  %v284_v29 = vld [vmem:[#allocation4 + $0x78] sm:$0xff]  ;;  %v281_v32 = vld [vmem:[#allocation4 + $0x60] sm:$0xff]  ;;  %v283_v34 = vld [vmem:[#allocation4 + $0x70] sm:$0xff] }
  0x3d   :  { %v5599_v31 = vpack.c.bf16 %v284_v29, %v280_v28  ;;  %v286_v35 = vld [vmem:[#allocation4 + $0x88] sm:$0xff]  ;;  %v288_v37 = vld [vmem:[#allocation4 + $0x98] sm:$0xff]  ;;  %v5605_v38 = vpack.c.bf16 %v281_v32, %v277_v30  ;;  %v5607_v39 = vpack.c.bf16 %v283_v34, %v279_v33  ;;  %v285_v41 = vld [vmem:[#allocation4 + $0x80] sm:$0xff] }
  0x3e   :  { %4165 = vmatprep.subr.msk.mxu0 %vm113_vm0, %v100_v10  ;;  %4168 = vmatprep.subr.msk.mxu1 %vm113_vm0, %v108_v11  ;;  %v290_v36 = vld [vmem:[#allocation4 + $0xa8] sm:$0xff]  ;;  %v292_v40 = vld [vmem:[#allocation4 + $0xb8] sm:$0xff]  ;;  %v289_v42 = vld [vmem:[#allocation4 + $0xa0] sm:$0xff] }
  0x3f   :  { %4166 = vmatpush1.msk.msra.mxu0 %vm113_vm0, %v96_v12  ;;  %4169 = vmatpush1.msk.msra.mxu1 %vm113_vm0, %v104_v13  ;;  %v5611_v43 = vpack.c.bf16 %v290_v36, %v286_v35  ;;  %v5613_v44 = vpack.c.bf16 %v292_v40, %v288_v37  ;;  %v287_v45 = vld [vmem:[#allocation4 + $0x90] sm:$0xff]  ;;  %v294_v47 = vld [vmem:[#allocation4 + $0xc8] sm:$0xff]  ;;  %v296_v49 = vld [vmem:[#allocation4 + $0xd8] sm:$0xff]  ;;  %v5619_v51 = vpack.c.bf16 %v289_v42, %v285_v41 }
  0x40   :  { %4167 = vmatmul.mubr.msk.f32.vlgmr.msra.gmra.mrb[0].mxu0 %vm109_vm1, %v68_v8  ;;  %4170 = vmatmul.mubr.msk.f32.vlgmr.msra.gmra.mrb[0].mxu1 %vm109_vm1, %v68_v8  ;;  %v291_v46 = vld [vmem:[#allocation4 + $0xb0] sm:$0xff]  ;;  %v298_v48 = vld [vmem:[#allocation4 + $0xe8] sm:$0xff]  ;;  %v300_v50 = vld [vmem:[#allocation4 + $0xf8] sm:$0xff] }
  0x41   :  { %4172 = vmatprep.subr.bf16.mxu0 %v5583_v17  ;;  %4204 = vmatprep.subr.bf16.mxu1 %v5585_v18  ;;  %v5621_v52 = vpack.c.bf16 %v291_v46, %v287_v45  ;;  %v293_v53 = vld [vmem:[#allocation4 + $0xc0] sm:$0xff]  ;;  %v5625_v55 = vpack.c.bf16 %v298_v48, %v294_v47  ;;  %v5627_v56 = vpack.c.bf16 %v300_v50, %v296_v49  ;;  %v295_v57 = vld [vmem:[#allocation4 + $0xd0] sm:$0xff]  ;;  %v302_v59 = vld [vmem:[#allocation4 + $0x108] sm:$0xff] }
  0x42   :  { %4174 = vmatpush1.bf16.msra.mxu0 %v5589_v22  ;;  %4206 = vmatpush1.bf16.msra.mxu1 %v5593_v26  ;;  %v297_v54 = vld [vmem:[#allocation4 + $0xe0] sm:$0xff]  ;;  %v299_v58 = vld [vmem:[#allocation4 + $0xf0] sm:$0xff]  ;;  %v306_v60 = vld [vmem:[#allocation4 + $0x128] sm:$0xff] }
  0x43   :  { %4176 = vmatprep.subr.bf16.mxu0 %v5595_v27  ;;  %4208 = vmatprep.subr.bf16.mxu1 %v5599_v31  ;;  %v304_v61 = vld [vmem:[#allocation4 + $0x118] sm:$0xff]  ;;  %v5631_v63 = vpack.c.bf16 %v297_v54, %v293_v53  ;;  %v5633_v0 = vpack.c.bf16 %v299_v58, %v295_v57  ;;  %v301_v7 = vld [vmem:[#allocation4 + $0x100] sm:$0xff]  ;;  %v5637_v9 = vpack.c.bf16 %v306_v60, %v302_v59  ;;  %v303_v11 = vld [vmem:[#allocation4 + $0x110] sm:$0xff] }
  0x44   :  { %397 = vmatprep.mubr.f32.mxu0 %v5462_v1  ;;  %468 = vmatprep.mubr.f32.mxu1 %v5462_v1  ;;  %v308_v62 = vld [vmem:[#allocation4 + $0x138] sm:$0xff]  ;;  %v305_v8 = vld [vmem:[#allocation4 + $0x120] sm:$0xff]  ;;  %v307_v12 = vld [vmem:[#allocation4 + $0x130] sm:$0xff] }
  0x45   :  { %v5639_v10 = vpack.c.bf16 %v308_v62, %v304_v61  ;;  %v310_v13 = vld [vmem:[#allocation4 + $0x148] sm:$0xff]  ;;  %v312_v15 = vld [vmem:[#allocation4 + $0x158] sm:$0xff]  ;;  %v5643_v19 = vpack.c.bf16 %v305_v8, %v301_v7  ;;  %v5645_v20 = vpack.c.bf16 %v307_v12, %v303_v11  ;;  %v309_v21 = vld [vmem:[#allocation4 + $0x140] sm:$0xff] }
  0x46   :  { %4178 = vmatpush1.bf16.msra.mxu0 %v5605_v38  ;;  %4210 = vmatpush1.bf16.msra.mxu1 %v5607_v39  ;;  %v314_v14 = vld [vmem:[#allocation4 + $0x168] sm:$0xff]  ;;  %v316_v16 = vld [vmem:[#allocation4 + $0x178] sm:$0xff]  ;;  %v313_v23 = vld [vmem:[#allocation4 + $0x160] sm:$0xff] }
  0x47   :  { %4180 = vmatprep.subr.bf16.mxu0 %v5611_v43  ;;  %4212 = vmatprep.subr.bf16.mxu1 %v5613_v44  ;;  %v5649_v24 = vpack.c.bf16 %v314_v14, %v310_v13  ;;  %v5651_v25 = vpack.c.bf16 %v316_v16, %v312_v15  ;;  %v311_v28 = vld [vmem:[#allocation4 + $0x150] sm:$0xff]  ;;  %v318_v30 = vld [vmem:[#allocation4 + $0x188] sm:$0xff]  ;;  %v320_v33 = vld [vmem:[#allocation4 + $0x198] sm:$0xff]  ;;  %v5655_v35 = vpack.c.bf16 %v313_v23, %v309_v21 }
  0x48   :  { %v315_v29 = vld [vmem:[#allocation4 + $0x170] sm:$0xff]  ;;  %v322_v32 = vld [vmem:[#allocation4 + $0x1a8] sm:$0xff]  ;;  %v324_v34 = vld [vmem:[#allocation4 + $0x1b8] sm:$0xff] }
  0x49   :  { %v5657_v36 = vpack.c.bf16 %v315_v29, %v311_v28  ;;  %v317_v37 = vld [vmem:[#allocation4 + $0x180] sm:$0xff]  ;;  %v5661_v41 = vpack.c.bf16 %v322_v32, %v318_v30  ;;  %v5663_v42 = vpack.c.bf16 %v324_v34, %v320_v33  ;;  %v319_v45 = vld [vmem:[#allocation4 + $0x190] sm:$0xff]  ;;  %v326_v47 = vld [vmem:[#allocation4 + $0x1c8] sm:$0xff]  ;;  %v5463_v34 = vmov 1966171168  }
  0x4a   :  { %4182 = vmatpush1.bf16.msra.mxu0 %v5619_v51  ;;  %4214 = vmatpush1.bf16.msra.mxu1 %v5621_v52  ;;  %v321_v40 = vld [vmem:[#allocation4 + $0x1a0] sm:$0xff]  ;;  %v323_v46 = vld [vmem:[#allocation4 + $0x1b0] sm:$0xff]  ;;  %v330_v48 = vld [vmem:[#allocation4 + $0x1e8] sm:$0xff] }
  0x4b   :  { %4184 = vmatprep.subr.bf16.mxu0 %v5625_v55  ;;  %4216 = vmatprep.subr.bf16.mxu1 %v5627_v56  ;;  %v328_v49 = vld [vmem:[#allocation4 + $0x1d8] sm:$0xff]  ;;  %v5667_v53 = vpack.c.bf16 %v321_v40, %v317_v37  ;;  %v5669_v54 = vpack.c.bf16 %v323_v46, %v319_v45  ;;  %v325_v57 = vld [vmem:[#allocation4 + $0x1c0] sm:$0xff]  ;;  %v5673_v58 = vpack.c.bf16 %v330_v48, %v326_v47  ;;  %v327_v61 = vld [vmem:[#allocation4 + $0x1d0] sm:$0xff]  ;;  %v482_v37 = vunpack.c.l.s4 %v5463_v34 }
  0x4c   :  { %v332_v50 = vld [vmem:[#allocation4 + $0x1f8] sm:$0xff]  ;;  %v329_v60 = vld [vmem:[#allocation4 + $0x1e0] sm:$0xff]  ;;  %v331_v62 = vld [vmem:[#allocation4 + $0x1f0] sm:$0xff] }
  0x4d   :  { %v5675_v59 = vpack.c.bf16 %v332_v50, %v328_v49  ;;  %v5679_v7 = vpack.c.bf16 %v329_v60, %v325_v57  ;;  %v5681_v8 = vpack.c.bf16 %v331_v62, %v327_v61  ;;  %v70_v11 = vld [vmem:[%s6431_s3] sm:$0xf]  ;;  %v483_v40 = vunpack.c.0.s8 %v482_v37 }
  0x4e   :  { %4186 = vmatpush1.bf16.msra.mxu0 %v5631_v63  ;;  %4218 = vmatpush1.bf16.msra.mxu1 %v5633_v0  ;;  %v75_v12 = vrot.slane %v70_v11, %v5568_v5  ;;  %v83_v13 = vrot.slane %v70_v11, %v5571_v6  ;;  %v79_v14 = vrot.slane %v70_v11, %v5562_v3 }
  0x4f   :  { %4188 = vmatprep.subr.bf16.mxu0 %v5637_v9  ;;  %4220 = vmatprep.subr.bf16.mxu1 %v5639_v10  ;;  %v87_v15 = vrot.slane %v70_v11, %v5565_v4  ;;  %v5733_v45 = vsub.s32 %v483_v40, %v5559_v2 }
  0x52   :  { %4190 = vmatpush1.bf16.msra.mxu0 %v5643_v19  ;;  %4222 = vmatpush1.bf16.msra.mxu1 %v5645_v20 }
  0x53   :  { %4192 = vmatprep.subr.bf16.mxu0 %v5649_v24  ;;  %4224 = vmatprep.subr.bf16.mxu1 %v5651_v25 }
  0x56   :  { %4194 = vmatpush1.bf16.msra.mxu0 %v5655_v35  ;;  %4226 = vmatpush1.bf16.msra.mxu1 %v5657_v36 }
  0x57   :  { %4196 = vmatprep.subr.bf16.mxu0 %v5661_v41  ;;  %4228 = vmatprep.subr.bf16.mxu1 %v5663_v42 }
  0x5a   :  { %4198 = vmatpush1.bf16.msra.mxu0 %v5667_v53  ;;  %4230 = vmatpush1.bf16.msra.mxu1 %v5669_v54 }
  0x5b   :  { %4200 = vmatprep.subr.bf16.mxu0 %v5673_v58  ;;  %4232 = vmatprep.subr.bf16.mxu1 %v5675_v59 }
  0x5e   :  { %4202 = vmatpush1.bf16.msra.mxu0 %v5679_v7  ;;  %4234 = vmatpush1.bf16.msra.mxu1 %v5681_v8 }
  0x5f   :  { %4236 = vmatprep.subr.bf16.mxu0 %v5583_v17  ;;  %4268 = vmatprep.subr.bf16.mxu1 %v5585_v18 }
  0x61   :  { %398 = vmatmul.mubr.f32.vlgmr.msra.gmra.mrb[2].mxu0 %v5462_v1  ;;  %469 = vmatmul.mubr.f32.vlgmr.msra.gmra.mrb[2].mxu1 %v5462_v1 }
  0x62   :  { %4238 = vmatpush1.bf16.msra.mxu0 %v5589_v22  ;;  %4270 = vmatpush1.bf16.msra.mxu1 %v5593_v26 }
  0x63   :  { %4240 = vmatprep.subr.bf16.mxu0 %v5595_v27  ;;  %4272 = vmatprep.subr.bf16.mxu1 %v5599_v31 }
  0x64   :  { %654 = vmatprep.mubr.f32.mxu0 %v5462_v1  ;;  %725 = vmatprep.mubr.f32.mxu1 %v5462_v1 }
  0x66   :  { %4242 = vmatpush1.bf16.msra.mxu0 %v5605_v38  ;;  %4274 = vmatpush1.bf16.msra.mxu1 %v5607_v39 }
  0x67   :  { %4244 = vmatprep.subr.bf16.mxu0 %v5611_v43  ;;  %4276 = vmatprep.subr.bf16.mxu1 %v5613_v44 }
  0x6a   :  { %4246 = vmatpush1.bf16.msra.mxu0 %v5619_v51  ;;  %4278 = vmatpush1.bf16.msra.mxu1 %v5621_v52 }
  0x6b   :  { %4248 = vmatprep.subr.bf16.mxu0 %v5625_v55  ;;  %4280 = vmatprep.subr.bf16.mxu1 %v5627_v56 }
  0x6e   :  { %4250 = vmatpush1.bf16.msra.mxu0 %v5631_v63  ;;  %4282 = vmatpush1.bf16.msra.mxu1 %v5633_v0 }
  0x6f   :  { %4252 = vmatprep.subr.bf16.mxu0 %v5637_v9  ;;  %4284 = vmatprep.subr.bf16.mxu1 %v5639_v10 }
  0x72   :  { %4254 = vmatpush1.bf16.msra.mxu0 %v5643_v19  ;;  %4286 = vmatpush1.bf16.msra.mxu1 %v5645_v20 }
  0x73   :  { %4256 = vmatprep.subr.bf16.mxu0 %v5649_v24  ;;  %4288 = vmatprep.subr.bf16.mxu1 %v5651_v25 }
  0x76   :  { %4258 = vmatpush1.bf16.msra.mxu0 %v5655_v35  ;;  %4290 = vmatpush1.bf16.msra.mxu1 %v5657_v36 }
  0x77   :  { %4260 = vmatprep.subr.bf16.mxu0 %v5661_v41  ;;  %4292 = vmatprep.subr.bf16.mxu1 %v5663_v42 }
  0x7a   :  { %4262 = vmatpush1.bf16.msra.mxu0 %v5667_v53  ;;  %4294 = vmatpush1.bf16.msra.mxu1 %v5669_v54 }
  0x7b   :  { %4264 = vmatprep.subr.bf16.mxu0 %v5673_v58  ;;  %4296 = vmatprep.subr.bf16.mxu1 %v5675_v59 }
  0x7e   :  { %4266 = vmatpush1.bf16.msra.mxu0 %v5679_v7  ;;  %4298 = vmatpush1.bf16.msra.mxu1 %v5681_v8 }
  0x7f   :  { %4300 = vmatprep.subr.bf16.mxu0 %v5583_v17  ;;  %4332 = vmatprep.subr.bf16.mxu1 %v5585_v18 }
 0x113   :  { %v188_v16 = vpop.f32.mrb[0].mxu0  ;;  %v259_v21 = vpop.f32.mrb[0].mxu1 }
 0x114   :  { %v189_v23 = vadd.f32 %v188_v16, %v75_v12  ;;  %v260_v28 = vadd.f32 %v259_v21, %v83_v13  ;;  %v190_v29 = vpop.f32.mrb[1].mxu0  ;;  %v261_v30 = vpop.f32.mrb[1].mxu1 }
 0x115   :  { %v191_v32 = vadd.f32 %v190_v29, %v79_v14  ;;  %v262_v33 = vadd.f32 %v261_v30, %v87_v15 }
 0x116   :  { %264 = vst [vmem:[#allocation3] sm:$0xff] %v189_v23  ;;  %266 = vst [vmem:[#allocation3 + $0x10] sm:$0xff] %v260_v28 }
 0x117   :  { %265 = vst [vmem:[#allocation3 + $0x8] sm:$0xff] %v191_v32  ;;  %267 = vst [vmem:[#allocation3 + $0x18] sm:$0xff] %v262_v33 }
 0x11e   :  { %v268_v12 = vld [vmem:[#allocation3] ss:$8 sm:$0xf] }
 0x134   :  { %v399_v46 = vpop.f32.mrb[2].mxu0  ;;  %v470_v47 = vpop.f32.mrb[2].mxu1 }
 0x135   :  { %v401_v48 = vpop.f32.mrb[3].mxu0  ;;  %v472_v49 = vpop.f32.mrb[3].mxu1 }
 0x136   :  { %v479_v50 = vcombine.low %v399_v46, %v401_v48  ;;  %v480_v57 = vcombine.low %v470_v47, %v472_v49 }
 0x138   :  { %v487_v60 = vrot.slane %v479_v50, %v5733_v45  ;;  %v494_v61 = vrot.slane %v480_v57, %v5733_v45 }
 0x13a   :  { %v495_v62 = vcombine.low %v487_v60, %v494_v61 }
 0x13c   :  { %v502_v11 = vrot.slane %v495_v62, %v5733_v45 }
 0x13e   :  { %v504_v13 = vadd.f32 %v502_v11, %v268_v12  ;;  %v525_v11 = vld [vmem:[#allocation3 + $0x1] ss:$8 sm:$0xf] }
 0x140   :  { %v505_v14 = vmul.f32 0.5, %v504_v13  ;;  %v510_v15 = vrot.slane %v504_v13, 3 }
 0x142   :  { %5267 = vtanh.f32 %v505_v14 }
 0x143   :  { %5269 = vtanh.f32 %v510_v15 }
 0x14c   :  { %v5268_v2 = vpop.eup %5267 }
 0x14d   :  { %v507_v16 = vmul.f32 0.5, %v5268_v2  ;;  %v5270_v28 = vpop.eup %5269 }
 0x14f   :  { %v508_v21 = vadd.f32 0.5, %v507_v16 }
 0x151   :  { %v514_v23 = vrot.slane %v508_v21, 1  ;;  %v517_v30 = vmul.f32 %v5270_v28, %v508_v21  ;;  %v520_v33 = vrot.slane %v508_v21, 2 }
 0x153   :  { %v516_v29 = vmul.f32 0.0, %v514_v23 }
 0x155   :  { %v5738_v32 = vadd.f32 %v517_v30, %v516_v29 }
 0x157   :  { %5271 = vtanh.f32 %v5738_v32 }
 0x161   :  { %v5272_v34 = vpop.eup %5271 }
 0x162   :  { %v522_v37 = vmul.f32 %v5272_v34, %v520_v33  ;;  %v1301_v34 = vld [vmem:[#allocation4 + $0x20] sm:$0xff] }
 0x164   :  { %523 = vst [vmem:[#allocation2] sm:$0x1] %v522_v37  ;;  %655 = vmatmul.mubr.f32.vlgmr.msra.gmra.mrb[4].mxu0 %v522_v37  ;;  %726 = vmatmul.mubr.f32.vlgmr.msra.gmra.mrb[4].mxu1 %v522_v37 }
 0x165   :  { %4302 = vmatpush1.bf16.msra.mxu0 %v5589_v22  ;;  %4334 = vmatpush1.bf16.msra.mxu1 %v5593_v26 }
 0x166   :  { %4304 = vmatprep.subr.bf16.mxu0 %v5595_v27  ;;  %4336 = vmatprep.subr.bf16.mxu1 %v5599_v31 }
 0x167   :  { %911 = vmatprep.mubr.f32.mxu0 %v5462_v1  ;;  %982 = vmatprep.mubr.f32.mxu1 %v5462_v1 }
 0x169   :  { %4306 = vmatpush1.bf16.msra.mxu0 %v5605_v38  ;;  %4338 = vmatpush1.bf16.msra.mxu1 %v5607_v39 }
 0x16a   :  { %4308 = vmatprep.subr.bf16.mxu0 %v5611_v43  ;;  %4340 = vmatprep.subr.bf16.mxu1 %v5613_v44 }
 0x16d   :  { %4310 = vmatpush1.bf16.msra.mxu0 %v5619_v51  ;;  %4342 = vmatpush1.bf16.msra.mxu1 %v5621_v52 }
 0x16e   :  { %4312 = vmatprep.subr.bf16.mxu0 %v5625_v55  ;;  %4344 = vmatprep.subr.bf16.mxu1 %v5627_v56 }
 0x171   :  { %4314 = vmatpush1.bf16.msra.mxu0 %v5631_v63  ;;  %4346 = vmatpush1.bf16.msra.mxu1 %v5633_v0 }
 0x172   :  { %4316 = vmatprep.subr.bf16.mxu0 %v5637_v9  ;;  %4348 = vmatprep.subr.bf16.mxu1 %v5639_v10 }
 0x175   :  { %4318 = vmatpush1.bf16.msra.mxu0 %v5643_v19  ;;  %4350 = vmatpush1.bf16.msra.mxu1 %v5645_v20 }
 0x176   :  { %4320 = vmatprep.subr.bf16.mxu0 %v5649_v24  ;;  %4352 = vmatprep.subr.bf16.mxu1 %v5651_v25 }
 0x179   :  { %4322 = vmatpush1.bf16.msra.mxu0 %v5655_v35  ;;  %4354 = vmatpush1.bf16.msra.mxu1 %v5657_v36 }
 0x17a   :  { %4324 = vmatprep.subr.bf16.mxu0 %v5661_v41  ;;  %4356 = vmatprep.subr.bf16.mxu1 %v5663_v42 }
 0x17d   :  { %4326 = vmatpush1.bf16.msra.mxu0 %v5667_v53  ;;  %4358 = vmatpush1.bf16.msra.mxu1 %v5669_v54 }
 0x17e   :  { %4328 = vmatprep.subr.bf16.mxu0 %v5673_v58  ;;  %4360 = vmatprep.subr.bf16.mxu1 %v5675_v59 }
 0x181   :  { %4330 = vmatpush1.bf16.msra.mxu0 %v5679_v7  ;;  %4362 = vmatpush1.bf16.msra.mxu1 %v5681_v8 }
 0x182   :  { %4364 = vmatprep.subr.bf16.mxu0 %v5583_v17  ;;  %4396 = vmatprep.subr.bf16.mxu1 %v5585_v18 }
 0x237   :  { %v656_v40 = vpop.f32.mrb[4].mxu0  ;;  %v727_v46 = vpop.f32.mrb[4].mxu1 }
 0x238   :  { %v658_v47 = vpop.f32.mrb[5].mxu0  ;;  %v729_v48 = vpop.f32.mrb[5].mxu1 }
 0x239   :  { %v736_v49 = vcombine.low %v656_v40, %v658_v47  ;;  %v737_v50 = vcombine.low %v727_v46, %v729_v48  ;;  %v1299_v46 = vld [vmem:[#allocation4 + $0x10] sm:$0xff] }
 0x23a   :  { %v1303_v47 = vld [vmem:[#allocation4 + $0x30] sm:$0xff] }
 0x23b   :  { %v744_v57 = vrot.slane %v736_v49, %v5733_v45  ;;  %v751_v60 = vrot.slane %v737_v50, %v5733_v45  ;;  %v5826_v48 = vpack.c.bf16 %v1303_v47, %v1299_v46  ;;  %v1306_v49 = vld [vmem:[#allocation4 + $0x48] sm:$0xff]  ;;  %v1340_v46 = vld [vmem:[#allocation4 + $0x158] sm:$0xff] }
 0x23c   :  { %v1310_v50 = vld [vmem:[#allocation4 + $0x68] sm:$0xff]  ;;  %v1344_v47 = vld [vmem:[#allocation4 + $0x178] sm:$0xff] }
 0x23d   :  { %v752_v61 = vcombine.low %v744_v57, %v751_v60  ;;  %v1308_v57 = vld [vmem:[#allocation4 + $0x58] sm:$0xff]  ;;  %v5831_v60 = vpack.c.bf16 %v1310_v50, %v1306_v49  ;;  %v1337_v49 = vld [vmem:[#allocation4 + $0x140] sm:$0xff]  ;;  %v5879_v50 = vpack.c.bf16 %v1344_v47, %v1340_v46 }
 0x23f   :  { %v759_v62 = vrot.slane %v752_v61, %v5733_v45  ;;  %v1312_v61 = vld [vmem:[#allocation4 + $0x78] sm:$0xff] }
 0x241   :  { %v761_v12 = vadd.f32 %v759_v62, %v525_v11  ;;  %v1305_v62 = vld [vmem:[#allocation4 + $0x40] sm:$0xff] }
 0x242   :  { %v1309_v11 = vld [vmem:[#allocation4 + $0x60] sm:$0xff] }
 0x243   :  { %v762_v13 = vmul.f32 0.5, %v761_v12  ;;  %v767_v17 = vrot.slane %v761_v12, 3  ;;  %v5833_v12 = vpack.c.bf16 %v1312_v61, %v1308_v57  ;;  %v1341_v57 = vld [vmem:[#allocation4 + $0x160] sm:$0xff]  ;;  %v1339_v61 = vld [vmem:[#allocation4 + $0x150] sm:$0xff] }
 0x245   :  { %5273 = vtanh.f32 %v762_v13  ;;  %v5835_v13 = vpack.c.bf16 %v1309_v11, %v1305_v62  ;;  %v1343_v62 = vld [vmem:[#allocation4 + $0x170] sm:$0xff]  ;;  %v1346_v11 = vld [vmem:[#allocation4 + $0x188] sm:$0xff] }
 0x246   :  { %5275 = vtanh.f32 %v767_v17  ;;  %v1307_v17 = vld [vmem:[#allocation4 + $0x50] sm:$0xff] }
 0x24f   :  { %v5274_v18 = vpop.eup %5273 }
 0x250   :  { %v764_v14 = vmul.f32 0.5, %v5274_v18  ;;  %v5276_v16 = vpop.eup %5275  ;;  %v1311_v18 = vld [vmem:[#allocation4 + $0x70] sm:$0xff] }
 0x252   :  { %v765_v15 = vadd.f32 0.5, %v764_v14  ;;  %v5838_v14 = vpack.c.bf16 %v1311_v18, %v1307_v17  ;;  %v1350_v17 = vld [vmem:[#allocation4 + $0x1a8] sm:$0xff]  ;;  %v1348_v18 = vld [vmem:[#allocation4 + $0x198] sm:$0xff] }
 0x254   :  { %v771_v2 = vrot.slane %v765_v15, 1  ;;  %v774_v23 = vmul.f32 %v5276_v16, %v765_v15  ;;  %v777_v29 = vrot.slane %v765_v15, 2  ;;  %v1314_v15 = vld [vmem:[#allocation4 + $0x88] sm:$0xff]  ;;  %v1316_v16 = vld [vmem:[#allocation4 + $0x98] sm:$0xff] }
 0x256   :  { %v773_v21 = vmul.f32 %v771_v2, %v5738_v32  ;;  %v1297_v32 = vld [vmem:[#allocation4] sm:$0xff]  ;;  %v1318_v2 = vld [vmem:[#allocation4 + $0xa8] sm:$0xff] }
 0x257   :  { %v5823_v40 = vpack.c.bf16 %v1301_v34, %v1297_v32 }
 0x258   :  { %v775_v28 = vadd.f32 %v774_v23, %v773_v21  ;;  %v5843_v21 = vpack.c.bf16 %v1318_v2, %v1314_v15  ;;  %v1320_v23 = vld [vmem:[#allocation4 + $0xb8] sm:$0xff]  ;;  %v5882_v15 = vpack.c.bf16 %v1341_v57, %v1337_v49 }
 0x259   :  { %v1352_v2 = vld [vmem:[#allocation4 + $0x1b8] sm:$0xff] }
 0x25a   :  { %5277 = vtanh.f32 %v775_v28 }
 0x264   :  { %v5278_v30 = vpop.eup %5277 }
 0x265   :  { %v779_v33 = vmul.f32 %v5278_v30, %v777_v29  ;;  %v1317_v29 = vld [vmem:[#allocation4 + $0xa0] sm:$0xff]  ;;  %v5845_v30 = vpack.c.bf16 %v1320_v23, %v1316_v16  ;;  %v5886_v16 = vpack.c.bf16 %v1343_v62, %v1339_v61  ;;  %v5888_v23 = vpack.c.bf16 %v1350_v17, %v1346_v11 }
 0x266   :  { %v1039_v17 = vld [vmem:[#allocation3 + $0x3] ss:$8 sm:$0xf] }
 0x267   :  { %780 = vst [vmem:[#allocation2 + $0x1] sm:$0x1] %v779_v33  ;;  %912 = vmatmul.mubr.f32.vlgmr.msra.gmra.mrb[6].mxu0 %v779_v33  ;;  %983 = vmatmul.mubr.f32.vlgmr.msra.gmra.mrb[6].mxu1 %v779_v33 }
 0x268   :  { %4366 = vmatpush1.bf16.msra.mxu0 %v5589_v22  ;;  %4398 = vmatpush1.bf16.msra.mxu1 %v5593_v26 }
 0x269   :  { %4368 = vmatprep.subr.bf16.mxu0 %v5595_v27  ;;  %4400 = vmatprep.subr.bf16.mxu1 %v5599_v31 }
 0x26a   :  { %1168 = vmatprep.mubr.f32.mxu0 %v5462_v1  ;;  %1239 = vmatprep.mubr.f32.mxu1 %v5462_v1 }
 0x26c   :  { %4370 = vmatpush1.bf16.msra.mxu0 %v5605_v38  ;;  %4402 = vmatpush1.bf16.msra.mxu1 %v5607_v39 }
 0x26d   :  { %4372 = vmatprep.subr.bf16.mxu0 %v5611_v43  ;;  %4404 = vmatprep.subr.bf16.mxu1 %v5613_v44 }
 0x270   :  { %4374 = vmatpush1.bf16.msra.mxu0 %v5619_v51  ;;  %4406 = vmatpush1.bf16.msra.mxu1 %v5621_v52 }
 0x271   :  { %4376 = vmatprep.subr.bf16.mxu0 %v5625_v55  ;;  %4408 = vmatprep.subr.bf16.mxu1 %v5627_v56  ;;  %v782_v55 = vld [vmem:[#allocation3 + $0x2] ss:$8 sm:$0xf] }
 0x274   :  { %4378 = vmatpush1.bf16.msra.mxu0 %v5631_v63  ;;  %4410 = vmatpush1.bf16.msra.mxu1 %v5633_v0 }
 0x275   :  { %4380 = vmatprep.subr.bf16.mxu0 %v5637_v9  ;;  %4412 = vmatprep.subr.bf16.mxu1 %v5639_v10 }
 0x278   :  { %4382 = vmatpush1.bf16.msra.mxu0 %v5643_v19  ;;  %4414 = vmatpush1.bf16.msra.mxu1 %v5645_v20 }
 0x279   :  { %4384 = vmatprep.subr.bf16.mxu0 %v5649_v24  ;;  %4416 = vmatprep.subr.bf16.mxu1 %v5651_v25 }
 0x27c   :  { %4386 = vmatpush1.bf16.msra.mxu0 %v5655_v35  ;;  %4418 = vmatpush1.bf16.msra.mxu1 %v5657_v36 }
 0x27d   :  { %4388 = vmatprep.subr.bf16.mxu0 %v5661_v41  ;;  %4420 = vmatprep.subr.bf16.mxu1 %v5663_v42 }
 0x280   :  { %4390 = vmatpush1.bf16.msra.mxu0 %v5667_v53  ;;  %4422 = vmatpush1.bf16.msra.mxu1 %v5669_v54  ;;  %v1298_v54 = vld [vmem:[#allocation4 + $0x8] sm:$0xff] }
 0x281   :  { %4392 = vmatprep.subr.bf16.mxu0 %v5673_v58  ;;  %4424 = vmatprep.subr.bf16.mxu1 %v5675_v59  ;;  %v1302_v58 = vld [vmem:[#allocation4 + $0x28] sm:$0xff]  ;;  %v1300_v59 = vld [vmem:[#allocation4 + $0x18] sm:$0xff] }
 0x284   :  { %4394 = vmatpush1.bf16.msra.mxu0 %v5679_v7  ;;  %4426 = vmatpush1.bf16.msra.mxu1 %v5681_v8  ;;  %v5819_v7 = vpack.c.bf16 %v1302_v58, %v1298_v54  ;;  %v1304_v8 = vld [vmem:[#allocation4 + $0x38] sm:$0xff]  ;;  %v1335_v58 = vld [vmem:[#allocation4 + $0x130] sm:$0xff] }
 0x285   :  { %v5821_v37 = vpack.c.bf16 %v1304_v8, %v1300_v59  ;;  %v1338_v59 = vld [vmem:[#allocation4 + $0x148] sm:$0xff] }
 0x286   :  { %4428 = vmatprep.subr.bf16.mxu0 %v5819_v7  ;;  %v1342_v8 = vld [vmem:[#allocation4 + $0x168] sm:$0xff] }
 0x287   :  { %4460 = vmatprep.subr.bf16.mxu1 %v5821_v37  ;;  %v5876_v34 = vpack.c.bf16 %v1342_v8, %v1338_v59 }
 0x33a   :  { %v913_v22 = vpop.f32.mrb[6].mxu0  ;;  %v984_v26 = vpop.f32.mrb[6].mxu1 }
 0x33b   :  { %v915_v27 = vpop.f32.mrb[7].mxu0  ;;  %v986_v31 = vpop.f32.mrb[7].mxu1 }
 0x33c   :  { %v993_v38 = vcombine.low %v913_v22, %v915_v27  ;;  %v994_v39 = vcombine.low %v984_v26, %v986_v31  ;;  %v1315_v22 = vld [vmem:[#allocation4 + $0x90] sm:$0xff]  ;;  %v1322_v31 = vld [vmem:[#allocation4 + $0xc8] sm:$0xff] }
 0x33d   :  { %v1319_v26 = vld [vmem:[#allocation4 + $0xb0] sm:$0xff] }
 0x33e   :  { %v1001_v43 = vrot.slane %v993_v38, %v5733_v45  ;;  %v1008_v44 = vrot.slane %v994_v39, %v5733_v45  ;;  %v5850_v27 = vpack.c.bf16 %v1319_v26, %v1315_v22  ;;  %v1326_v38 = vld [vmem:[#allocation4 + $0xe8] sm:$0xff]  ;;  %v1324_v39 = vld [vmem:[#allocation4 + $0xd8] sm:$0xff]  ;;  %v1347_v22 = vld [vmem:[#allocation4 + $0x190] sm:$0xff]  ;;  %v5891_v26 = vpack.c.bf16 %v1352_v2, %v1348_v18 }
 0x340   :  { %v1009_v51 = vcombine.low %v1001_v43, %v1008_v44  ;;  %v5854_v43 = vpack.c.bf16 %v1326_v38, %v1322_v31  ;;  %v1328_v44 = vld [vmem:[#allocation4 + $0xf8] sm:$0xff]  ;;  %v1351_v31 = vld [vmem:[#allocation4 + $0x1b0] sm:$0xff]  ;;  %v1354_v38 = vld [vmem:[#allocation4 + $0x1c8] sm:$0xff] }
 0x342   :  { %v1016_v52 = vrot.slane %v1009_v51, %v5733_v45  ;;  %v1321_v51 = vld [vmem:[#allocation4 + $0xc0] sm:$0xff] }
 0x344   :  { %v1018_v56 = vadd.f32 %v1016_v52, %v782_v55  ;;  %v1325_v52 = vld [vmem:[#allocation4 + $0xe0] sm:$0xff]  ;;  %v5857_v55 = vpack.c.bf16 %v1328_v44, %v1324_v39  ;;  %v1358_v39 = vld [vmem:[#allocation4 + $0x1e8] sm:$0xff]  ;;  %v1356_v44 = vld [vmem:[#allocation4 + $0x1d8] sm:$0xff] }
 0x346   :  { %v1019_v63 = vmul.f32 0.5, %v1018_v56  ;;  %v1024_v0 = vrot.slane %v1018_v56, 3  ;;  %v5859_v56 = vpack.c.bf16 %v1325_v52, %v1321_v51  ;;  %v1360_v51 = vld [vmem:[#allocation4 + $0x1f8] sm:$0xff] }
 0x348   :  { %5279 = vtanh.f32 %v1019_v63  ;;  %v1323_v63 = vld [vmem:[#allocation4 + $0xd0] sm:$0xff] }
 0x349   :  { %5281 = vtanh.f32 %v1024_v0  ;;  %v1327_v0 = vld [vmem:[#allocation4 + $0xf0] sm:$0xff] }
 0x352   :  { %v5280_v9 = vpop.eup %5279 }
 0x353   :  { %v1021_v10 = vmul.f32 0.5, %v5280_v9  ;;  %v5282_v24 = vpop.eup %5281  ;;  %v1330_v9 = vld [vmem:[#allocation4 + $0x108] sm:$0xff] }
 0x355   :  { %v1022_v19 = vadd.f32 0.5, %v1021_v10  ;;  %v5862_v10 = vpack.c.bf16 %v1327_v0, %v1323_v63  ;;  %v5898_v63 = vpack.c.bf16 %v1351_v31, %v1347_v22  ;;  %v5900_v0 = vpack.c.bf16 %v1358_v39, %v1354_v38 }
 0x357   :  { %v1028_v20 = vrot.slane %v1022_v19, 1  ;;  %v1031_v35 = vmul.f32 %v5282_v24, %v1022_v19  ;;  %v1034_v41 = vrot.slane %v1022_v19, 2  ;;  %v1334_v19 = vld [vmem:[#allocation4 + $0x128] sm:$0xff]  ;;  %v1336_v24 = vld [vmem:[#allocation4 + $0x138] sm:$0xff] }
 0x359   :  { %v1030_v25 = vmul.f32 %v1028_v20, %v775_v28  ;;  %v1313_v28 = vld [vmem:[#allocation4 + $0x80] sm:$0xff]  ;;  %v1332_v20 = vld [vmem:[#allocation4 + $0x118] sm:$0xff] }
 0x35a   :  { %v5847_v33 = vpack.c.bf16 %v1317_v29, %v1313_v28  ;;  %v1345_v28 = vld [vmem:[#allocation4 + $0x180] sm:$0xff] }
 0x35b   :  { %v5814_v36 = vadd.f32 %v1031_v35, %v1030_v25  ;;  %v5865_v25 = vpack.c.bf16 %v1334_v19, %v1330_v9  ;;  %v5867_v35 = vpack.c.bf16 %v1336_v24, %v1332_v20  ;;  %v1349_v29 = vld [vmem:[#allocation4 + $0x1a0] sm:$0xff]  ;;  %v5903_v20 = vpack.c.bf16 %v1360_v51, %v1356_v44  ;;  %v1355_v24 = vld [vmem:[#allocation4 + $0x1d0] sm:$0xff] }
 0x35c   :  { %v5894_v52 = vpack.c.bf16 %v1349_v29, %v1345_v28  ;;  %v1353_v9 = vld [vmem:[#allocation4 + $0x1c0] sm:$0xff] }
 0x35d   :  { %5283 = vtanh.f32 %v5814_v36  ;;  %v1357_v19 = vld [vmem:[#allocation4 + $0x1e0] sm:$0xff] }
 0x367   :  { %v5284_v42 = vpop.eup %5283 }
 0x368   :  { %v1036_v53 = vmul.f32 %v5284_v42, %v1034_v41  ;;  %v1329_v41 = vld [vmem:[#allocation4 + $0x100] sm:$0xff] }
 0x369   :  { %v1333_v42 = vld [vmem:[#allocation4 + $0x120] sm:$0xff] }
 0x36a   :  { %1037 = vst [vmem:[#allocation2 + $0x2] sm:$0x1] %v1036_v53  ;;  %1169 = vmatmul.mubr.f32.vlgmr.msra.gmra.mrb[8].mxu0 %v1036_v53  ;;  %1240 = vmatmul.mubr.f32.vlgmr.msra.gmra.mrb[8].mxu1 %v1036_v53  ;;  %v1331_v53 = vld [vmem:[#allocation4 + $0x110] sm:$0xff]  ;;  %v5870_v54 = vpack.c.bf16 %v1333_v42, %v1329_v41  ;;  %v5906_v42 = vpack.c.bf16 %v1357_v19, %v1353_v9 }
 0x36b   :  { %1425 = vmatprep.mubr.f32.mxu0 %v5462_v1  ;;  %1496 = vmatprep.mubr.f32.mxu1 %v5462_v1  ;;  %v5874_v32 = vpack.c.bf16 %v1335_v58, %v1331_v53  ;;  %v1359_v41 = vld [vmem:[#allocation4 + $0x1f0] sm:$0xff] }
 0x36c   :  { %4430 = vmatpush1.bf16.msra.mxu0 %v5823_v40  ;;  %4462 = vmatpush1.bf16.msra.mxu1 %v5826_v48  ;;  %v5910_v53 = vpack.c.bf16 %v1359_v41, %v1355_v24 }
 0x36d   :  { %4432 = vmatprep.subr.bf16.mxu0 %v5831_v60  ;;  %4464 = vmatprep.subr.bf16.mxu1 %v5833_v12 }
 0x370   :  { %4434 = vmatpush1.bf16.msra.mxu0 %v5835_v13  ;;  %4466 = vmatpush1.bf16.msra.mxu1 %v5838_v14 }
 0x371   :  { %4436 = vmatprep.subr.bf16.mxu0 %v5843_v21  ;;  %4468 = vmatprep.subr.bf16.mxu1 %v5845_v30 }
 0x374   :  { %4438 = vmatpush1.bf16.msra.mxu0 %v5847_v33  ;;  %4470 = vmatpush1.bf16.msra.mxu1 %v5850_v27 }
 0x375   :  { %4440 = vmatprep.subr.bf16.mxu0 %v5854_v43  ;;  %4472 = vmatprep.subr.bf16.mxu1 %v5857_v55 }
 0x378   :  { %4442 = vmatpush1.bf16.msra.mxu0 %v5859_v56  ;;  %4474 = vmatpush1.bf16.msra.mxu1 %v5862_v10 }
 0x379   :  { %4444 = vmatprep.subr.bf16.mxu0 %v5865_v25  ;;  %4476 = vmatprep.subr.bf16.mxu1 %v5867_v35 }
 0x37c   :  { %4446 = vmatpush1.bf16.msra.mxu0 %v5870_v54  ;;  %4478 = vmatpush1.bf16.msra.mxu1 %v5874_v32 }
 0x37d   :  { %4448 = vmatprep.subr.bf16.mxu0 %v5876_v34  ;;  %4480 = vmatprep.subr.bf16.mxu1 %v5879_v50 }
 0x380   :  { %4450 = vmatpush1.bf16.msra.mxu0 %v5882_v15  ;;  %4482 = vmatpush1.bf16.msra.mxu1 %v5886_v16 }
 0x381   :  { %4452 = vmatprep.subr.bf16.mxu0 %v5888_v23  ;;  %4484 = vmatprep.subr.bf16.mxu1 %v5891_v26 }
 0x384   :  { %4454 = vmatpush1.bf16.msra.mxu0 %v5894_v52  ;;  %4486 = vmatpush1.bf16.msra.mxu1 %v5898_v63 }
 0x385   :  { %4456 = vmatprep.subr.bf16.mxu0 %v5900_v0  ;;  %4488 = vmatprep.subr.bf16.mxu1 %v5903_v20 }
 0x388   :  { %4458 = vmatpush1.bf16.msra.mxu0 %v5906_v42  ;;  %4490 = vmatpush1.bf16.msra.mxu1 %v5910_v53 }
 0x389   :  { %4492 = vmatprep.subr.bf16.mxu0 %v5819_v7  ;;  %4524 = vmatprep.subr.bf16.mxu1 %v5821_v37 }
 0x43d   :  { %v1170_v58 = vpop.f32.mrb[8].mxu0  ;;  %v1241_v59 = vpop.f32.mrb[8].mxu1 }
 0x43e   :  { %v1172_v8 = vpop.f32.mrb[9].mxu0  ;;  %v1243_v46 = vpop.f32.mrb[9].mxu1 }
 0x43f   :  { %v1250_v47 = vcombine.low %v1170_v58, %v1172_v8  ;;  %v1251_v49 = vcombine.low %v1241_v59, %v1243_v46 }
 0x441   :  { %v1258_v57 = vrot.slane %v1250_v47, %v5733_v45  ;;  %v1265_v61 = vrot.slane %v1251_v49, %v5733_v45 }
 0x443   :  { %v1266_v62 = vcombine.low %v1258_v57, %v1265_v61 }
 0x445   :  { %v1273_v11 = vrot.slane %v1266_v62, %v5733_v45 }
 0x447   :  { %v1275_v18 = vadd.f32 %v1273_v11, %v1039_v17  ;;  %v1296_v11 = vld [vmem:[#allocation3 + $0x4] ss:$8 sm:$0xf] }
 0x449   :  { %v1276_v2 = vmul.f32 0.5, %v1275_v18  ;;  %v1281_v28 = vrot.slane %v1275_v18, 3 }
 0x44b   :  { %5285 = vtanh.f32 %v1276_v2 }
 0x44c   :  { %5287 = vtanh.f32 %v1281_v28 }
 0x455   :  { %v5286_v29 = vpop.eup %5285 }
 0x456   :  { %v1278_v22 = vmul.f32 0.5, %v5286_v29  ;;  %v5288_v39 = vpop.eup %5287 }
 0x458   :  { %v1279_v31 = vadd.f32 0.5, %v1278_v22 }
 0x45a   :  { %v1285_v38 = vrot.slane %v1279_v31, 1  ;;  %v1288_v51 = vmul.f32 %v5288_v39, %v1279_v31  ;;  %v1291_v19 = vrot.slane %v1279_v31, 2 }
 0x45c   :  { %v1287_v44 = vmul.f32 %v1285_v38, %v5814_v36 }
 0x45e   :  { %v5921_v9 = vadd.f32 %v1288_v51, %v1287_v44 }
 0x460   :  { %5289 = vtanh.f32 %v5921_v9 }
 0x46a   :  { %v5290_v24 = vpop.eup %5289 }
 0x46b   :  { %v1293_v41 = vmul.f32 %v5290_v24, %v1291_v19 }
 0x46d   :  { %1294 = vst [vmem:[#allocation2 + $0x3] sm:$0x1] %v1293_v41  ;;  %1426 = vmatmul.mubr.f32.vlgmr.msra.gmra.mrb[10].mxu0 %v1293_v41  ;;  %1497 = vmatmul.mubr.f32.vlgmr.msra.gmra.mrb[10].mxu1 %v1293_v41 }
 0x46e   :  { %4494 = vmatpush1.bf16.msra.mxu0 %v5823_v40  ;;  %4526 = vmatpush1.bf16.msra.mxu1 %v5826_v48 }
 0x46f   :  { %4496 = vmatprep.subr.bf16.mxu0 %v5831_v60  ;;  %4528 = vmatprep.subr.bf16.mxu1 %v5833_v12 }
 0x470   :  { %1682 = vmatprep.mubr.f32.mxu0 %v5462_v1  ;;  %1753 = vmatprep.mubr.f32.mxu1 %v5462_v1 }
 0x472   :  { %4498 = vmatpush1.bf16.msra.mxu0 %v5835_v13  ;;  %4530 = vmatpush1.bf16.msra.mxu1 %v5838_v14 }
 0x473   :  { %4500 = vmatprep.subr.bf16.mxu0 %v5843_v21  ;;  %4532 = vmatprep.subr.bf16.mxu1 %v5845_v30 }
 0x476   :  { %4502 = vmatpush1.bf16.msra.mxu0 %v5847_v33  ;;  %4534 = vmatpush1.bf16.msra.mxu1 %v5850_v27 }
 0x477   :  { %4504 = vmatprep.subr.bf16.mxu0 %v5854_v43  ;;  %4536 = vmatprep.subr.bf16.mxu1 %v5857_v55 }
 0x47a   :  { %4506 = vmatpush1.bf16.msra.mxu0 %v5859_v56  ;;  %4538 = vmatpush1.bf16.msra.mxu1 %v5862_v10 }
 0x47b   :  { %4508 = vmatprep.subr.bf16.mxu0 %v5865_v25  ;;  %4540 = vmatprep.subr.bf16.mxu1 %v5867_v35 }
 0x47e   :  { %4510 = vmatpush1.bf16.msra.mxu0 %v5870_v54  ;;  %4542 = vmatpush1.bf16.msra.mxu1 %v5874_v32 }
 0x47f   :  { %4512 = vmatprep.subr.bf16.mxu0 %v5876_v34  ;;  %4544 = vmatprep.subr.bf16.mxu1 %v5879_v50 }
 0x482   :  { %4514 = vmatpush1.bf16.msra.mxu0 %v5882_v15  ;;  %4546 = vmatpush1.bf16.msra.mxu1 %v5886_v16 }
 0x483   :  { %4516 = vmatprep.subr.bf16.mxu0 %v5888_v23  ;;  %4548 = vmatprep.subr.bf16.mxu1 %v5891_v26 }
 0x486   :  { %4518 = vmatpush1.bf16.msra.mxu0 %v5894_v52  ;;  %4550 = vmatpush1.bf16.msra.mxu1 %v5898_v63 }
 0x487   :  { %4520 = vmatprep.subr.bf16.mxu0 %v5900_v0  ;;  %4552 = vmatprep.subr.bf16.mxu1 %v5903_v20 }
 0x48a   :  { %4522 = vmatpush1.bf16.msra.mxu0 %v5906_v42  ;;  %4554 = vmatpush1.bf16.msra.mxu1 %v5910_v53 }
 0x48b   :  { %4556 = vmatprep.subr.bf16.mxu0 %v5819_v7  ;;  %4588 = vmatprep.subr.bf16.mxu1 %v5821_v37 }
 0x540   :  { %v1427_v36 = vpop.f32.mrb[10].mxu0  ;;  %v1498_v58 = vpop.f32.mrb[10].mxu1 }
 0x541   :  { %v1429_v59 = vpop.f32.mrb[11].mxu0  ;;  %v1500_v8 = vpop.f32.mrb[11].mxu1 }
 0x542   :  { %v1507_v46 = vcombine.low %v1427_v36, %v1429_v59  ;;  %v1508_v47 = vcombine.low %v1498_v58, %v1500_v8 }
 0x544   :  { %v1515_v49 = vrot.slane %v1507_v46, %v5733_v45  ;;  %v1522_v57 = vrot.slane %v1508_v47, %v5733_v45 }
 0x546   :  { %v1523_v61 = vcombine.low %v1515_v49, %v1522_v57 }
 0x548   :  { %v1530_v62 = vrot.slane %v1523_v61, %v5733_v45 }
 0x54a   :  { %v1532_v17 = vadd.f32 %v1530_v62, %v1296_v11  ;;  %v1553_v62 = vld [vmem:[#allocation3 + $0x5] ss:$8 sm:$0xf] }
 0x54c   :  { %v1533_v18 = vmul.f32 0.5, %v1532_v17  ;;  %v1538_v2 = vrot.slane %v1532_v17, 3 }
 0x54e   :  { %5291 = vtanh.f32 %v1533_v18 }
 0x54f   :  { %5293 = vtanh.f32 %v1538_v2 }
 0x558   :  { %v5292_v28 = vpop.eup %5291 }
 0x559   :  { %v1535_v29 = vmul.f32 0.5, %v5292_v28  ;;  %v5294_v38 = vpop.eup %5293 }
 0x55b   :  { %v1536_v22 = vadd.f32 0.5, %v1535_v29 }
 0x55d   :  { %v1542_v31 = vrot.slane %v1536_v22, 1  ;;  %v1545_v44 = vmul.f32 %v5294_v38, %v1536_v22  ;;  %v1548_v19 = vrot.slane %v1536_v22, 2 }
 0x55f   :  { %v1544_v39 = vmul.f32 %v1542_v31, %v5921_v9 }
 0x561   :  { %v5962_v51 = vadd.f32 %v1545_v44, %v1544_v39 }
 0x563   :  { %5295 = vtanh.f32 %v5962_v51 }
 0x56d   :  { %v5296_v24 = vpop.eup %5295 }
 0x56e   :  { %v1550_v41 = vmul.f32 %v5296_v24, %v1548_v19  ;;  %v2328_v24 = vld [vmem:[#allocation7 + $0x20] sm:$0xff] }
 0x570   :  { %1551 = vst [vmem:[#allocation2 + $0x4] sm:$0x1] %v1550_v41  ;;  %1683 = vmatmul.mubr.f32.vlgmr.msra.gmra.mrb[12].mxu0 %v1550_v41  ;;  %1754 = vmatmul.mubr.f32.vlgmr.msra.gmra.mrb[12].mxu1 %v1550_v41 }
 0x571   :  { %4558 = vmatpush1.bf16.msra.mxu0 %v5823_v40  ;;  %4590 = vmatpush1.bf16.msra.mxu1 %v5826_v48 }
 0x572   :  { %4560 = vmatprep.subr.bf16.mxu0 %v5831_v60  ;;  %4592 = vmatprep.subr.bf16.mxu1 %v5833_v12 }
 0x573   :  { %1939 = vmatprep.mubr.f32.mxu0 %v5462_v1  ;;  %2010 = vmatprep.mubr.f32.mxu1 %v5462_v1 }
 0x575   :  { %4562 = vmatpush1.bf16.msra.mxu0 %v5835_v13  ;;  %4594 = vmatpush1.bf16.msra.mxu1 %v5838_v14 }
 0x576   :  { %4564 = vmatprep.subr.bf16.mxu0 %v5843_v21  ;;  %4596 = vmatprep.subr.bf16.mxu1 %v5845_v30 }
 0x579   :  { %4566 = vmatpush1.bf16.msra.mxu0 %v5847_v33  ;;  %4598 = vmatpush1.bf16.msra.mxu1 %v5850_v27 }
 0x57a   :  { %4568 = vmatprep.subr.bf16.mxu0 %v5854_v43  ;;  %4600 = vmatprep.subr.bf16.mxu1 %v5857_v55 }
 0x57d   :  { %4570 = vmatpush1.bf16.msra.mxu0 %v5859_v56  ;;  %4602 = vmatpush1.bf16.msra.mxu1 %v5862_v10 }
 0x57e   :  { %4572 = vmatprep.subr.bf16.mxu0 %v5865_v25  ;;  %4604 = vmatprep.subr.bf16.mxu1 %v5867_v35 }
 0x581   :  { %4574 = vmatpush1.bf16.msra.mxu0 %v5870_v54  ;;  %4606 = vmatpush1.bf16.msra.mxu1 %v5874_v32 }
 0x582   :  { %4576 = vmatprep.subr.bf16.mxu0 %v5876_v34  ;;  %4608 = vmatprep.subr.bf16.mxu1 %v5879_v50 }
 0x585   :  { %4578 = vmatpush1.bf16.msra.mxu0 %v5882_v15  ;;  %4610 = vmatpush1.bf16.msra.mxu1 %v5886_v16 }
 0x586   :  { %4580 = vmatprep.subr.bf16.mxu0 %v5888_v23  ;;  %4612 = vmatprep.subr.bf16.mxu1 %v5891_v26 }
 0x589   :  { %4582 = vmatpush1.bf16.msra.mxu0 %v5894_v52  ;;  %4614 = vmatpush1.bf16.msra.mxu1 %v5898_v63 }
 0x58a   :  { %4584 = vmatprep.subr.bf16.mxu0 %v5900_v0  ;;  %4616 = vmatprep.subr.bf16.mxu1 %v5903_v20 }
 0x58d   :  { %4586 = vmatpush1.bf16.msra.mxu0 %v5906_v42  ;;  %4618 = vmatpush1.bf16.msra.mxu1 %v5910_v53 }
 0x58e   :  { %4620 = vmatprep.subr.bf16.mxu0 %v5819_v7  ;;  %4652 = vmatprep.subr.bf16.mxu1 %v5821_v37 }
 0x643   :  { %v1684_v9 = vpop.f32.mrb[12].mxu0  ;;  %v1755_v36 = vpop.f32.mrb[12].mxu1 }
 0x644   :  { %v1686_v58 = vpop.f32.mrb[13].mxu0  ;;  %v1757_v59 = vpop.f32.mrb[13].mxu1 }
 0x645   :  { %v1764_v8 = vcombine.low %v1684_v9, %v1686_v58  ;;  %v1765_v46 = vcombine.low %v1755_v36, %v1757_v59  ;;  %v2326_v36 = vld [vmem:[#allocation7 + $0x10] sm:$0xff] }
 0x646   :  { %v2330_v58 = vld [vmem:[#allocation7 + $0x30] sm:$0xff] }
 0x647   :  { %v1772_v47 = vrot.slane %v1764_v8, %v5733_v45  ;;  %v1779_v49 = vrot.slane %v1765_v46, %v5733_v45  ;;  %v4717_v59 = vpack.c.bf16 %v2330_v58, %v2326_v36  ;;  %v2333_v8 = vld [vmem:[#allocation7 + $0x48] sm:$0xff]  ;;  %v2368_v36 = vld [vmem:[#allocation7 + $0x160] sm:$0xff] }
 0x648   :  { %v2337_v46 = vld [vmem:[#allocation7 + $0x68] sm:$0xff] }
 0x649   :  { %v1780_v57 = vcombine.low %v1772_v47, %v1779_v49  ;;  %v2335_v47 = vld [vmem:[#allocation7 + $0x58] sm:$0xff]  ;;  %v4687_v49 = vpack.c.bf16 %v2337_v46, %v2333_v8  ;;  %v2366_v8 = vld [vmem:[#allocation7 + $0x150] sm:$0xff] }
 0x64a   :  { %v2370_v46 = vld [vmem:[#allocation7 + $0x170] sm:$0xff] }
 0x64b   :  { %v1787_v61 = vrot.slane %v1780_v57, %v5733_v45  ;;  %v2339_v57 = vld [vmem:[#allocation7 + $0x78] sm:$0xff] }
 0x64d   :  { %v1789_v11 = vadd.f32 %v1787_v61, %v1553_v62  ;;  %v2332_v61 = vld [vmem:[#allocation7 + $0x40] sm:$0xff] }
 0x64e   :  { %v2336_v62 = vld [vmem:[#allocation7 + $0x60] sm:$0xff] }
 0x64f   :  { %v1790_v17 = vmul.f32 0.5, %v1789_v11  ;;  %v1795_v7 = vrot.slane %v1789_v11, 3  ;;  %v4719_v11 = vpack.c.bf16 %v2339_v57, %v2335_v47  ;;  %v4737_v47 = vpack.c.bf16 %v2370_v46, %v2366_v8  ;;  %v2377_v57 = vld [vmem:[#allocation7 + $0x1a8] sm:$0xff]  ;;  %v2557_v46 = vld [vmem:[#allocation9] sm:$0xff] }
 0x651   :  { %5297 = vtanh.f32 %v1790_v17  ;;  %v4689_v17 = vpack.c.bf16 %v2336_v62, %v2332_v61  ;;  %v2375_v61 = vld [vmem:[#allocation7 + $0x198] sm:$0xff] }
 0x652   :  { %5299 = vtanh.f32 %v1795_v7  ;;  %v2334_v7 = vld [vmem:[#allocation7 + $0x50] sm:$0xff] }
 0x65b   :  { %v5298_v37 = vpop.eup %5297 }
 0x65c   :  { %v1792_v18 = vmul.f32 0.5, %v5298_v37  ;;  %v5300_v29 = vpop.eup %5299  ;;  %v2338_v37 = vld [vmem:[#allocation7 + $0x70] sm:$0xff] }
 0x65e   :  { %v1793_v2 = vadd.f32 0.5, %v1792_v18  ;;  %v4721_v18 = vpack.c.bf16 %v2338_v37, %v2334_v7  ;;  %v2376_v7 = vld [vmem:[#allocation7 + $0x1a0] sm:$0xff] }
 0x660   :  { %v1799_v28 = vrot.slane %v1793_v2, 1  ;;  %v1802_v31 = vmul.f32 %v5300_v29, %v1793_v2  ;;  %v1805_v39 = vrot.slane %v1793_v2, 2  ;;  %v2341_v2 = vld [vmem:[#allocation7 + $0x88] sm:$0xff]  ;;  %v2343_v29 = vld [vmem:[#allocation7 + $0x98] sm:$0xff] }
 0x662   :  { %v1801_v22 = vmul.f32 %v1799_v28, %v5962_v51  ;;  %v2324_v51 = vld [vmem:[#allocation7] sm:$0xff]  ;;  %v2345_v28 = vld [vmem:[#allocation7 + $0xa8] sm:$0xff] }
 0x663   :  { %v4685_v9 = vpack.c.bf16 %v2328_v24, %v2324_v51  ;;  %v2367_v51 = vld [vmem:[#allocation7 + $0x158] sm:$0xff] }
 0x664   :  { %v1803_v38 = vadd.f32 %v1802_v31, %v1801_v22  ;;  %v4691_v22 = vpack.c.bf16 %v2345_v28, %v2341_v2  ;;  %v2347_v31 = vld [vmem:[#allocation7 + $0xb8] sm:$0xff]  ;;  %v2374_v2 = vld [vmem:[#allocation7 + $0x190] sm:$0xff] }
 0x665   :  { %v2378_v28 = vld [vmem:[#allocation7 + $0x1b0] sm:$0xff] }
 0x666   :  { %5301 = vtanh.f32 %v1803_v38 }
 0x670   :  { %v5302_v44 = vpop.eup %5301 }
 0x671   :  { %v1807_v19 = vmul.f32 %v5302_v44, %v1805_v39  ;;  %v2344_v39 = vld [vmem:[#allocation7 + $0xa0] sm:$0xff]  ;;  %v4723_v44 = vpack.c.bf16 %v2347_v31, %v2343_v29  ;;  %v2381_v29 = vld [vmem:[#allocation7 + $0x1c8] sm:$0xff] }
 0x672   :  { %v2385_v31 = vld [vmem:[#allocation7 + $0x1e8] sm:$0xff] }
 0x673   :  { %1808 = vst [vmem:[#allocation2 + $0x5] sm:$0x1] %v1807_v19  ;;  %1940 = vmatmul.mubr.f32.vlgmr.msra.gmra.mrb[14].mxu0 %v1807_v19  ;;  %2011 = vmatmul.mubr.f32.vlgmr.msra.gmra.mrb[14].mxu1 %v1807_v19 }
 0x674   :  { %4622 = vmatpush1.bf16.msra.mxu0 %v5823_v40  ;;  %4654 = vmatpush1.bf16.msra.mxu1 %v5826_v48 }
 0x675   :  { %4624 = vmatprep.subr.bf16.mxu0 %v5831_v60  ;;  %4656 = vmatprep.subr.bf16.mxu1 %v5833_v12 }
 0x676   :  { %2196 = vmatprep.mubr.f32.mxu0 %v5462_v1  ;;  %2267 = vmatprep.mubr.f32.mxu1 %v5462_v1 }
 0x678   :  { %4626 = vmatpush1.bf16.msra.mxu0 %v5835_v13  ;;  %4658 = vmatpush1.bf16.msra.mxu1 %v5838_v14 }
 0x679   :  { %4628 = vmatprep.subr.bf16.mxu0 %v5843_v21  ;;  %4660 = vmatprep.subr.bf16.mxu1 %v5845_v30 }
 0x67c   :  { %4630 = vmatpush1.bf16.msra.mxu0 %v5847_v33  ;;  %4662 = vmatpush1.bf16.msra.mxu1 %v5850_v27 }
 0x67d   :  { %4632 = vmatprep.subr.bf16.mxu0 %v5854_v43  ;;  %4664 = vmatprep.subr.bf16.mxu1 %v5857_v55  ;;  %v1810_v43 = vld [vmem:[#allocation3 + $0x6] ss:$8 sm:$0xf] }
 0x680   :  { %4634 = vmatpush1.bf16.msra.mxu0 %v5859_v56  ;;  %4666 = vmatpush1.bf16.msra.mxu1 %v5862_v10 }
 0x681   :  { %4636 = vmatprep.subr.bf16.mxu0 %v5865_v25  ;;  %4668 = vmatprep.subr.bf16.mxu1 %v5867_v35 }
 0x684   :  { %4638 = vmatpush1.bf16.msra.mxu0 %v5870_v54  ;;  %4670 = vmatpush1.bf16.msra.mxu1 %v5874_v32 }
 0x685   :  { %4640 = vmatprep.subr.bf16.mxu0 %v5876_v34  ;;  %4672 = vmatprep.subr.bf16.mxu1 %v5879_v50 }
 0x688   :  { %4642 = vmatpush1.bf16.msra.mxu0 %v5882_v15  ;;  %4674 = vmatpush1.bf16.msra.mxu1 %v5886_v16 }
 0x689   :  { %4644 = vmatprep.subr.bf16.mxu0 %v5888_v23  ;;  %4676 = vmatprep.subr.bf16.mxu1 %v5891_v26 }
 0x68c   :  { %4646 = vmatpush1.bf16.msra.mxu0 %v5894_v52  ;;  %4678 = vmatpush1.bf16.msra.mxu1 %v5898_v63  ;;  %v2325_v63 = vld [vmem:[#allocation7 + $0x8] sm:$0xff] }
 0x68d   :  { %4648 = vmatprep.subr.bf16.mxu0 %v5900_v0  ;;  %4680 = vmatprep.subr.bf16.mxu1 %v5903_v20  ;;  %v2329_v0 = vld [vmem:[#allocation7 + $0x28] sm:$0xff]  ;;  %v2327_v20 = vld [vmem:[#allocation7 + $0x18] sm:$0xff] }
 0x690   :  { %4650 = vmatpush1.bf16.msra.mxu0 %v5906_v42  ;;  %4682 = vmatpush1.bf16.msra.mxu1 %v5910_v53  ;;  %v4683_v42 = vpack.c.bf16 %v2329_v0, %v2325_v63  ;;  %v2331_v53 = vld [vmem:[#allocation7 + $0x38] sm:$0xff]  ;;  %v2358_v63 = vld [vmem:[#allocation7 + $0x110] sm:$0xff] }
 0x691   :  { %v4715_v41 = vpack.c.bf16 %v2331_v53, %v2327_v20  ;;  %v2362_v0 = vld [vmem:[#allocation7 + $0x130] sm:$0xff]  ;;  %v2369_v53 = vld [vmem:[#allocation7 + $0x168] sm:$0xff] }
 0x692   :  { %4684 = vmatprep.subr.bf16.mxu0 %v4683_v42  ;;  %v4733_v20 = vpack.c.bf16 %v2362_v0, %v2358_v63  ;;  %v2365_v42 = vld [vmem:[#allocation7 + $0x148] sm:$0xff] }
 0x693   :  { %4716 = vmatprep.subr.bf16.mxu1 %v4715_v41  ;;  %v4703_v24 = vpack.c.bf16 %v2369_v53, %v2365_v42  ;;  %v2371_v41 = vld [vmem:[#allocation7 + $0x178] sm:$0xff] }
 0x694   :  { %v4735_v58 = vpack.c.bf16 %v2371_v41, %v2367_v51 }
 0x746   :  { %v1941_v40 = vpop.f32.mrb[14].mxu0  ;;  %v2012_v48 = vpop.f32.mrb[14].mxu1 }
 0x747   :  { %v1943_v60 = vpop.f32.mrb[15].mxu0  ;;  %v2014_v12 = vpop.f32.mrb[15].mxu1 }
 0x748   :  { %v2021_v13 = vcombine.low %v1941_v40, %v1943_v60  ;;  %v2022_v14 = vcombine.low %v2012_v48, %v2014_v12  ;;  %v2342_v40 = vld [vmem:[#allocation7 + $0x90] sm:$0xff]  ;;  %v2349_v12 = vld [vmem:[#allocation7 + $0xc8] sm:$0xff] }
 0x749   :  { %v2346_v48 = vld [vmem:[#allocation7 + $0xb0] sm:$0xff] }
 0x74a   :  { %v2029_v21 = vrot.slane %v2021_v13, %v5733_v45  ;;  %v2036_v30 = vrot.slane %v2022_v14, %v5733_v45  ;;  %v4725_v60 = vpack.c.bf16 %v2346_v48, %v2342_v40  ;;  %v2353_v13 = vld [vmem:[#allocation7 + $0xe8] sm:$0xff]  ;;  %v2351_v14 = vld [vmem:[#allocation7 + $0xd8] sm:$0xff]  ;;  %v2380_v40 = vld [vmem:[#allocation7 + $0x1c0] sm:$0xff] }
 0x74b   :  { %v2384_v48 = vld [vmem:[#allocation7 + $0x1e0] sm:$0xff] }
 0x74c   :  { %v2037_v33 = vcombine.low %v2029_v21, %v2036_v30  ;;  %v4695_v21 = vpack.c.bf16 %v2353_v13, %v2349_v12  ;;  %v2355_v30 = vld [vmem:[#allocation7 + $0xf8] sm:$0xff]  ;;  %v4713_v12 = vpack.c.bf16 %v2384_v48, %v2380_v40  ;;  %v2386_v13 = vld [vmem:[#allocation7 + $0x1f0] sm:$0xff] }
 0x74e   :  { %v2044_v27 = vrot.slane %v2037_v33, %v5733_v45  ;;  %v2348_v33 = vld [vmem:[#allocation7 + $0xc0] sm:$0xff] }
 0x750   :  { %v2046_v55 = vadd.f32 %v2044_v27, %v1810_v43  ;;  %v2352_v27 = vld [vmem:[#allocation7 + $0xe0] sm:$0xff]  ;;  %v4727_v43 = vpack.c.bf16 %v2355_v30, %v2351_v14  ;;  %v2558_v14 = vld [vmem:[#allocation9 + $0x8] sm:$0xff] }
 0x752   :  { %v2047_v56 = vmul.f32 0.5, %v2046_v55  ;;  %v2052_v10 = vrot.slane %v2046_v55, 3  ;;  %v4697_v55 = vpack.c.bf16 %v2352_v27, %v2348_v33  ;;  %v2560_v27 = vld [vmem:[#allocation9 + $0x18] sm:$0xff] }
 0x754   :  { %5303 = vtanh.f32 %v2047_v56  ;;  %v2350_v56 = vld [vmem:[#allocation7 + $0xd0] sm:$0xff] }
 0x755   :  { %5305 = vtanh.f32 %v2052_v10  ;;  %v2354_v10 = vld [vmem:[#allocation7 + $0xf0] sm:$0xff] }
 0x75e   :  { %v5304_v25 = vpop.eup %5303 }
 0x75f   :  { %v2049_v35 = vmul.f32 0.5, %v5304_v25  ;;  %v5306_v34 = vpop.eup %5305  ;;  %v4729_v25 = vpack.c.bf16 %v2354_v10, %v2350_v56 }
 0x761   :  { %v2050_v54 = vadd.f32 0.5, %v2049_v35  ;;  %v2357_v35 = vld [vmem:[#allocation7 + $0x108] sm:$0xff] }
 0x763   :  { %v2056_v32 = vrot.slane %v2050_v54, 1  ;;  %v2059_v15 = vmul.f32 %v5306_v34, %v2050_v54  ;;  %v2062_v23 = vrot.slane %v2050_v54, 2  ;;  %v2361_v54 = vld [vmem:[#allocation7 + $0x128] sm:$0xff] }
 0x764   :  { %v4699_v34 = vpack.c.bf16 %v2361_v54, %v2357_v35 }
 0x765   :  { %v2058_v50 = vmul.f32 %v2056_v32, %v1803_v38  ;;  %v2340_v38 = vld [vmem:[#allocation7 + $0x80] sm:$0xff]  ;;  %v2359_v32 = vld [vmem:[#allocation7 + $0x118] sm:$0xff] }
 0x766   :  { %v4693_v19 = vpack.c.bf16 %v2344_v39, %v2340_v38  ;;  %v2383_v38 = vld [vmem:[#allocation7 + $0x1d8] sm:$0xff] }
 0x767   :  { %v6038_v16 = vadd.f32 %v2059_v15, %v2058_v50  ;;  %v2363_v50 = vld [vmem:[#allocation7 + $0x138] sm:$0xff]  ;;  %v2356_v15 = vld [vmem:[#allocation7 + $0x100] sm:$0xff] }
 0x768   :  { %v2387_v39 = vld [vmem:[#allocation7 + $0x1f8] sm:$0xff] }
 0x769   :  { %5307 = vtanh.f32 %v6038_v16 }
 0x773   :  { %v5308_v26 = vpop.eup %5307 }
 0x774   :  { %v2064_v52 = vmul.f32 %v5308_v26, %v2062_v23  ;;  %v2360_v23 = vld [vmem:[#allocation7 + $0x120] sm:$0xff]  ;;  %v4731_v26 = vpack.c.bf16 %v2363_v50, %v2359_v32 }
 0x776   :  { %2065 = vst [vmem:[#allocation2 + $0x6] sm:$0x1] %v2064_v52  ;;  %2197 = vmatmul.mubr.f32.vlgmr.msra.gmra.mrb[16].mxu0 %v2064_v52  ;;  %2268 = vmatmul.mubr.f32.vlgmr.msra.gmra.mrb[16].mxu1 %v2064_v52  ;;  %v4701_v52 = vpack.c.bf16 %v2360_v23, %v2356_v15 }
 0x777   :  { %2474 = vmatprep.mubr.f32.mxu0 %v5462_v1  ;;  %2545 = vmatprep.mubr.f32.mxu1 %v5462_v1 }
 0x778   :  { %4686 = vmatpush1.bf16.msra.mxu0 %v4685_v9  ;;  %4718 = vmatpush1.bf16.msra.mxu1 %v4717_v59  ;;  %v2364_v9 = vld [vmem:[#allocation7 + $0x140] sm:$0xff] }
 0x779   :  { %4688 = vmatprep.subr.bf16.mxu0 %v4687_v49  ;;  %4720 = vmatprep.subr.bf16.mxu1 %v4719_v11  ;;  %v4705_v59 = vpack.c.bf16 %v2368_v36, %v2364_v9  ;;  %v2373_v49 = vld [vmem:[#allocation7 + $0x188] sm:$0xff]  ;;  %v2379_v11 = vld [vmem:[#allocation7 + $0x1b8] sm:$0xff] }
 0x77a   :  { %v4707_v62 = vpack.c.bf16 %v2377_v57, %v2373_v49  ;;  %v4739_v37 = vpack.c.bf16 %v2379_v11, %v2375_v61  ;;  %v2559_v49 = vld [vmem:[#allocation9 + $0x10] sm:$0xff]  ;;  %v2566_v61 = vld [vmem:[#allocation9 + $0x48] sm:$0xff]  ;;  %v2568_v11 = vld [vmem:[#allocation9 + $0x58] sm:$0xff] }
 0x77b   :  { %v2563_v57 = vld [vmem:[#allocation9 + $0x30] sm:$0xff] }
 0x77c   :  { %4690 = vmatpush1.bf16.msra.mxu0 %v4689_v17  ;;  %4722 = vmatpush1.bf16.msra.mxu1 %v4721_v18  ;;  %v2372_v17 = vld [vmem:[#allocation7 + $0x180] sm:$0xff] }
 0x77d   :  { %4692 = vmatprep.subr.bf16.mxu0 %v4691_v22  ;;  %4724 = vmatprep.subr.bf16.mxu1 %v4723_v44  ;;  %v4709_v18 = vpack.c.bf16 %v2376_v7, %v2372_v17  ;;  %v4741_v22 = vpack.c.bf16 %v2378_v28, %v2374_v2  ;;  %v4711_v44 = vpack.c.bf16 %v2385_v31, %v2381_v29  ;;  %v2572_v17 = vld [vmem:[#allocation9 + $0x78] sm:$0xff]  ;;  %v2567_v2 = vld [vmem:[#allocation9 + $0x50] sm:$0xff]  ;;  %v2574_v31 = vld [vmem:[#allocation9 + $0x88] sm:$0xff] }
 0x77e   :  { %v6059_v29 = vpack.c.bf16 %v2572_v17, %v2568_v11  ;;  %v2599_v17 = vld [vmem:[#allocation9 + $0x150] sm:$0xff] }
 0x780   :  { %4694 = vmatpush1.bf16.msra.mxu0 %v4693_v19  ;;  %4726 = vmatpush1.bf16.msra.mxu1 %v4725_v60  ;;  %v4743_v19 = vpack.c.bf16 %v2387_v39, %v2383_v38  ;;  %v2382_v60 = vld [vmem:[#allocation7 + $0x1d0] sm:$0xff]  ;;  %v2578_v38 = vld [vmem:[#allocation9 + $0xa8] sm:$0xff] }
 0x781   :  { %4696 = vmatprep.subr.bf16.mxu0 %v4695_v21  ;;  %4728 = vmatprep.subr.bf16.mxu1 %v4727_v43  ;;  %v2562_v21 = vld [vmem:[#allocation9 + $0x28] sm:$0xff]  ;;  %v4745_v30 = vpack.c.bf16 %v2386_v13, %v2382_v60  ;;  %v2564_v43 = vld [vmem:[#allocation9 + $0x38] sm:$0xff]  ;;  %v2573_v60 = vld [vmem:[#allocation9 + $0x80] sm:$0xff]  ;;  %v6069_v13 = vpack.c.bf16 %v2578_v38, %v2574_v31 }
 0x782   :  { %v6043_v33 = vpack.c.bf16 %v2562_v21, %v2558_v14  ;;  %v2575_v21 = vld [vmem:[#allocation9 + $0x90] sm:$0xff]  ;;  %v2612_v31 = vld [vmem:[#allocation9 + $0x1b8] sm:$0xff] }
 0x784   :  { %4698 = vmatpush1.bf16.msra.mxu0 %v4697_v55  ;;  %4730 = vmatpush1.bf16.msra.mxu1 %v4729_v25  ;;  %v6045_v55 = vpack.c.bf16 %v2564_v43, %v2560_v27  ;;  %v2582_v27 = vld [vmem:[#allocation9 + $0xc8] sm:$0xff] }
 0x785   :  { %4700 = vmatprep.subr.bf16.mxu0 %v4699_v34  ;;  %4732 = vmatprep.subr.bf16.mxu1 %v4731_v26  ;;  %v2067_v26 = vld [vmem:[#allocation3 + $0x7] ss:$8 sm:$0xf] }
 0x786   :  { %v2586_v43 = vld [vmem:[#allocation9 + $0xe8] sm:$0xff] }
 0x788   :  { %4702 = vmatpush1.bf16.msra.mxu0 %v4701_v52  ;;  %4734 = vmatpush1.bf16.msra.mxu1 %v4733_v20 }
 0x789   :  { %4704 = vmatprep.subr.bf16.mxu0 %v4703_v24  ;;  %4736 = vmatprep.subr.bf16.mxu1 %v4735_v58 }
 0x78c   :  { %4706 = vmatpush1.bf16.msra.mxu0 %v4705_v59  ;;  %4738 = vmatpush1.bf16.msra.mxu1 %v4737_v47  ;;  %v2561_v47 = vld [vmem:[#allocation9 + $0x20] sm:$0xff] }
 0x78d   :  { %4708 = vmatprep.subr.bf16.mxu0 %v4707_v62  ;;  %4740 = vmatprep.subr.bf16.mxu1 %v4739_v37  ;;  %v2570_v62 = vld [vmem:[#allocation9 + $0x68] sm:$0xff]  ;;  %v6053_v7 = vpack.c.bf16 %v2561_v47, %v2557_v46  ;;  %v6055_v37 = vpack.c.bf16 %v2563_v57, %v2559_v49  ;;  %v2604_v46 = vld [vmem:[#allocation9 + $0x178] sm:$0xff]  ;;  %v2597_v57 = vld [vmem:[#allocation9 + $0x140] sm:$0xff] }
 0x78e   :  { %v6057_v28 = vpack.c.bf16 %v2570_v62, %v2566_v61  ;;  %v2601_v61 = vld [vmem:[#allocation9 + $0x160] sm:$0xff] }
 0x78f   :  { %v6113_v38 = vpack.c.bf16 %v2601_v61, %v2597_v57 }
 0x790   :  { %4710 = vmatpush1.bf16.msra.mxu0 %v4709_v18  ;;  %4742 = vmatpush1.bf16.msra.mxu1 %v4741_v22  ;;  %v2569_v18 = vld [vmem:[#allocation9 + $0x60] sm:$0xff]  ;;  %v2571_v22 = vld [vmem:[#allocation9 + $0x70] sm:$0xff] }
 0x791   :  { %4712 = vmatprep.subr.bf16.mxu0 %v4711_v44  ;;  %4744 = vmatprep.subr.bf16.mxu1 %v4743_v19  ;;  %v2576_v44 = vld [vmem:[#allocation9 + $0x98] sm:$0xff]  ;;  %v6065_v48 = vpack.c.bf16 %v2571_v22, %v2567_v2  ;;  %v2610_v2 = vld [vmem:[#allocation9 + $0x1a8] sm:$0xff] }
 0x792   :  { %v2580_v19 = vld [vmem:[#allocation9 + $0xb8] sm:$0xff] }
 0x793   :  { %v6071_v14 = vpack.c.bf16 %v2580_v19, %v2576_v44  ;;  %v2608_v22 = vld [vmem:[#allocation9 + $0x198] sm:$0xff]  ;;  %v2605_v44 = vld [vmem:[#allocation9 + $0x180] sm:$0xff] }
 0x794   :  { %4714 = vmatpush1.bf16.msra.mxu0 %v4713_v12  ;;  %4746 = vmatpush1.bf16.msra.mxu1 %v4745_v30  ;;  %v2577_v12 = vld [vmem:[#allocation9 + $0xa0] sm:$0xff]  ;;  %v2579_v30 = vld [vmem:[#allocation9 + $0xb0] sm:$0xff] }
 0x795   :  { %4748 = vmatprep.subr.bf16.mxu0 %v6043_v33  ;;  %4780 = vmatprep.subr.bf16.mxu1 %v6045_v55  ;;  %v2609_v19 = vld [vmem:[#allocation9 + $0x1a0] sm:$0xff] }
 0x849   :  { %v2198_v56 = vpop.f32.mrb[16].mxu0  ;;  %v2269_v10 = vpop.f32.mrb[16].mxu1 }
 0x84a   :  { %v2200_v25 = vpop.f32.mrb[17].mxu0  ;;  %v2271_v35 = vpop.f32.mrb[17].mxu1 }
 0x84b   :  { %v2278_v54 = vcombine.low %v2198_v56, %v2200_v25  ;;  %v2279_v32 = vcombine.low %v2269_v10, %v2271_v35  ;;  %v2584_v56 = vld [vmem:[#allocation9 + $0xd8] sm:$0xff]  ;;  %v6077_v25 = vpack.c.bf16 %v2577_v12, %v2573_v60  ;;  %v6079_v35 = vpack.c.bf16 %v2579_v30, %v2575_v21  ;;  %v2607_v21 = vld [vmem:[#allocation9 + $0x190] sm:$0xff] }
 0x84c   :  { %v2588_v10 = vld [vmem:[#allocation9 + $0xf8] sm:$0xff]  ;;  %v6121_v12 = vpack.c.bf16 %v2612_v31, %v2608_v22  ;;  %v2611_v30 = vld [vmem:[#allocation9 + $0x1b0] sm:$0xff] }
 0x84d   :  { %v2286_v34 = vrot.slane %v2278_v54, %v5733_v45  ;;  %v2293_v50 = vrot.slane %v2279_v32, %v5733_v45  ;;  %v2581_v54 = vld [vmem:[#allocation9 + $0xc0] sm:$0xff] }
 0x84e   :  { %v2585_v32 = vld [vmem:[#allocation9 + $0xe0] sm:$0xff] }
 0x84f   :  { %v2294_v15 = vcombine.low %v2286_v34, %v2293_v50  ;;  %v6083_v34 = vpack.c.bf16 %v2586_v43, %v2582_v27  ;;  %v6085_v50 = vpack.c.bf16 %v2588_v10, %v2584_v56  ;;  %v2614_v27 = vld [vmem:[#allocation9 + $0x1c8] sm:$0xff]  ;;  %v2616_v56 = vld [vmem:[#allocation9 + $0x1d8] sm:$0xff] }
 0x850   :  { %v2618_v43 = vld [vmem:[#allocation9 + $0x1e8] sm:$0xff]  ;;  %v2620_v10 = vld [vmem:[#allocation9 + $0x1f8] sm:$0xff] }
 0x851   :  { %v2301_v23 = vrot.slane %v2294_v15, %v5733_v45  ;;  %v2583_v15 = vld [vmem:[#allocation9 + $0xd0] sm:$0xff] }
 0x853   :  { %v2303_v52 = vadd.f32 %v2301_v23, %v2067_v26  ;;  %v2587_v23 = vld [vmem:[#allocation9 + $0xf0] sm:$0xff]  ;;  %v2590_v26 = vld [vmem:[#allocation9 + $0x108] sm:$0xff] }
 0x855   :  { %v2304_v63 = vmul.f32 0.5, %v2303_v52  ;;  %v2309_v0 = vrot.slane %v2303_v52, 3  ;;  %v2594_v52 = vld [vmem:[#allocation9 + $0x128] sm:$0xff] }
 0x857   :  { %5309 = vtanh.f32 %v2304_v63  ;;  %v2592_v63 = vld [vmem:[#allocation9 + $0x118] sm:$0xff] }
 0x858   :  { %5311 = vtanh.f32 %v2309_v0  ;;  %v2596_v0 = vld [vmem:[#allocation9 + $0x138] sm:$0xff] }
 0x861   :  { %v5310_v20 = vpop.eup %5309 }
 0x862   :  { %v2306_v42 = vmul.f32 0.5, %v5310_v20  ;;  %v5312_v24 = vpop.eup %5311  ;;  %v6089_v20 = vpack.c.bf16 %v2585_v32, %v2581_v54  ;;  %v6125_v54 = vpack.c.bf16 %v2609_v19, %v2605_v44  ;;  %v6127_v32 = vpack.c.bf16 %v2611_v30, %v2607_v21 }
 0x864   :  { %v2307_v53 = vadd.f32 0.5, %v2306_v42  ;;  %v6091_v42 = vpack.c.bf16 %v2587_v23, %v2583_v15  ;;  %v2613_v15 = vld [vmem:[#allocation9 + $0x1c0] sm:$0xff]  ;;  %v6131_v23 = vpack.c.bf16 %v2618_v43, %v2614_v27 }
 0x866   :  { %v2313_v51 = vrot.slane %v2307_v53, 1  ;;  %v2316_v9 = vmul.f32 %v5312_v24, %v2307_v53  ;;  %v2319_v58 = vrot.slane %v2307_v53, 2  ;;  %v2589_v53 = vld [vmem:[#allocation9 + $0x100] sm:$0xff]  ;;  %v6095_v24 = vpack.c.bf16 %v2594_v52, %v2590_v26 }
 0x867   :  { %v6133_v26 = vpack.c.bf16 %v2620_v10, %v2616_v56  ;;  %v2617_v52 = vld [vmem:[#allocation9 + $0x1e0] sm:$0xff] }
 0x868   :  { %v2315_v41 = vmul.f32 %v2313_v51, %v6038_v16  ;;  %v2565_v16 = vld [vmem:[#allocation9 + $0x40] sm:$0xff] }
 0x869   :  { %v6063_v40 = vpack.c.bf16 %v2569_v18, %v2565_v16  ;;  %v2593_v51 = vld [vmem:[#allocation9 + $0x120] sm:$0xff]  ;;  %v2603_v16 = vld [vmem:[#allocation9 + $0x170] sm:$0xff]  ;;  %v2606_v18 = vld [vmem:[#allocation9 + $0x188] sm:$0xff] }
 0x86a   :  { %v2317_v36 = vadd.f32 %v2316_v9, %v2315_v41  ;;  %v6097_v41 = vpack.c.bf16 %v2596_v0, %v2592_v63  ;;  %v2591_v9 = vld [vmem:[#allocation9 + $0x110] sm:$0xff]  ;;  %v6101_v47 = vpack.c.bf16 %v2593_v51, %v2589_v53  ;;  %v6119_v60 = vpack.c.bf16 %v2610_v2, %v2606_v18 }
 0x86b   :  { %v2615_v63 = vld [vmem:[#allocation9 + $0x1d0] sm:$0xff]  ;;  %v6137_v53 = vpack.c.bf16 %v2617_v52, %v2613_v15 }
 0x86c   :  { %5313 = vtanh.f32 %v2317_v36  ;;  %v2595_v36 = vld [vmem:[#allocation9 + $0x130] sm:$0xff] }
 0x86d   :  { %v6103_v49 = vpack.c.bf16 %v2595_v36, %v2591_v9  ;;  %v2619_v0 = vld [vmem:[#allocation9 + $0x1f0] sm:$0xff] }
 0x86e   :  { %v6139_v51 = vpack.c.bf16 %v2619_v0, %v2615_v63  ;;  %v2388_v9 = vld [vmem:[%s6434_s6] sm:$0xf]  ;;  %s5464_s6 = smov [#allocation10]  }
 0x86f   :  { %v2393_v36 = vrot.slane %v2388_v9, %v5568_v5  ;;  %s4155_s18 = sshll.u32 %s5464_s6, 4  ;;  %s4156_s18 = int_to_ptr.vmem [resolvable:$true] %s4155_s18 }
 0x870   :  { %s5429_s19 = scalar_lea.vmem %s4156_s18, 16  ;;  %s5433_s20 = scalar_lea.vmem %s4156_s18, 32 }
 0x871   :  { %p5430_p10 = scmp.ne.s32.totalorder %s4156_s18, %s5429_s19  ;;  %p5434_p11 = scmp.lt.s32.totalorder %s4156_s18, %s4156_s18 }
 0x872   :  { %p5435_p12 = scmp.lt.s32.totalorder %s5433_s20, %s5429_s19 }
 0x874   :  { %p5436_p13 = por %p5435_p12, %p5434_p11 }
 0x876   :  { %v5314_v59 = vpop.eup %5313  ;;  %p5437_p0 = pnand %p5436_p13, %p5430_p10 }
 0x877   :  { %v2321_v8 = vmul.f32 %v5314_v59, %v2319_v58  ;;  %v2598_v58 = vld [vmem:[#allocation9 + $0x148] sm:$0xff] }
 0x878   :  { %v2602_v59 = vld [vmem:[#allocation9 + $0x168] sm:$0xff] }
 0x879   :  { %2322 = vst [vmem:[#allocation2 + $0x7] sm:$0x1] %v2321_v8  ;;  %v2600_v8 = vld [vmem:[#allocation9 + $0x158] sm:$0xff]  ;;  %v6107_v62 = vpack.c.bf16 %v2602_v59, %v2598_v58  ;;  %v2401_v58 = vrot.slane %v2388_v9, %v5571_v6  ;;  %v2397_v59 = vrot.slane %v2388_v9, %v5562_v3 }
 0x87a   :  { %v6109_v11 = vpack.c.bf16 %v2604_v46, %v2600_v8  ;;  %v2405_v8 = vrot.slane %v2388_v9, %v5565_v4 }
 0x880   :  { %v2323_v39 = vld [vmem:[#allocation2] sm:$0xff] }
 0x881   :  { %2475 = vmatmul.mubr.f32.vlgmr.msra.gmra.mrb[18].mxu0 %v2323_v39  ;;  %2546 = vmatmul.mubr.f32.vlgmr.msra.gmra.mrb[18].mxu1 %v2323_v39  ;;  %v6115_v39 = vpack.c.bf16 %v2603_v16, %v2599_v17 }
 0x882   :  { %4750 = vmatpush1.bf16.msra.mxu0 %v6053_v7  ;;  %4782 = vmatpush1.bf16.msra.mxu1 %v6055_v37 }
 0x883   :  { %4752 = vmatprep.subr.bf16.mxu0 %v6057_v28  ;;  %4784 = vmatprep.subr.bf16.mxu1 %v6059_v29 }
 0x884   :  { %2685 = vmatprep.mubr.f32.mxu0 %v5462_v1  ;;  %2756 = vmatprep.mubr.f32.mxu1 %v5462_v1 }
 0x886   :  { %4754 = vmatpush1.bf16.msra.mxu0 %v6063_v40  ;;  %4786 = vmatpush1.bf16.msra.mxu1 %v6065_v48 }
 0x887   :  { %4756 = vmatprep.subr.bf16.mxu0 %v6069_v13  ;;  %4788 = vmatprep.subr.bf16.mxu1 %v6071_v14 }
 0x88a   :  { %4758 = vmatpush1.bf16.msra.mxu0 %v6077_v25  ;;  %4790 = vmatpush1.bf16.msra.mxu1 %v6079_v35 }
 0x88b   :  { %4760 = vmatprep.subr.bf16.mxu0 %v6083_v34  ;;  %4792 = vmatprep.subr.bf16.mxu1 %v6085_v50 }
 0x88e   :  { %4762 = vmatpush1.bf16.msra.mxu0 %v6089_v20  ;;  %4794 = vmatpush1.bf16.msra.mxu1 %v6091_v42 }
 0x88f   :  { %4764 = vmatprep.subr.bf16.mxu0 %v6095_v24  ;;  %4796 = vmatprep.subr.bf16.mxu1 %v6097_v41 }
 0x892   :  { %4766 = vmatpush1.bf16.msra.mxu0 %v6101_v47  ;;  %4798 = vmatpush1.bf16.msra.mxu1 %v6103_v49 }
 0x893   :  { %4768 = vmatprep.subr.bf16.mxu0 %v6107_v62  ;;  %4800 = vmatprep.subr.bf16.mxu1 %v6109_v11 }
 0x896   :  { %4770 = vmatpush1.bf16.msra.mxu0 %v6113_v38  ;;  %4802 = vmatpush1.bf16.msra.mxu1 %v6115_v39 }
 0x897   :  { %4772 = vmatprep.subr.bf16.mxu0 %v6119_v60  ;;  %4804 = vmatprep.subr.bf16.mxu1 %v6121_v12 }
 0x89a   :  { %4774 = vmatpush1.bf16.msra.mxu0 %v6125_v54  ;;  %4806 = vmatpush1.bf16.msra.mxu1 %v6127_v32 }
 0x89b   :  { %4776 = vmatprep.subr.bf16.mxu0 %v6131_v23  ;;  %4808 = vmatprep.subr.bf16.mxu1 %v6133_v26 }
 0x89e   :  { %4778 = vmatpush1.bf16.msra.mxu0 %v6137_v53  ;;  %4810 = vmatpush1.bf16.msra.mxu1 %v6139_v51 }
 0x89f   :  { %4812 = vmatprep.subr.bf16.mxu0 %v6043_v33  ;;  %4844 = vmatprep.subr.bf16.mxu1 %v6045_v55 }
 0x8a1   :  { %2686 = vmatmul.mubr.f32.vlgmr.msra.gmra.mrb[20].mxu0 %v5462_v1  ;;  %2757 = vmatmul.mubr.f32.vlgmr.msra.gmra.mrb[20].mxu1 %v5462_v1 }
 0x8a2   :  { %4814 = vmatpush1.bf16.msra.mxu0 %v6053_v7  ;;  %4846 = vmatpush1.bf16.msra.mxu1 %v6055_v37 }
 0x8a3   :  { %4816 = vmatprep.subr.bf16.mxu0 %v6057_v28  ;;  %4848 = vmatprep.subr.bf16.mxu1 %v6059_v29 }
 0x8a4   :  { %2876 = vmatprep.mubr.f32.mxu0 %v5462_v1  ;;  %2947 = vmatprep.mubr.f32.mxu1 %v5462_v1 }
 0x8a6   :  { %4818 = vmatpush1.bf16.msra.mxu0 %v6063_v40  ;;  %4850 = vmatpush1.bf16.msra.mxu1 %v6065_v48 }
 0x8a7   :  { %4820 = vmatprep.subr.bf16.mxu0 %v6069_v13  ;;  %4852 = vmatprep.subr.bf16.mxu1 %v6071_v14 }
 0x8aa   :  { %4822 = vmatpush1.bf16.msra.mxu0 %v6077_v25  ;;  %4854 = vmatpush1.bf16.msra.mxu1 %v6079_v35 }
 0x8ab   :  { %4824 = vmatprep.subr.bf16.mxu0 %v6083_v34  ;;  %4856 = vmatprep.subr.bf16.mxu1 %v6085_v50 }
 0x8ae   :  { %4826 = vmatpush1.bf16.msra.mxu0 %v6089_v20  ;;  %4858 = vmatpush1.bf16.msra.mxu1 %v6091_v42 }
 0x8af   :  { %4828 = vmatprep.subr.bf16.mxu0 %v6095_v24  ;;  %4860 = vmatprep.subr.bf16.mxu1 %v6097_v41 }
 0x8b2   :  { %4830 = vmatpush1.bf16.msra.mxu0 %v6101_v47  ;;  %4862 = vmatpush1.bf16.msra.mxu1 %v6103_v49 }
 0x8b3   :  { %4832 = vmatprep.subr.bf16.mxu0 %v6107_v62  ;;  %4864 = vmatprep.subr.bf16.mxu1 %v6109_v11 }
 0x8b6   :  { %4834 = vmatpush1.bf16.msra.mxu0 %v6113_v38  ;;  %4866 = vmatpush1.bf16.msra.mxu1 %v6115_v39 }
 0x8b7   :  { %4836 = vmatprep.subr.bf16.mxu0 %v6119_v60  ;;  %4868 = vmatprep.subr.bf16.mxu1 %v6121_v12 }
 0x8ba   :  { %4838 = vmatpush1.bf16.msra.mxu0 %v6125_v54  ;;  %4870 = vmatpush1.bf16.msra.mxu1 %v6127_v32 }
 0x8bb   :  { %4840 = vmatprep.subr.bf16.mxu0 %v6131_v23  ;;  %4872 = vmatprep.subr.bf16.mxu1 %v6133_v26 }
 0x8be   :  { %4842 = vmatpush1.bf16.msra.mxu0 %v6137_v53  ;;  %4874 = vmatpush1.bf16.msra.mxu1 %v6139_v51 }
 0x8bf   :  { %4876 = vmatprep.subr.bf16.mxu0 %v6043_v33  ;;  %4908 = vmatprep.subr.bf16.mxu1 %v6045_v55 }
 0x954   :  { %v2476_v46 = vpop.f32.mrb[18].mxu0  ;;  %v2547_v57 = vpop.f32.mrb[18].mxu1 }
 0x955   :  { %v2477_v61 = vadd.f32 %v2476_v46, %v2393_v36  ;;  %v2548_v17 = vadd.f32 %v2547_v57, %v2401_v58  ;;  %v2478_v16 = vpop.f32.mrb[19].mxu0  ;;  %v2549_v18 = vpop.f32.mrb[19].mxu1 }
 0x956   :  { %v2479_v2 = vadd.f32 %v2478_v16, %v2397_v59  ;;  %v2550_v22 = vadd.f32 %v2549_v18, %v2405_v8 }
 0x957   :  { %2552 = vst [vmem:[#allocation3] sm:$0xff] %v2477_v61  ;;  %2554 = vst [vmem:[#allocation3 + $0x10] sm:$0xff] %v2548_v17 }
 0x958   :  { %2553 = vst [vmem:[#allocation3 + $0x8] sm:$0xff] %v2479_v2  ;;  %2555 = vst [vmem:[#allocation3 + $0x18] sm:$0xff] %v2550_v22 }
 0x95f   :  { %v2556_v43 = vld [vmem:[#allocation3] ss:$8 sm:$0xf] }
 0x974   :  { %v2687_v31 = vpop.f32.mrb[20].mxu0  ;;  %v2758_v5 = vpop.f32.mrb[20].mxu1 }
 0x975   :  { %v2689_v44 = vpop.f32.mrb[21].mxu0  ;;  %v2760_v6 = vpop.f32.mrb[21].mxu1 }
 0x976   :  { %v2767_v19 = vcombine.low %v2687_v31, %v2689_v44  ;;  %v2768_v3 = vcombine.low %v2758_v5, %v2760_v6 }
 0x978   :  { %v2775_v4 = vrot.slane %v2767_v19, %v5733_v45  ;;  %v2782_v21 = vrot.slane %v2768_v3, %v5733_v45  ;;  %v2811_v3 = vld [vmem:[#allocation3 + $0x1] ss:$8 sm:$0xf] }
 0x97a   :  { %v2783_v30 = vcombine.low %v2775_v4, %v2782_v21 }
 0x97c   :  { %v2790_v27 = vrot.slane %v2783_v30, %v5733_v45 }
 0x97e   :  { %v2792_v56 = vadd.f32 %v2790_v27, %v2556_v43 }
 0x980   :  { %v2793_v10 = vmul.f32 0.5, %v2792_v56  ;;  %v2798_v15 = vrot.slane %v2792_v56, 3 }
 0x982   :  { %5315 = vtanh.f32 %v2793_v10 }
 0x983   :  { %5317 = vtanh.f32 %v2798_v15 }
 0x98c   :  { %v5316_v52 = vpop.eup %5315 }
 0x98d   :  { %v2795_v63 = vmul.f32 0.5, %v5316_v52  ;;  %v5318_v36 = vpop.eup %5317 }
 0x98f   :  { %v2796_v0 = vadd.f32 0.5, %v2795_v63 }
 0x991   :  { %v2802_v9 = vrot.slane %v2796_v0, 1  ;;  %v2805_v59 = vmul.f32 %v5318_v36, %v2796_v0  ;;  %v2808_v46 = vrot.slane %v2796_v0, 2 }
 0x993   :  { %v2804_v58 = vmul.f32 0.0, %v2802_v9 }
 0x995   :  { %v2806_v8 = vadd.f32 %v2805_v59, %v2804_v58 }
 0x997   :  { %5319 = vtanh.f32 %v2806_v8 }
 0x9a1   :  { %v5320_v57 = vpop.eup %5319 }
 0x9a2   :  { %v2810_v61 = vmul.f32 %v5320_v57, %v2808_v46 }
 0x9a4   :  { %2877 = vmatmul.mubr.f32.vlgmr.msra.gmra.mrb[22].mxu0 %v2810_v61  ;;  %2948 = vmatmul.mubr.f32.vlgmr.msra.gmra.mrb[22].mxu1 %v2810_v61 }
 0x9a5   :  { %4878 = vmatpush1.bf16.msra.mxu0 %v6053_v7  ;;  %4910 = vmatpush1.bf16.msra.mxu1 %v6055_v37 }
 0x9a6   :  { %4880 = vmatprep.subr.bf16.mxu0 %v6057_v28  ;;  %4912 = vmatprep.subr.bf16.mxu1 %v6059_v29 }
 0x9a7   :  { %3067 = vmatprep.mubr.f32.mxu0 %v5462_v1  ;;  %3138 = vmatprep.mubr.f32.mxu1 %v5462_v1 }
 0x9a9   :  { %4882 = vmatpush1.bf16.msra.mxu0 %v6063_v40  ;;  %4914 = vmatpush1.bf16.msra.mxu1 %v6065_v48 }
 0x9aa   :  { %4884 = vmatprep.subr.bf16.mxu0 %v6069_v13  ;;  %4916 = vmatprep.subr.bf16.mxu1 %v6071_v14 }
 0x9ad   :  { %4886 = vmatpush1.bf16.msra.mxu0 %v6077_v25  ;;  %4918 = vmatpush1.bf16.msra.mxu1 %v6079_v35 }
 0x9ae   :  { %4888 = vmatprep.subr.bf16.mxu0 %v6083_v34  ;;  %4920 = vmatprep.subr.bf16.mxu1 %v6085_v50 }
 0x9b1   :  { %4890 = vmatpush1.bf16.msra.mxu0 %v6089_v20  ;;  %4922 = vmatpush1.bf16.msra.mxu1 %v6091_v42 }
 0x9b2   :  { %4892 = vmatprep.subr.bf16.mxu0 %v6095_v24  ;;  %4924 = vmatprep.subr.bf16.mxu1 %v6097_v41 }
 0x9b5   :  { %4894 = vmatpush1.bf16.msra.mxu0 %v6101_v47  ;;  %4926 = vmatpush1.bf16.msra.mxu1 %v6103_v49 }
 0x9b6   :  { %4896 = vmatprep.subr.bf16.mxu0 %v6107_v62  ;;  %4928 = vmatprep.subr.bf16.mxu1 %v6109_v11 }
 0x9b9   :  { %4898 = vmatpush1.bf16.msra.mxu0 %v6113_v38  ;;  %4930 = vmatpush1.bf16.msra.mxu1 %v6115_v39 }
 0x9ba   :  { %4900 = vmatprep.subr.bf16.mxu0 %v6119_v60  ;;  %4932 = vmatprep.subr.bf16.mxu1 %v6121_v12 }
 0x9bd   :  { %4902 = vmatpush1.bf16.msra.mxu0 %v6125_v54  ;;  %4934 = vmatpush1.bf16.msra.mxu1 %v6127_v32 }
 0x9be   :  { %4904 = vmatprep.subr.bf16.mxu0 %v6131_v23  ;;  %4936 = vmatprep.subr.bf16.mxu1 %v6133_v26 }
 0x9c1   :  { %4906 = vmatpush1.bf16.msra.mxu0 %v6137_v53  ;;  %4938 = vmatpush1.bf16.msra.mxu1 %v6139_v51 }
 0x9c2   :  { %4940 = vmatprep.subr.bf16.mxu0 %v6043_v33  ;;  %4972 = vmatprep.subr.bf16.mxu1 %v6045_v55 }
 0xa77   :  { %v2878_v17 = vpop.f32.mrb[22].mxu0  ;;  %v2949_v16 = vpop.f32.mrb[22].mxu1 }
 0xa78   :  { %v2880_v18 = vpop.f32.mrb[23].mxu0  ;;  %v2951_v2 = vpop.f32.mrb[23].mxu1 }
 0xa79   :  { %v2958_v22 = vcombine.low %v2878_v17, %v2880_v18  ;;  %v2959_v31 = vcombine.low %v2949_v16, %v2951_v2 }
 0xa7b   :  { %v2966_v5 = vrot.slane %v2958_v22, %v5733_v45  ;;  %v2973_v44 = vrot.slane %v2959_v31, %v5733_v45  ;;  %v3002_v31 = vld [vmem:[#allocation3 + $0x2] ss:$8 sm:$0xf] }
 0xa7d   :  { %v2974_v6 = vcombine.low %v2966_v5, %v2973_v44 }
 0xa7f   :  { %v2981_v19 = vrot.slane %v2974_v6, %v5733_v45 }
 0xa81   :  { %v2983_v4 = vadd.f32 %v2981_v19, %v2811_v3 }
 0xa83   :  { %v2984_v21 = vmul.f32 0.5, %v2983_v4  ;;  %v2989_v30 = vrot.slane %v2983_v4, 3 }
 0xa85   :  { %5321 = vtanh.f32 %v2984_v21 }
 0xa86   :  { %5323 = vtanh.f32 %v2989_v30 }
 0xa8f   :  { %v5322_v27 = vpop.eup %5321 }
 0xa90   :  { %v2986_v43 = vmul.f32 0.5, %v5322_v27  ;;  %v5324_v15 = vpop.eup %5323 }
 0xa92   :  { %v2987_v56 = vadd.f32 0.5, %v2986_v43 }
 0xa94   :  { %v2993_v10 = vrot.slane %v2987_v56, 1  ;;  %v2996_v63 = vmul.f32 %v5324_v15, %v2987_v56  ;;  %v2999_v9 = vrot.slane %v2987_v56, 2 }
 0xa96   :  { %v2995_v52 = vmul.f32 %v2993_v10, %v2806_v8 }
 0xa98   :  { %v2997_v0 = vadd.f32 %v2996_v63, %v2995_v52 }
 0xa9a   :  { %5325 = vtanh.f32 %v2997_v0 }
 0xaa4   :  { %v5326_v36 = vpop.eup %5325 }
 0xaa5   :  { %v3001_v58 = vmul.f32 %v5326_v36, %v2999_v9 }
 0xaa7   :  { %3068 = vmatmul.mubr.f32.vlgmr.msra.gmra.mrb[24].mxu0 %v3001_v58  ;;  %3139 = vmatmul.mubr.f32.vlgmr.msra.gmra.mrb[24].mxu1 %v3001_v58 }
 0xaa8   :  { %4942 = vmatpush1.bf16.msra.mxu0 %v6053_v7  ;;  %4974 = vmatpush1.bf16.msra.mxu1 %v6055_v37 }
 0xaa9   :  { %4944 = vmatprep.subr.bf16.mxu0 %v6057_v28  ;;  %4976 = vmatprep.subr.bf16.mxu1 %v6059_v29 }
 0xaaa   :  { %3258 = vmatprep.mubr.f32.mxu0 %v5462_v1  ;;  %3329 = vmatprep.mubr.f32.mxu1 %v5462_v1 }
 0xaac   :  { %4946 = vmatpush1.bf16.msra.mxu0 %v6063_v40  ;;  %4978 = vmatpush1.bf16.msra.mxu1 %v6065_v48 }
 0xaad   :  { %4948 = vmatprep.subr.bf16.mxu0 %v6069_v13  ;;  %4980 = vmatprep.subr.bf16.mxu1 %v6071_v14 }
 0xab0   :  { %4950 = vmatpush1.bf16.msra.mxu0 %v6077_v25  ;;  %4982 = vmatpush1.bf16.msra.mxu1 %v6079_v35 }
 0xab1   :  { %4952 = vmatprep.subr.bf16.mxu0 %v6083_v34  ;;  %4984 = vmatprep.subr.bf16.mxu1 %v6085_v50 }
 0xab4   :  { %4954 = vmatpush1.bf16.msra.mxu0 %v6089_v20  ;;  %4986 = vmatpush1.bf16.msra.mxu1 %v6091_v42 }
 0xab5   :  { %4956 = vmatprep.subr.bf16.mxu0 %v6095_v24  ;;  %4988 = vmatprep.subr.bf16.mxu1 %v6097_v41 }
 0xab8   :  { %4958 = vmatpush1.bf16.msra.mxu0 %v6101_v47  ;;  %4990 = vmatpush1.bf16.msra.mxu1 %v6103_v49 }
 0xab9   :  { %4960 = vmatprep.subr.bf16.mxu0 %v6107_v62  ;;  %4992 = vmatprep.subr.bf16.mxu1 %v6109_v11 }
 0xabc   :  { %4962 = vmatpush1.bf16.msra.mxu0 %v6113_v38  ;;  %4994 = vmatpush1.bf16.msra.mxu1 %v6115_v39 }
 0xabd   :  { %4964 = vmatprep.subr.bf16.mxu0 %v6119_v60  ;;  %4996 = vmatprep.subr.bf16.mxu1 %v6121_v12 }
 0xac0   :  { %4966 = vmatpush1.bf16.msra.mxu0 %v6125_v54  ;;  %4998 = vmatpush1.bf16.msra.mxu1 %v6127_v32 }
 0xac1   :  { %4968 = vmatprep.subr.bf16.mxu0 %v6131_v23  ;;  %5000 = vmatprep.subr.bf16.mxu1 %v6133_v26 }
 0xac4   :  { %4970 = vmatpush1.bf16.msra.mxu0 %v6137_v53  ;;  %5002 = vmatpush1.bf16.msra.mxu1 %v6139_v51 }
 0xac5   :  { %5004 = vmatprep.subr.bf16.mxu0 %v6043_v33  ;;  %5036 = vmatprep.subr.bf16.mxu1 %v6045_v55 }
 0xb7a   :  { %v3069_v59 = vpop.f32.mrb[24].mxu0  ;;  %v3140_v8 = vpop.f32.mrb[24].mxu1 }
 0xb7b   :  { %v3071_v46 = vpop.f32.mrb[25].mxu0  ;;  %v3142_v57 = vpop.f32.mrb[25].mxu1 }
 0xb7c   :  { %v3149_v61 = vcombine.low %v3069_v59, %v3071_v46  ;;  %v3150_v17 = vcombine.low %v3140_v8, %v3142_v57 }
 0xb7e   :  { %v3157_v16 = vrot.slane %v3149_v61, %v5733_v45  ;;  %v3164_v18 = vrot.slane %v3150_v17, %v5733_v45  ;;  %v3193_v17 = vld [vmem:[#allocation3 + $0x3] ss:$8 sm:$0xf] }
 0xb80   :  { %v3165_v2 = vcombine.low %v3157_v16, %v3164_v18 }
 0xb82   :  { %v3172_v22 = vrot.slane %v3165_v2, %v5733_v45 }
 0xb84   :  { %v3174_v5 = vadd.f32 %v3172_v22, %v3002_v31 }
 0xb86   :  { %v3175_v44 = vmul.f32 0.5, %v3174_v5  ;;  %v3180_v6 = vrot.slane %v3174_v5, 3 }
 0xb88   :  { %5327 = vtanh.f32 %v3175_v44 }
 0xb89   :  { %5329 = vtanh.f32 %v3180_v6 }
 0xb92   :  { %v5328_v19 = vpop.eup %5327 }
 0xb93   :  { %v3177_v3 = vmul.f32 0.5, %v5328_v19  ;;  %v5330_v30 = vpop.eup %5329 }
 0xb95   :  { %v3178_v4 = vadd.f32 0.5, %v3177_v3 }
 0xb97   :  { %v3184_v21 = vrot.slane %v3178_v4, 1  ;;  %v3187_v43 = vmul.f32 %v5330_v30, %v3178_v4  ;;  %v3190_v10 = vrot.slane %v3178_v4, 2 }
 0xb99   :  { %v3186_v27 = vmul.f32 %v3184_v21, %v2997_v0 }
 0xb9b   :  { %v3188_v56 = vadd.f32 %v3187_v43, %v3186_v27 }
 0xb9d   :  { %5331 = vtanh.f32 %v3188_v56 }
 0xba7   :  { %v5332_v15 = vpop.eup %5331 }
 0xba8   :  { %v3192_v52 = vmul.f32 %v5332_v15, %v3190_v10 }
 0xbaa   :  { %3259 = vmatmul.mubr.f32.vlgmr.msra.gmra.mrb[26].mxu0 %v3192_v52  ;;  %3330 = vmatmul.mubr.f32.vlgmr.msra.gmra.mrb[26].mxu1 %v3192_v52 }
 0xbab   :  { %5006 = vmatpush1.bf16.msra.mxu0 %v6053_v7  ;;  %5038 = vmatpush1.bf16.msra.mxu1 %v6055_v37 }
 0xbac   :  { %5008 = vmatprep.subr.bf16.mxu0 %v6057_v28  ;;  %5040 = vmatprep.subr.bf16.mxu1 %v6059_v29 }
 0xbad   :  { %3449 = vmatprep.mubr.f32.mxu0 %v5462_v1  ;;  %3520 = vmatprep.mubr.f32.mxu1 %v5462_v1 }
 0xbaf   :  { %5010 = vmatpush1.bf16.msra.mxu0 %v6063_v40  ;;  %5042 = vmatpush1.bf16.msra.mxu1 %v6065_v48 }
 0xbb0   :  { %5012 = vmatprep.subr.bf16.mxu0 %v6069_v13  ;;  %5044 = vmatprep.subr.bf16.mxu1 %v6071_v14 }
 0xbb3   :  { %5014 = vmatpush1.bf16.msra.mxu0 %v6077_v25  ;;  %5046 = vmatpush1.bf16.msra.mxu1 %v6079_v35 }
 0xbb4   :  { %5016 = vmatprep.subr.bf16.mxu0 %v6083_v34  ;;  %5048 = vmatprep.subr.bf16.mxu1 %v6085_v50 }
 0xbb7   :  { %5018 = vmatpush1.bf16.msra.mxu0 %v6089_v20  ;;  %5050 = vmatpush1.bf16.msra.mxu1 %v6091_v42 }
 0xbb8   :  { %5020 = vmatprep.subr.bf16.mxu0 %v6095_v24  ;;  %5052 = vmatprep.subr.bf16.mxu1 %v6097_v41 }
 0xbbb   :  { %5022 = vmatpush1.bf16.msra.mxu0 %v6101_v47  ;;  %5054 = vmatpush1.bf16.msra.mxu1 %v6103_v49 }
 0xbbc   :  { %5024 = vmatprep.subr.bf16.mxu0 %v6107_v62  ;;  %5056 = vmatprep.subr.bf16.mxu1 %v6109_v11 }
 0xbbf   :  { %5026 = vmatpush1.bf16.msra.mxu0 %v6113_v38  ;;  %5058 = vmatpush1.bf16.msra.mxu1 %v6115_v39 }
 0xbc0   :  { %5028 = vmatprep.subr.bf16.mxu0 %v6119_v60  ;;  %5060 = vmatprep.subr.bf16.mxu1 %v6121_v12 }
 0xbc3   :  { %5030 = vmatpush1.bf16.msra.mxu0 %v6125_v54  ;;  %5062 = vmatpush1.bf16.msra.mxu1 %v6127_v32 }
 0xbc4   :  { %5032 = vmatprep.subr.bf16.mxu0 %v6131_v23  ;;  %5064 = vmatprep.subr.bf16.mxu1 %v6133_v26 }
 0xbc7   :  { %5034 = vmatpush1.bf16.msra.mxu0 %v6137_v53  ;;  %5066 = vmatpush1.bf16.msra.mxu1 %v6139_v51 }
 0xbc8   :  { %5068 = vmatprep.subr.bf16.mxu0 %v6043_v33  ;;  %5100 = vmatprep.subr.bf16.mxu1 %v6045_v55 }
 0xc7d   :  { %v3260_v63 = vpop.f32.mrb[26].mxu0  ;;  %v3331_v0 = vpop.f32.mrb[26].mxu1 }
 0xc7e   :  { %v3262_v9 = vpop.f32.mrb[27].mxu0  ;;  %v3333_v36 = vpop.f32.mrb[27].mxu1 }
 0xc7f   :  { %v3340_v58 = vcombine.low %v3260_v63, %v3262_v9  ;;  %v3341_v59 = vcombine.low %v3331_v0, %v3333_v36 }
 0xc81   :  { %v3348_v8 = vrot.slane %v3340_v58, %v5733_v45  ;;  %v3355_v46 = vrot.slane %v3341_v59, %v5733_v45  ;;  %v3384_v59 = vld [vmem:[#allocation3 + $0x4] ss:$8 sm:$0xf] }
 0xc83   :  { %v3356_v57 = vcombine.low %v3348_v8, %v3355_v46 }
 0xc85   :  { %v3363_v61 = vrot.slane %v3356_v57, %v5733_v45 }
 0xc87   :  { %v3365_v16 = vadd.f32 %v3363_v61, %v3193_v17 }
 0xc89   :  { %v3366_v18 = vmul.f32 0.5, %v3365_v16  ;;  %v3371_v2 = vrot.slane %v3365_v16, 3 }
 0xc8b   :  { %5333 = vtanh.f32 %v3366_v18 }
 0xc8c   :  { %5335 = vtanh.f32 %v3371_v2 }
 0xc95   :  { %v5334_v22 = vpop.eup %5333 }
 0xc96   :  { %v3368_v31 = vmul.f32 0.5, %v5334_v22  ;;  %v5336_v6 = vpop.eup %5335 }
 0xc98   :  { %v3369_v5 = vadd.f32 0.5, %v3368_v31 }
 0xc9a   :  { %v3375_v44 = vrot.slane %v3369_v5, 1  ;;  %v3378_v3 = vmul.f32 %v5336_v6, %v3369_v5  ;;  %v3381_v21 = vrot.slane %v3369_v5, 2 }
 0xc9c   :  { %v3377_v19 = vmul.f32 %v3375_v44, %v3188_v56 }
 0xc9e   :  { %v3379_v4 = vadd.f32 %v3378_v3, %v3377_v19 }
 0xca0   :  { %5337 = vtanh.f32 %v3379_v4 }
 0xcaa   :  { %v5338_v30 = vpop.eup %5337 }
 0xcab   :  { %v3383_v27 = vmul.f32 %v5338_v30, %v3381_v21 }
 0xcad   :  { %3450 = vmatmul.mubr.f32.vlgmr.msra.gmra.mrb[28].mxu0 %v3383_v27  ;;  %3521 = vmatmul.mubr.f32.vlgmr.msra.gmra.mrb[28].mxu1 %v3383_v27 }
 0xcae   :  { %5070 = vmatpush1.bf16.msra.mxu0 %v6053_v7  ;;  %5102 = vmatpush1.bf16.msra.mxu1 %v6055_v37 }
 0xcaf   :  { %5072 = vmatprep.subr.bf16.mxu0 %v6057_v28  ;;  %5104 = vmatprep.subr.bf16.mxu1 %v6059_v29 }
 0xcb0   :  { %3640 = vmatprep.mubr.f32.mxu0 %v5462_v1  ;;  %3711 = vmatprep.mubr.f32.mxu1 %v5462_v1 }
 0xcb2   :  { %5074 = vmatpush1.bf16.msra.mxu0 %v6063_v40  ;;  %5106 = vmatpush1.bf16.msra.mxu1 %v6065_v48 }
 0xcb3   :  { %5076 = vmatprep.subr.bf16.mxu0 %v6069_v13  ;;  %5108 = vmatprep.subr.bf16.mxu1 %v6071_v14 }
 0xcb6   :  { %5078 = vmatpush1.bf16.msra.mxu0 %v6077_v25  ;;  %5110 = vmatpush1.bf16.msra.mxu1 %v6079_v35 }
 0xcb7   :  { %5080 = vmatprep.subr.bf16.mxu0 %v6083_v34  ;;  %5112 = vmatprep.subr.bf16.mxu1 %v6085_v50 }
 0xcba   :  { %5082 = vmatpush1.bf16.msra.mxu0 %v6089_v20  ;;  %5114 = vmatpush1.bf16.msra.mxu1 %v6091_v42 }
 0xcbb   :  { %5084 = vmatprep.subr.bf16.mxu0 %v6095_v24  ;;  %5116 = vmatprep.subr.bf16.mxu1 %v6097_v41 }
 0xcbe   :  { %5086 = vmatpush1.bf16.msra.mxu0 %v6101_v47  ;;  %5118 = vmatpush1.bf16.msra.mxu1 %v6103_v49 }
 0xcbf   :  { %5088 = vmatprep.subr.bf16.mxu0 %v6107_v62  ;;  %5120 = vmatprep.subr.bf16.mxu1 %v6109_v11 }
 0xcc2   :  { %5090 = vmatpush1.bf16.msra.mxu0 %v6113_v38  ;;  %5122 = vmatpush1.bf16.msra.mxu1 %v6115_v39 }
 0xcc3   :  { %5092 = vmatprep.subr.bf16.mxu0 %v6119_v60  ;;  %5124 = vmatprep.subr.bf16.mxu1 %v6121_v12 }
 0xcc6   :  { %5094 = vmatpush1.bf16.msra.mxu0 %v6125_v54  ;;  %5126 = vmatpush1.bf16.msra.mxu1 %v6127_v32 }
 0xcc7   :  { %5096 = vmatprep.subr.bf16.mxu0 %v6131_v23  ;;  %5128 = vmatprep.subr.bf16.mxu1 %v6133_v26 }
 0xcca   :  { %5098 = vmatpush1.bf16.msra.mxu0 %v6137_v53  ;;  %5130 = vmatpush1.bf16.msra.mxu1 %v6139_v51 }
 0xccb   :  { %5132 = vmatprep.subr.bf16.mxu0 %v6043_v33  ;;  %5164 = vmatprep.subr.bf16.mxu1 %v6045_v55 }
 0xd80   :  { %v3451_v43 = vpop.f32.mrb[28].mxu0  ;;  %v3522_v56 = vpop.f32.mrb[28].mxu1 }
 0xd81   :  { %v3453_v10 = vpop.f32.mrb[29].mxu0  ;;  %v3524_v15 = vpop.f32.mrb[29].mxu1 }
 0xd82   :  { %v3531_v52 = vcombine.low %v3451_v43, %v3453_v10  ;;  %v3532_v63 = vcombine.low %v3522_v56, %v3524_v15 }
 0xd84   :  { %v3539_v0 = vrot.slane %v3531_v52, %v5733_v45  ;;  %v3546_v9 = vrot.slane %v3532_v63, %v5733_v45  ;;  %v3575_v63 = vld [vmem:[#allocation3 + $0x5] ss:$8 sm:$0xf] }
 0xd86   :  { %v3547_v36 = vcombine.low %v3539_v0, %v3546_v9 }
 0xd88   :  { %v3554_v58 = vrot.slane %v3547_v36, %v5733_v45 }
 0xd8a   :  { %v3556_v8 = vadd.f32 %v3554_v58, %v3384_v59 }
 0xd8c   :  { %v3557_v46 = vmul.f32 0.5, %v3556_v8  ;;  %v3562_v57 = vrot.slane %v3556_v8, 3 }
 0xd8e   :  { %5339 = vtanh.f32 %v3557_v46 }
 0xd8f   :  { %5341 = vtanh.f32 %v3562_v57 }
 0xd98   :  { %v5340_v61 = vpop.eup %5339 }
 0xd99   :  { %v3559_v17 = vmul.f32 0.5, %v5340_v61  ;;  %v5342_v2 = vpop.eup %5341 }
 0xd9b   :  { %v3560_v16 = vadd.f32 0.5, %v3559_v17 }
 0xd9d   :  { %v3566_v18 = vrot.slane %v3560_v16, 1  ;;  %v3569_v31 = vmul.f32 %v5342_v2, %v3560_v16  ;;  %v3572_v44 = vrot.slane %v3560_v16, 2 }
 0xd9f   :  { %v3568_v22 = vmul.f32 %v3566_v18, %v3379_v4 }
 0xda1   :  { %v3570_v5 = vadd.f32 %v3569_v31, %v3568_v22 }
 0xda3   :  { %5343 = vtanh.f32 %v3570_v5 }
 0xdad   :  { %v5344_v6 = vpop.eup %5343 }
 0xdae   :  { %v3574_v19 = vmul.f32 %v5344_v6, %v3572_v44  ;;  %v3957_v44 = vld [vmem:[#allocation3 + $0x7] ss:$8 sm:$0xf] }
 0xdb0   :  { %3641 = vmatmul.mubr.f32.vlgmr.msra.gmra.mrb[30].mxu0 %v3574_v19  ;;  %3712 = vmatmul.mubr.f32.vlgmr.msra.gmra.mrb[30].mxu1 %v3574_v19 }
 0xdb1   :  { %5134 = vmatpush1.bf16.msra.mxu0 %v6053_v7  ;;  %5166 = vmatpush1.bf16.msra.mxu1 %v6055_v37 }
 0xdb2   :  { %5136 = vmatprep.subr.bf16.mxu0 %v6057_v28  ;;  %5168 = vmatprep.subr.bf16.mxu1 %v6059_v29 }
 0xdb3   :  { %3831 = vmatprep.mubr.f32.mxu0 %v5462_v1  ;;  %3902 = vmatprep.mubr.f32.mxu1 %v5462_v1 }
 0xdb5   :  { %5138 = vmatpush1.bf16.msra.mxu0 %v6063_v40  ;;  %5170 = vmatpush1.bf16.msra.mxu1 %v6065_v48 }
 0xdb6   :  { %5140 = vmatprep.subr.bf16.mxu0 %v6069_v13  ;;  %5172 = vmatprep.subr.bf16.mxu1 %v6071_v14 }
 0xdb9   :  { %5142 = vmatpush1.bf16.msra.mxu0 %v6077_v25  ;;  %5174 = vmatpush1.bf16.msra.mxu1 %v6079_v35 }
 0xdba   :  { %5144 = vmatprep.subr.bf16.mxu0 %v6083_v34  ;;  %5176 = vmatprep.subr.bf16.mxu1 %v6085_v50 }
 0xdbd   :  { %5146 = vmatpush1.bf16.msra.mxu0 %v6089_v20  ;;  %5178 = vmatpush1.bf16.msra.mxu1 %v6091_v42 }
 0xdbe   :  { %5148 = vmatprep.subr.bf16.mxu0 %v6095_v24  ;;  %5180 = vmatprep.subr.bf16.mxu1 %v6097_v41 }
 0xdc1   :  { %5150 = vmatpush1.bf16.msra.mxu0 %v6101_v47  ;;  %5182 = vmatpush1.bf16.msra.mxu1 %v6103_v49 }
 0xdc2   :  { %5152 = vmatprep.subr.bf16.mxu0 %v6107_v62  ;;  %5184 = vmatprep.subr.bf16.mxu1 %v6109_v11 }
 0xdc5   :  { %5154 = vmatpush1.bf16.msra.mxu0 %v6113_v38  ;;  %5186 = vmatpush1.bf16.msra.mxu1 %v6115_v39 }
 0xdc6   :  { %5156 = vmatprep.subr.bf16.mxu0 %v6119_v60  ;;  %5188 = vmatprep.subr.bf16.mxu1 %v6121_v12 }
 0xdc9   :  { %5158 = vmatpush1.bf16.msra.mxu0 %v6125_v54  ;;  %5190 = vmatpush1.bf16.msra.mxu1 %v6127_v32 }
 0xdca   :  { %5160 = vmatprep.subr.bf16.mxu0 %v6131_v23  ;;  %5192 = vmatprep.subr.bf16.mxu1 %v6133_v26 }
 0xdcd   :  { %5162 = vmatpush1.bf16.msra.mxu0 %v6137_v53  ;;  %5194 = vmatpush1.bf16.msra.mxu1 %v6139_v51 }
 0xdce   :  { %5196 = vmatprep.subr.bf16.mxu0 %v6043_v33  ;;  %5228 = vmatprep.subr.bf16.mxu1 %v6045_v55 }
 0xe83   :  { %v3642_v3 = vpop.f32.mrb[30].mxu0  ;;  %v3713_v4 = vpop.f32.mrb[30].mxu1 }
 0xe84   :  { %v3644_v21 = vpop.f32.mrb[31].mxu0  ;;  %v3715_v30 = vpop.f32.mrb[31].mxu1 }
 0xe85   :  { %v3722_v27 = vcombine.low %v3642_v3, %v3644_v21  ;;  %v3723_v43 = vcombine.low %v3713_v4, %v3715_v30 }
 0xe87   :  { %v3730_v56 = vrot.slane %v3722_v27, %v5733_v45  ;;  %v3737_v10 = vrot.slane %v3723_v43, %v5733_v45 }
 0xe89   :  { %v3738_v15 = vcombine.low %v3730_v56, %v3737_v10 }
 0xe8b   :  { %v3745_v52 = vrot.slane %v3738_v15, %v5733_v45 }
 0xe8d   :  { %v3747_v0 = vadd.f32 %v3745_v52, %v3575_v63 }
 0xe8f   :  { %v3748_v9 = vmul.f32 0.5, %v3747_v0  ;;  %v3753_v33 = vrot.slane %v3747_v0, 3 }
 0xe91   :  { %5345 = vtanh.f32 %v3748_v9 }
 0xe92   :  { %5347 = vtanh.f32 %v3753_v33 }
 0xe9b   :  { %v5346_v55 = vpop.eup %5345 }
 0xe9c   :  { %v3750_v36 = vmul.f32 0.5, %v5346_v55  ;;  %v5348_v8 = vpop.eup %5347 }
 0xe9e   :  { %v3751_v58 = vadd.f32 0.5, %v3750_v36 }
 0xea0   :  { %v3757_v59 = vrot.slane %v3751_v58, 1  ;;  %v3760_v57 = vmul.f32 %v5348_v8, %v3751_v58  ;;  %v3763_v17 = vrot.slane %v3751_v58, 2 }
 0xea2   :  { %v3759_v46 = vmul.f32 %v3757_v59, %v3570_v5 }
 0xea4   :  { %v3761_v61 = vadd.f32 %v3760_v57, %v3759_v46 }
 0xea6   :  { %5349 = vtanh.f32 %v3761_v61 }
 0xeb0   :  { %v5350_v16 = vpop.eup %5349 }
 0xeb1   :  { %v3765_v18 = vmul.f32 %v5350_v16, %v3763_v17 }
 0xeb3   :  { %3832 = vmatmul.mubr.f32.vlgmr.msra.gmra.mrb[32].mxu0 %v3765_v18  ;;  %3903 = vmatmul.mubr.f32.vlgmr.msra.gmra.mrb[32].mxu1 %v3765_v18 }
 0xeb4   :  { %5198 = vmatpush1.bf16.msra.mxu0 %v6053_v7  ;;  %5230 = vmatpush1.bf16.msra.mxu1 %v6055_v37 }
 0xeb5   :  { %5200 = vmatprep.subr.bf16.mxu0 %v6057_v28  ;;  %5232 = vmatprep.subr.bf16.mxu1 %v6059_v29 }
 0xeb6   :  { %4022 = vmatprep.mubr.f32.mxu0 %v5462_v1  ;;  %4093 = vmatprep.mubr.f32.mxu1 %v5462_v1 }
 0xeb8   :  { %5202 = vmatpush1.bf16.msra.mxu0 %v6063_v40  ;;  %5234 = vmatpush1.bf16.msra.mxu1 %v6065_v48 }
 0xeb9   :  { %5204 = vmatprep.subr.bf16.mxu0 %v6069_v13  ;;  %5236 = vmatprep.subr.bf16.mxu1 %v6071_v14 }
 0xebc   :  { %5206 = vmatpush1.bf16.msra.mxu0 %v6077_v25  ;;  %5238 = vmatpush1.bf16.msra.mxu1 %v6079_v35  ;;  %v3766_v35 = vld [vmem:[#allocation3 + $0x6] ss:$8 sm:$0xf] }
 0xebd   :  { %5208 = vmatprep.subr.bf16.mxu0 %v6083_v34  ;;  %5240 = vmatprep.subr.bf16.mxu1 %v6085_v50 }
 0xec0   :  { %5210 = vmatpush1.bf16.msra.mxu0 %v6089_v20  ;;  %5242 = vmatpush1.bf16.msra.mxu1 %v6091_v42 }
 0xec1   :  { %5212 = vmatprep.subr.bf16.mxu0 %v6095_v24  ;;  %5244 = vmatprep.subr.bf16.mxu1 %v6097_v41 }
 0xec4   :  { %5214 = vmatpush1.bf16.msra.mxu0 %v6101_v47  ;;  %5246 = vmatpush1.bf16.msra.mxu1 %v6103_v49 }
 0xec5   :  { %5216 = vmatprep.subr.bf16.mxu0 %v6107_v62  ;;  %5248 = vmatprep.subr.bf16.mxu1 %v6109_v11 }
 0xec8   :  { %5218 = vmatpush1.bf16.msra.mxu0 %v6113_v38  ;;  %5250 = vmatpush1.bf16.msra.mxu1 %v6115_v39 }
 0xec9   :  { %5220 = vmatprep.subr.bf16.mxu0 %v6119_v60  ;;  %5252 = vmatprep.subr.bf16.mxu1 %v6121_v12 }
 0xecc   :  { %5222 = vmatpush1.bf16.msra.mxu0 %v6125_v54  ;;  %5254 = vmatpush1.bf16.msra.mxu1 %v6127_v32 }
 0xecd   :  { %5224 = vmatprep.subr.bf16.mxu0 %v6131_v23  ;;  %5256 = vmatprep.subr.bf16.mxu1 %v6133_v26 }
 0xed0   :  { %5226 = vmatpush1.bf16.msra.mxu0 %v6137_v53  ;;  %5258 = vmatpush1.bf16.msra.mxu1 %v6139_v51 }
 0xf86   :  { %v3833_v1 = vpop.f32.mrb[32].mxu0  ;;  %v3904_v7 = vpop.f32.mrb[32].mxu1 }
 0xf87   :  { %v3835_v37 = vpop.f32.mrb[33].mxu0  ;;  %v3906_v28 = vpop.f32.mrb[33].mxu1 }
 0xf88   :  { %v3913_v29 = vcombine.low %v3833_v1, %v3835_v37  ;;  %v3914_v40 = vcombine.low %v3904_v7, %v3906_v28 }
 0xf8a   :  { %v3921_v48 = vrot.slane %v3913_v29, %v5733_v45  ;;  %v3928_v13 = vrot.slane %v3914_v40, %v5733_v45 }
 0xf8c   :  { %v3929_v14 = vcombine.low %v3921_v48, %v3928_v13 }
 0xf8e   :  { %v3936_v25 = vrot.slane %v3929_v14, %v5733_v45 }
 0xf90   :  { %v3938_v34 = vadd.f32 %v3936_v25, %v3766_v35 }
 0xf92   :  { %v3939_v50 = vmul.f32 0.5, %v3938_v34  ;;  %v3944_v20 = vrot.slane %v3938_v34, 3 }
 0xf94   :  { %5351 = vtanh.f32 %v3939_v50 }
 0xf95   :  { %5353 = vtanh.f32 %v3944_v20 }
 0xf9e   :  { %v5352_v42 = vpop.eup %5351 }
 0xf9f   :  { %v3941_v24 = vmul.f32 0.5, %v5352_v42  ;;  %v5354_v49 = vpop.eup %5353 }
 0xfa1   :  { %v3942_v41 = vadd.f32 0.5, %v3941_v24 }
 0xfa3   :  { %v3948_v47 = vrot.slane %v3942_v41, 1  ;;  %v3951_v11 = vmul.f32 %v5354_v49, %v3942_v41  ;;  %v3954_v39 = vrot.slane %v3942_v41, 2 }
 0xfa5   :  { %v3950_v62 = vmul.f32 %v3948_v47, %v3761_v61 }
 0xfa7   :  { %v3952_v38 = vadd.f32 %v3951_v11, %v3950_v62 }
 0xfa9   :  { %5355 = vtanh.f32 %v3952_v38 }
 0xfb3   :  { %v5356_v60 = vpop.eup %5355 }
 0xfb4   :  { %v3956_v12 = vmul.f32 %v5356_v60, %v3954_v39 }
 0xfb6   :  { %4023 = vmatmul.mubr.f32.vlgmr.msra.gmra.mrb[34].mxu0 %v3956_v12  ;;  %4094 = vmatmul.mubr.f32.vlgmr.msra.gmra.mrb[34].mxu1 %v3956_v12 }
0x1089   :  { %v4024_v54 = vpop.f32.mrb[34].mxu0  ;;  %v4095_v32 = vpop.f32.mrb[34].mxu1 }
0x108a   :  { %v4026_v23 = vpop.f32.mrb[35].mxu0  ;;  %v4097_v26 = vpop.f32.mrb[35].mxu1 }
0x108b   :  { %v4104_v53 = vcombine.low %v4024_v54, %v4026_v23  ;;  %v4105_v51 = vcombine.low %v4095_v32, %v4097_v26 }
0x108d   :  { %v4112_v2 = vrot.slane %v4104_v53, %v5733_v45  ;;  %v4119_v22 = vrot.slane %v4105_v51, %v5733_v45 }
0x108f   :  { %v4120_v31 = vcombine.low %v4112_v2, %v4119_v22 }
0x1091   :  { %v4127_v5 = vrot.slane %v4120_v31, %v5733_v45 }
0x1093   :  { %v4129_v6 = vadd.f32 %v4127_v5, %v3957_v44 }
0x1095   :  { %v4130_v19 = vmul.f32 0.5, %v4129_v6  ;;  %v4135_v3 = vrot.slane %v4129_v6, 3 }
0x1097   :  { %5357 = vtanh.f32 %v4130_v19 }
0x1098   :  { %5359 = vtanh.f32 %v4135_v3 }
0x10a1   :  { %v5358_v4 = vpop.eup %5357 }
0x10a2   :  { %v4132_v21 = vmul.f32 0.5, %v5358_v4  ;;  %v5360_v43 = vpop.eup %5359 }
0x10a4   :  { %v4133_v30 = vadd.f32 0.5, %v4132_v21 }
0x10a6   :  { %v4139_v27 = vrot.slane %v4133_v30, 1  ;;  %v4142_v10 = vmul.f32 %v5360_v43, %v4133_v30  ;;  %v4145_v52 = vrot.slane %v4133_v30, 2 }
0x10a8   :  { %v4141_v56 = vmul.f32 %v4139_v27, %v3952_v38 }
0x10aa   :  { %v4143_v15 = vadd.f32 %v4142_v10, %v4141_v56 }
0x10ac   :  { %5361 = vtanh.f32 %v4143_v15 }
0x10b6   :  { %v5362_v63 = vpop.eup %5361 }
0x10b7   :  { %v4147_v45 = vmul.f32 %v5362_v63, %v4145_v52 }
0x10b9   :  { %4148 = vst [vmem:[#allocation10] sm:$0x1] %v4147_v45 }
0x10ba   :  { %5440 = shalt.err (!%p5437_p0)
}
0x10bb   :  { %s5441_s23 = scalar_lea.hbm %s6435_s7, 16 }
0x10bc   :  { %p5442_p1 = scmp.ne.s32.totalorder %s6435_s7, %s5441_s23  ;;  %p5445_p2 = scmp.lt.u32.totalorder %s5441_s23, %s6435_s7 }
0x10be   :  { %p5447_p3 = pnand %p5445_p2, %p5442_p1 }
0x10c0   :  { %5450 = shalt.err (!%p5447_p3)
}
0x10c1   :  { %4158 = dma.vmem_to_hbm [thread:$0]  %s4156_s18, 16, %s6435_s7, [#allocation6]  }
0x10c2   :  { %5455 = dma.done.wait [#allocation6], 16  }
0x10c3   :  { %5456 = vsyncadd [#allocation6], 4294967280 }
0x10c4   :  { %4162 = vsyncpa [#allocation5], 1 }
0x10c5   :  { %4163 = vsyncpa [#allocation8], 1 }
0x10c6   :  { %4164 = vsyncpa [#allocation6], 1 }

</bundles_post_ra>
